<compile_context>
chip_gen: v5e
topology: v5e:2x2
jax: 0.10.0
libtpu: 0.0.40
codegen_flags: <defaults>
</compile_context>

<pallas_src>
import math

import jax
import jax.numpy as jnp
from jax.experimental import pallas as pl
from jax.experimental.pallas import tpu as pltpu

# MXU operand dtype (accumulation is always f32 via preferred_element_type).
_CDT = jnp.bfloat16

# Row offsets inside the packed small-parameter array (see make_params).
_R_FF1, _R_ATT, _R_CNV, _R_FF2, _N_ROWS = 0, 6, 10, 15, 21

_SQRT_HALF = 0.7071067811865476


# ----------------------------- in-kernel helpers -----------------------------

def _layernorm(x, g, b, eps=1e-5):
    # centred two-pass statistics (the centred value is needed for the output anyway)
    mu = jnp.mean(x, axis=-1, keepdims=True)
    d = x - mu
    var = jnp.mean(d * d, axis=-1, keepdims=True)
    return d * jax.lax.rsqrt(var + eps) * g + b


def _erf(z):
    # Abramowitz & Stegun 7.1.26 (|err| < 1.6e-7): one exp (EUP) + a few VPU FMAs.
    az = jnp.abs(z)
    t = 1.0 / (1.0 + 0.3275911 * az)
    poly = t * (0.254829592 + t * (-0.284496736 + t * (1.421413741
               + t * (-1.453152027 + t * 1.061405429))))
    e = 1.0 - poly * jnp.exp(-az * az)
    return jnp.where(z >= 0.0, e, -e)


def _gelu_erf(x):
    # PyTorch nn.GELU() default (exact / erf form).
    return 0.5 * x * (1.0 + _erf(x * _SQRT_HALF))


def _feedforward(x2, vec_ref, w1_ref, w2_ref, r, dim, mlp):
    # LN -> Linear -> GELU(erf) -> Linear -> LN   (dropouts identity in eval)
    h = _layernorm(x2, vec_ref[r:r + 1, :dim], vec_ref[r + 1:r + 2, :dim])
    h = jnp.dot(h.astype(_CDT), w1_ref[...], preferred_element_type=jnp.float32)
    h = _gelu_erf(h + vec_ref[r + 2:r + 3, :mlp])
    h = jnp.dot(h.astype(_CDT), w2_ref[...], preferred_element_type=jnp.float32)
    h = h + vec_ref[r + 3:r + 4, :dim]
    return _layernorm(h, vec_ref[r + 4:r + 5, :dim], vec_ref[r + 5:r + 6, :dim])


def _attention(x2, vec_ref, wqkv_ref, wout_ref, r, Bt, N, heads, dh):
    # pre-LN -> qkv -> per-head SDPA (scale folded into wq) -> per-head accumulated
    # out projection -> post-LN.  No head concatenations.
    dim = x2.shape[-1]
    inner = heads * dh
    M = Bt * N
    h = _layernorm(x2, vec_ref[r:r + 1, :dim], vec_ref[r + 1:r + 2, :dim])
    qkv = jnp.dot(h.astype(_CDT), wqkv_ref[...],
                  preferred_element_type=jnp.float32)            # (M, 3*inner)
    if Bt > 1:
        qkv = qkv.reshape(Bt, N, 3 * inner)                      # free row-major split

    def head_slice(base):
        if Bt == 1:
            return qkv[:, base:base + dh].astype(_CDT)           # (N, dh)
        return qkv[:, :, base:base + dh].astype(_CDT)            # (Bt, N, dh)

    # TODO(synk): flash-style key-block streaming for long sequences.
    out = None
    for hh in range(heads):
        q = head_slice(hh * dh)
        k = head_slice(inner + hh * dh)
        v = head_slice(2 * inner + hh * dh)
        if Bt == 1:
            s = jnp.einsum('nd,md->nm', q, k, preferred_element_type=jnp.float32)
        else:
            s = jnp.einsum('bnd,bmd->bnm', q, k, preferred_element_type=jnp.float32)
        s = s - jnp.max(s, axis=-1, keepdims=True)
        e = jnp.exp(s)
        p = (e * pl.reciprocal(jnp.sum(e, axis=-1, keepdims=True),
                               approx=True)).astype(_CDT)
        if Bt == 1:
            o = jnp.dot(p, v, preferred_element_type=jnp.float32)
        else:
            o = jnp.einsum('bnm,bmd->bnd', p, v, preferred_element_type=jnp.float32)
        contrib = jnp.dot(o.reshape(M, dh).astype(_CDT),
                          wout_ref[hh * dh:(hh + 1) * dh, :],
                          preferred_element_type=jnp.float32)
        out = contrib if out is None else out + contrib
    return _layernorm(out, vec_ref[r + 2:r + 3, :dim], vec_ref[r + 3:r + 4, :dim])


def _conv_module(x2, vec_ref, w1_ref, wdw_ref, w2_ref, r,
                 Bt, N, dim, ic, ksize, pad_l):
    # LN -> 1x1 conv (dim -> 2*ic) -> GLU -> depthwise conv (eval BN folded)
    # -> Swish -> 1x1 conv (ic -> dim).  Sequence shifts are XLU sublane rolls of
    # the flat (M, ic) slab; the iota mask implements the "same" zero padding and
    # also zeroes rows that wrap across batch boundaries.
    M = Bt * N
    h = _layernorm(x2, vec_ref[r:r + 1, :dim], vec_ref[r + 1:r + 2, :dim])
    h = jnp.dot(h.astype(_CDT), w1_ref[...], preferred_element_type=jnp.float32)
    h = h + vec_ref[r + 2:r + 3, :2 * ic]
    h = h[:, :ic] * jax.nn.sigmoid(h[:, ic:])                    # GLU -> (M, ic)

    wdw = wdw_ref[...]                                           # (K, ic) BN-folded
    # position within each sequence, hoisted out of the tap loop
    pos = jax.lax.broadcasted_iota(jnp.int32, (Bt, N, ic), 1).reshape(M, ic)

    # centre tap: no shift, no mask; conv + folded-BN bias in row r+3.
    acc = h * wdw[pad_l:pad_l + 1, :] + vec_ref[r + 3:r + 4, :ic]
    for k in range(ksize):
        shift = pad_l - k                        # out[n] += h[n - shift] * w[k]
        if k == pad_l or abs(shift) >= N:        # centre done / fully masked tap
            continue
        rolled = pltpu.roll(h, shift=shift % M, axis=0)          # XLU sublane rotate
        valid = jnp.logical_and(pos >= shift, pos - shift < N)
        acc = acc + jnp.where(valid, rolled, 0.0) * wdw[k:k + 1, :]

    acc = acc * jax.nn.sigmoid(acc)                              # Swish
    out = jnp.dot(acc.astype(_CDT), w2_ref[...], preferred_element_type=jnp.float32)
    return out + vec_ref[r + 4:r + 5, :dim]


# ------------------------------- pallas wrapper -------------------------------

def conformer_block(x, params, *, heads, dim_head, kernel_size,
                    block_batch=None, act_vmem_budget=36 << 20):
    B, N, dim = x.shape
    (vec, w_ff1a, w_ff1b, w_qkv, w_out,
     w_cv1, w_dw, w_cv2, w_ff2a, w_ff2b) = params
    mlp = w_ff1a.shape[1]
    ic = w_dw.shape[1]
    inner = heads * dim_head
    assert ic == 2 * dim and w_qkv.shape[1] == 3 * inner
    assert N % 8 == 0, "sequence length must be a multiple of 8 sublanes"
    pad_l = kernel_size // 2

    weight_args = (vec, w_ff1a, w_ff1b, w_qkv, w_out,
                   w_cv1, w_dw, w_cv2, w_ff2a, w_ff2b)
    weight_bytes = sum(int(p.size) * p.dtype.itemsize for p in weight_args)

    def est_vmem(bt):
        m = bt * N
        io = 4 * bt * N * dim * 4                    # double-buffered x in + out
        resid = 2 * m * dim * 4                      # residual + module output
        ff = 2 * m * mlp * 4                         # FF hidden (pre/post GELU)
        attn = m * 3 * inner * 4 + 2 * bt * N * N * 4 + m * dim_head * 4
        conv = m * 2 * ic * 4 + 3 * m * ic * 4       # GLU + acc + rolled tap + iota
        return io + weight_bytes + resid + max(ff, attn, conv)

    if block_batch is None:
        # smallest divisor of B that (a) fits the VMEM budget, (b) keeps >= 2 grid
        # steps when B >= 2 (v7x megacore / pipelining), (c) reaches an MXU-friendly
        # M = Bt*N >= 256 when possible.
        Bt = 1
        for cand in range(1, B + 1):
            if B % cand:
                continue
            if est_vmem(cand) > act_vmem_budget:
                break                                # footprint grows with cand
            if B >= 2 and B // cand < 2:
                continue
            Bt = cand
            if cand * N >= 256:
                break
    else:
        Bt = block_batch
    assert B % Bt == 0
    M = Bt * N
    vmem_limit = int(min(64 << 20, max(32 << 20, (3 * est_vmem(Bt)) // 2)))

    def kernel(x_ref, vec_ref, wf1a_ref, wf1b_ref, wqkv_ref, wout_ref,
               wc1_ref, wdw_ref, wc2_ref, wf2a_ref, wf2b_ref, o_ref):
        # TODO(synk): for very large Bt*N, chunk the FF / conv slabs over M with
        # lax.fori_loop(unroll=True) to bound vreg live ranges.
        xb = x_ref[...].reshape(M, dim)              # flatten batch into matmul M
        xb = xb + _feedforward(xb, vec_ref, wf1a_ref, wf1b_ref, _R_FF1, dim, mlp)
        xb = xb + _attention(xb, vec_ref, wqkv_ref, wout_ref, _R_ATT,
                             Bt, N, heads, dim_head)
        xb = xb + _conv_module(xb, vec_ref, wc1_ref, wdw_ref, wc2_ref, _R_CNV,
                               Bt, N, dim, ic, kernel_size, pad_l)
        xb = xb + _feedforward(xb, vec_ref, wf2a_ref, wf2b_ref, _R_FF2, dim, mlp)
        o_ref[...] = xb.reshape(Bt, N, dim)

    x_spec = pl.BlockSpec((Bt, N, dim), lambda b: (b, 0, 0))
    # Constant-index weights: single-buffered, fetched once (no double-buffer VMEM).
    w_specs = [pl.BlockSpec(p.shape, lambda b: (0, 0),
                            pipeline_mode=pl.Buffered(1))
               for p in weight_args]

    return pl.pallas_call(
        kernel,
        out_shape=jax.ShapeDtypeStruct((B, N, dim), jnp.float32),
        grid_spec=pltpu.PrefetchScalarGridSpec(
            num_scalar_prefetch=0,
            grid=(B // Bt,),
            in_specs=[x_spec] + w_specs,
            out_specs=pl.BlockSpec((Bt, N, dim), lambda b: (b, 0, 0)),
        ),
        compiler_params=pltpu.CompilerParams(
            dimension_semantics=("parallel",),
            vmem_limit_bytes=vmem_limit),
    )(x, *weight_args)


# ----------------------------- deterministic params ---------------------------

def make_params(key, dim, heads, dim_head, mlp_dim, kernel_size,
                weight_dtype=_CDT):
    """Builds (packed_vectors, *weight matrices) for the eval-mode ConformerBlock.

    Layout notes for loading real PyTorch weights:
      * Linear / 1x1-Conv1d weights are stored transposed to (in, out).
      * Depthwise Conv1d weight (ic, 1, K) is stored transposed as (K, ic).
      * The SDPA scale 1/sqrt(dim_head) is folded into the q columns of w_qkv.
      * Eval-mode BatchNorm1d is folded into the depthwise conv weight/bias.
    """
    inner = heads * dim_head
    ic = dim * 2
    keys = iter(jax.random.split(key, 24))

    def rnd(shape, scale=0.05):
        return jax.random.normal(next(keys), shape, jnp.float32) * scale

    # FeedForward 1 / 2
    ff1_w1, ff1_b1 = rnd((dim, mlp_dim)), rnd((mlp_dim,))
    ff1_w2, ff1_b2 = rnd((mlp_dim, dim)), rnd((dim,))
    ff2_w1, ff2_b1 = rnd((dim, mlp_dim)), rnd((mlp_dim,))
    ff2_w2, ff2_b2 = rnd((mlp_dim, dim)), rnd((dim,))

    # Attention (to_qkv / to_out have no bias); fold the SDPA scale into q columns.
    wq = rnd((dim, inner)) * (1.0 / math.sqrt(dim_head))
    wk, wv = rnd((dim, inner)), rnd((dim, inner))
    w_qkv = jnp.concatenate([wq, wk, wv], axis=1)
    w_out = rnd((inner, dim))

    # Conv module
    cv_w1, cv_b1 = rnd((dim, 2 * ic)), rnd((2 * ic,))
    dw_w, dw_b = rnd((kernel_size, ic)), rnd((ic,))
    bn_g = 1.0 + rnd((ic,), 0.1)
    bn_b = rnd((ic,))
    bn_mean = rnd((ic,))
    bn_var = 1.0 + jnp.abs(rnd((ic,), 0.1))
    cv_w2, cv_b2 = rnd((ic, dim)), rnd((dim,))

    # Fold eval-mode BatchNorm1d into the depthwise conv.
    bn_scale = bn_g * jax.lax.rsqrt(bn_var + 1e-5)
    dw_w = dw_w * bn_scale[None, :]
    dw_b = (dw_b - bn_mean) * bn_scale + bn_b

    ones = jnp.ones((dim,), jnp.float32)
    zeros = jnp.zeros((dim,), jnp.float32)
    vec_rows = [
        ones, zeros, ff1_b1, ff1_b2, ones, zeros,      # FF1   (rows 0..5)
        ones, zeros, ones, zeros,                      # attn pre/post LN (6..9)
        ones, zeros, cv_b1, dw_b, cv_b2,               # conv  (10..14)
        ones, zeros, ff2_b1, ff2_b2, ones, zeros,      # FF2   (15..20)
    ]
    assert len(vec_rows) == _N_ROWS
    vw = max(r.shape[0] for r in vec_rows)
    vw = ((vw + 127) // 128) * 128                     # lane-dense packed rows
    vec = jnp.stack([jnp.pad(r, (0, vw - r.shape[0])) for r in vec_rows])

    wd = weight_dtype
    return (vec.astype(jnp.float32),
            ff1_w1.astype(wd), ff1_w2.astype(wd),
            w_qkv.astype(wd), w_out.astype(wd),
            cv_w1.astype(wd), dw_w.astype(jnp.float32), cv_w2.astype(wd),
            ff2_w1.astype(wd), ff2_w2.astype(wd))


# --------------------------- pure-JAX reference check --------------------------

def reference_forward(x, params, *, heads, dim_head, kernel_size):
    (vec, wf1a, wf1b, wqkv, wout, wc1, wdw, wc2, wf2a, wf2b) = params
    B, N, dim = x.shape
    mlp, ic, inner = wf1a.shape[1], wdw.shape[1], heads * dim_head
    pad_l = kernel_size // 2
    pad_r = pad_l - (kernel_size + 1) % 2

    def ln(h, g, b, eps=1e-5):
        mu = jnp.mean(h, -1, keepdims=True)
        var = jnp.mean((h - mu) ** 2, -1, keepdims=True)
        return (h - mu) * jax.lax.rsqrt(var + eps) * g + b

    def ff(h, w1, w2, r):
        h = ln(h, vec[r, :dim], vec[r + 1, :dim])
        h = jnp.dot(h.astype(_CDT), w1, preferred_element_type=jnp.float32) + vec[r + 2, :mlp]
        h = jax.nn.gelu(h, approximate=False)
        h = jnp.dot(h.astype(_CDT), w2, preferred_element_type=jnp.float32) + vec[r + 3, :dim]
        return ln(h, vec[r + 4, :dim], vec[r + 5, :dim])

    def attn(h, r):
        hh = ln(h, vec[r, :dim], vec[r + 1, :dim])
        qkv = jnp.einsum('bnd,de->bne', hh.astype(_CDT), wqkv,
                         preferred_element_type=jnp.float32)
        q, k, v = jnp.split(qkv, 3, axis=-1)
        hf = lambda t: t.reshape(B, N, heads, dim_head).transpose(0, 2, 1, 3)
        q, k, v = map(hf, (q, k, v))
        s = jnp.einsum('bhnd,bhmd->bhnm', q.astype(_CDT), k.astype(_CDT),
                       preferred_element_type=jnp.float32)       # scale folded in wq
        p = jax.nn.softmax(s, axis=-1)
        o = jnp.einsum('bhnm,bhmd->bhnd', p.astype(_CDT), v.astype(_CDT),
                       preferred_element_type=jnp.float32)
        o = o.transpose(0, 2, 1, 3).reshape(B, N, inner)
        o = jnp.dot(o.astype(_CDT), wout, preferred_element_type=jnp.float32)
        return ln(o, vec[r + 2, :dim], vec[r + 3, :dim])

    def conv(h, r):
        hh = ln(h, vec[r, :dim], vec[r + 1, :dim])
        hh = jnp.dot(hh.astype(_CDT), wc1, preferred_element_type=jnp.float32) + vec[r + 2, :2 * ic]
        hh = hh[..., :ic] * jax.nn.sigmoid(hh[..., ic:])
        hp = jnp.pad(hh, ((0, 0), (pad_l, pad_r), (0, 0)))
        acc = jnp.zeros((B, N, ic), jnp.float32) + vec[r + 3, :ic]
        for k in range(kernel_size):
            acc = acc + hp[:, k:k + N, :] * wdw[k]
        acc = acc * jax.nn.sigmoid(acc)
        return jnp.dot(acc.astype(_CDT), wc2, preferred_element_type=jnp.float32) + vec[r + 4, :dim]

    h = x
    h = h + ff(h, wf1a, wf1b, _R_FF1)
    h = h + attn(h, _R_ATT)
    h = h + conv(h, _R_CNV)
    h = h + ff(h, wf2a, wf2b, _R_FF2)
    return h


# ------------------------------------ main ------------------------------------

if __name__ == "__main__":
    B, N = 2, 16
    dim, heads, dim_head, mlp_dim = 128, 2, 128, 256     # 128-wide => lane-dense
    conv_kernel_size = 31                                 # module default

    key = jax.random.PRNGKey(0)
    kx, kp = jax.random.split(key)
    x = jax.random.normal(kx, (B, N, dim), jnp.float32)
    params = make_params(kp, dim, heads, dim_head, mlp_dim, conv_kernel_size)

    out = conformer_block(x, params, heads=heads, dim_head=dim_head,
                          kernel_size=conv_kernel_size)
    jax.block_until_ready(out)
    assert out.shape == (B, N, dim)
    assert bool(jnp.all(jnp.isfinite(out)))

    ref = reference_forward(x, params, heads=heads, dim_head=dim_head,
                            kernel_size=conv_kernel_size)
    max_err = float(jnp.max(jnp.abs(out - ref)))
    assert max_err < 5e-2, f"max abs error vs reference: {max_err}"

    print("KERNEL_OK")
</pallas_src>

<mosaic_0001>
module attributes {stable_mosaic.version = 11 : i64} {
  func.func @kernel(%arg0: i32, %arg1: memref<1x16x128xf32, #tpu.memory_space<vmem>>, %arg2: memref<21x512xf32, #tpu.memory_space<vmem>>, %arg3: memref<128x256xbf16, #tpu.memory_space<vmem>>, %arg4: memref<256x128xbf16, #tpu.memory_space<vmem>>, %arg5: memref<128x768xbf16, #tpu.memory_space<vmem>>, %arg6: memref<256x128xbf16, #tpu.memory_space<vmem>>, %arg7: memref<128x512xbf16, #tpu.memory_space<vmem>>, %arg8: memref<31x256xf32, #tpu.memory_space<vmem>>, %arg9: memref<256x128xbf16, #tpu.memory_space<vmem>>, %arg10: memref<128x256xbf16, #tpu.memory_space<vmem>>, %arg11: memref<256x128xbf16, #tpu.memory_space<vmem>>, %arg12: memref<1x16x128xf32, #tpu.memory_space<vmem>>) attributes {dimension_semantics = [#tpu.dimension_semantics<parallel>], iteration_bounds = array<i64: 2>, scalar_prefetch = 0 : i64, scratch_operands = 0 : i64, tpu.core_type = #tpu.core_type<tc>, window_params = [{transform_indices = @transform_0, window_bounds = array<i64: 1, 16, 128>}, {pipeline_mode = #tpu.pipeline_mode<synchronous>, transform_indices = @transform_1, window_bounds = array<i64: 21, 512>}, {pipeline_mode = #tpu.pipeline_mode<synchronous>, transform_indices = @transform_2, window_bounds = array<i64: 128, 256>}, {pipeline_mode = #tpu.pipeline_mode<synchronous>, transform_indices = @transform_3, window_bounds = array<i64: 256, 128>}, {pipeline_mode = #tpu.pipeline_mode<synchronous>, transform_indices = @transform_4, window_bounds = array<i64: 128, 768>}, {pipeline_mode = #tpu.pipeline_mode<synchronous>, transform_indices = @transform_5, window_bounds = array<i64: 256, 128>}, {pipeline_mode = #tpu.pipeline_mode<synchronous>, transform_indices = @transform_6, window_bounds = array<i64: 128, 512>}, {pipeline_mode = #tpu.pipeline_mode<synchronous>, transform_indices = @transform_7, window_bounds = array<i64: 31, 256>}, {pipeline_mode = #tpu.pipeline_mode<synchronous>, transform_indices = @transform_8, window_bounds = array<i64: 256, 128>}, {pipeline_mode = #tpu.pipeline_mode<synchronous>, transform_indices = @transform_9, window_bounds = array<i64: 128, 256>}, {pipeline_mode = #tpu.pipeline_mode<synchronous>, transform_indices = @transform_10, window_bounds = array<i64: 256, 128>}, {transform_indices = @transform_11, window_bounds = array<i64: 1, 16, 128>}]} {
    %c0 = arith.constant 0 : index
    %c0_0 = arith.constant 0 : index
    %c0_1 = arith.constant 0 : index
    %0 = vector.load %arg1[%c0, %c0_0, %c0_1] : memref<1x16x128xf32, #tpu.memory_space<vmem>>, vector<1x16x128xf32>
    %1 = vector.shape_cast %0 : vector<1x16x128xf32> to vector<16x128xf32>
    %c0_2 = arith.constant 0 : index
    %c0_3 = arith.constant 0 : index
    %2 = vector.load %arg2[%c0_2, %c0_3] : memref<21x512xf32, #tpu.memory_space<vmem>>, vector<1x128xf32>
    %c1 = arith.constant 1 : index
    %c0_4 = arith.constant 0 : index
    %3 = vector.load %arg2[%c1, %c0_4] : memref<21x512xf32, #tpu.memory_space<vmem>>, vector<1x128xf32>
    %cst = arith.constant dense<0.000000e+00> : vector<16xf32>
    %4 = vector.multi_reduction <add>, %1, %cst [1] : vector<16x128xf32> to vector<16xf32>
    %5 = vector.shape_cast %4 : vector<16xf32> to vector<16x1xf32>
    %cst_5 = arith.constant 1.280000e+02 : f32
    %6 = vector.broadcast %cst_5 : f32 to vector<16x1xf32>
    %7 = arith.divf %5, %6 : vector<16x1xf32>
    %8 = vector.broadcast %7 : vector<16x1xf32> to vector<16x128xf32>
    %9 = arith.subf %1, %8 : vector<16x128xf32>
    %10 = arith.mulf %9, %9 : vector<16x128xf32>
    %cst_6 = arith.constant dense<0.000000e+00> : vector<16xf32>
    %11 = vector.multi_reduction <add>, %10, %cst_6 [1] : vector<16x128xf32> to vector<16xf32>
    %12 = vector.shape_cast %11 : vector<16xf32> to vector<16x1xf32>
    %cst_7 = arith.constant 1.280000e+02 : f32
    %13 = vector.broadcast %cst_7 : f32 to vector<16x1xf32>
    %14 = arith.divf %12, %13 : vector<16x1xf32>
    %cst_8 = arith.constant 9.99999974E-6 : f32
    %15 = vector.broadcast %cst_8 : f32 to vector<16x1xf32>
    %16 = arith.addf %14, %15 : vector<16x1xf32>
    %17 = math.rsqrt %16 : vector<16x1xf32>
    %18 = vector.broadcast %17 : vector<16x1xf32> to vector<16x128xf32>
    %19 = arith.mulf %9, %18 : vector<16x128xf32>
    %20 = vector.broadcast %2 : vector<1x128xf32> to vector<16x128xf32>
    %21 = arith.mulf %19, %20 : vector<16x128xf32>
    %22 = vector.broadcast %3 : vector<1x128xf32> to vector<16x128xf32>
    %23 = arith.addf %21, %22 : vector<16x128xf32>
    %24 = arith.truncf %23 : vector<16x128xf32> to vector<16x128xbf16>
    %c0_9 = arith.constant 0 : index
    %c0_10 = arith.constant 0 : index
    %25 = vector.load %arg3[%c0_9, %c0_10] : memref<128x256xbf16, #tpu.memory_space<vmem>>, vector<128x256xbf16>
    %cst_11 = arith.constant dense<0.000000e+00> : vector<16x256xf32>
    %26 = tpu.matmul %24, %25, %cst_11 {dimension_numbers = #tpu.dot_dimension_numbers<[1], [0], [0], [1], [0, 0, 1, 1], [], []>} : vector<16x128xbf16>, vector<128x256xbf16>, vector<16x256xf32> -> vector<16x256xf32>
    %c2 = arith.constant 2 : index
    %c0_12 = arith.constant 0 : index
    %27 = vector.load %arg2[%c2, %c0_12] : memref<21x512xf32, #tpu.memory_space<vmem>>, vector<1x256xf32>
    %28 = vector.broadcast %27 : vector<1x256xf32> to vector<16x256xf32>
    %29 = arith.addf %26, %28 : vector<16x256xf32>
    %cst_13 = arith.constant 5.000000e-01 : f32
    %30 = vector.broadcast %cst_13 : f32 to vector<16x256xf32>
    %31 = arith.mulf %30, %29 : vector<16x256xf32>
    %cst_14 = arith.constant 0.707106769 : f32
    %32 = vector.broadcast %cst_14 : f32 to vector<16x256xf32>
    %33 = arith.mulf %29, %32 : vector<16x256xf32>
    %34 = math.absf %33 : vector<16x256xf32>
    %cst_15 = arith.constant 0.327591091 : f32
    %35 = vector.broadcast %cst_15 : f32 to vector<16x256xf32>
    %36 = arith.mulf %35, %34 : vector<16x256xf32>
    %cst_16 = arith.constant 1.000000e+00 : f32
    %37 = vector.broadcast %cst_16 : f32 to vector<16x256xf32>
    %38 = arith.addf %37, %36 : vector<16x256xf32>
    %cst_17 = arith.constant 1.000000e+00 : f32
    %39 = vector.broadcast %cst_17 : f32 to vector<16x256xf32>
    %40 = arith.divf %39, %38 : vector<16x256xf32>
    %cst_18 = arith.constant 1.06140542 : f32
    %41 = vector.broadcast %cst_18 : f32 to vector<16x256xf32>
    %42 = arith.mulf %40, %41 : vector<16x256xf32>
    %cst_19 = arith.constant -1.45315206 : f32
    %43 = vector.broadcast %cst_19 : f32 to vector<16x256xf32>
    %44 = arith.addf %43, %42 : vector<16x256xf32>
    %45 = arith.mulf %40, %44 : vector<16x256xf32>
    %cst_20 = arith.constant 1.42141378 : f32
    %46 = vector.broadcast %cst_20 : f32 to vector<16x256xf32>
    %47 = arith.addf %46, %45 : vector<16x256xf32>
    %48 = arith.mulf %40, %47 : vector<16x256xf32>
    %cst_21 = arith.constant -0.284496725 : f32
    %49 = vector.broadcast %cst_21 : f32 to vector<16x256xf32>
    %50 = arith.addf %49, %48 : vector<16x256xf32>
    %51 = arith.mulf %40, %50 : vector<16x256xf32>
    %cst_22 = arith.constant 0.254829586 : f32
    %52 = vector.broadcast %cst_22 : f32 to vector<16x256xf32>
    %53 = arith.addf %52, %51 : vector<16x256xf32>
    %54 = arith.mulf %40, %53 : vector<16x256xf32>
    %cst_23 = arith.constant 0.000000e+00 : f32
    %55 = vector.broadcast %cst_23 : f32 to vector<16x256xf32>
    %56 = arith.subf %55, %34 : vector<16x256xf32>
    %57 = arith.mulf %56, %34 : vector<16x256xf32>
    %58 = math.exp %57 : vector<16x256xf32>
    %59 = arith.mulf %54, %58 : vector<16x256xf32>
    %cst_24 = arith.constant 1.000000e+00 : f32
    %60 = vector.broadcast %cst_24 : f32 to vector<16x256xf32>
    %61 = arith.subf %60, %59 : vector<16x256xf32>
    %cst_25 = arith.constant 0.000000e+00 : f32
    %62 = vector.broadcast %cst_25 : f32 to vector<16x256xf32>
    %63 = arith.cmpf oge, %33, %62 : vector<16x256xf32>
    %cst_26 = arith.constant 0.000000e+00 : f32
    %64 = vector.broadcast %cst_26 : f32 to vector<16x256xf32>
    %65 = arith.subf %64, %61 : vector<16x256xf32>
    %66 = arith.select %63, %61, %65 : vector<16x256xi1>, vector<16x256xf32>
    %cst_27 = arith.constant 1.000000e+00 : f32
    %67 = vector.broadcast %cst_27 : f32 to vector<16x256xf32>
    %68 = arith.addf %67, %66 : vector<16x256xf32>
    %69 = arith.mulf %31, %68 : vector<16x256xf32>
    %70 = arith.truncf %69 : vector<16x256xf32> to vector<16x256xbf16>
    %c0_28 = arith.constant 0 : index
    %c0_29 = arith.constant 0 : index
    %71 = vector.load %arg4[%c0_28, %c0_29] : memref<256x128xbf16, #tpu.memory_space<vmem>>, vector<256x128xbf16>
    %cst_30 = arith.constant dense<0.000000e+00> : vector<16x128xf32>
    %72 = tpu.matmul %70, %71, %cst_30 {dimension_numbers = #tpu.dot_dimension_numbers<[1], [0], [0], [1], [0, 0, 1, 1], [], []>} : vector<16x256xbf16>, vector<256x128xbf16>, vector<16x128xf32> -> vector<16x128xf32>
    %c3 = arith.constant 3 : index
    %c0_31 = arith.constant 0 : index
    %73 = vector.load %arg2[%c3, %c0_31] : memref<21x512xf32, #tpu.memory_space<vmem>>, vector<1x128xf32>
    %74 = vector.broadcast %73 : vector<1x128xf32> to vector<16x128xf32>
    %75 = arith.addf %72, %74 : vector<16x128xf32>
    %c4 = arith.constant 4 : index
    %c0_32 = arith.constant 0 : index
    %76 = vector.load %arg2[%c4, %c0_32] : memref<21x512xf32, #tpu.memory_space<vmem>>, vector<1x128xf32>
    %c5 = arith.constant 5 : index
    %c0_33 = arith.constant 0 : index
    %77 = vector.load %arg2[%c5, %c0_33] : memref<21x512xf32, #tpu.memory_space<vmem>>, vector<1x128xf32>
    %cst_34 = arith.constant dense<0.000000e+00> : vector<16xf32>
    %78 = vector.multi_reduction <add>, %75, %cst_34 [1] : vector<16x128xf32> to vector<16xf32>
    %79 = vector.shape_cast %78 : vector<16xf32> to vector<16x1xf32>
    %cst_35 = arith.constant 1.280000e+02 : f32
    %80 = vector.broadcast %cst_35 : f32 to vector<16x1xf32>
    %81 = arith.divf %79, %80 : vector<16x1xf32>
    %82 = vector.broadcast %81 : vector<16x1xf32> to vector<16x128xf32>
    %83 = arith.subf %75, %82 : vector<16x128xf32>
    %84 = arith.mulf %83, %83 : vector<16x128xf32>
    %cst_36 = arith.constant dense<0.000000e+00> : vector<16xf32>
    %85 = vector.multi_reduction <add>, %84, %cst_36 [1] : vector<16x128xf32> to vector<16xf32>
    %86 = vector.shape_cast %85 : vector<16xf32> to vector<16x1xf32>
    %cst_37 = arith.constant 1.280000e+02 : f32
    %87 = vector.broadcast %cst_37 : f32 to vector<16x1xf32>
    %88 = arith.divf %86, %87 : vector<16x1xf32>
    %cst_38 = arith.constant 9.99999974E-6 : f32
    %89 = vector.broadcast %cst_38 : f32 to vector<16x1xf32>
    %90 = arith.addf %88, %89 : vector<16x1xf32>
    %91 = math.rsqrt %90 : vector<16x1xf32>
    %92 = vector.broadcast %91 : vector<16x1xf32> to vector<16x128xf32>
    %93 = arith.mulf %83, %92 : vector<16x128xf32>
    %94 = vector.broadcast %76 : vector<1x128xf32> to vector<16x128xf32>
    %95 = arith.mulf %93, %94 : vector<16x128xf32>
    %96 = vector.broadcast %77 : vector<1x128xf32> to vector<16x128xf32>
    %97 = arith.addf %95, %96 : vector<16x128xf32>
    %98 = arith.addf %1, %97 : vector<16x128xf32>
    %c6 = arith.constant 6 : index
    %c0_39 = arith.constant 0 : index
    %99 = vector.load %arg2[%c6, %c0_39] : memref<21x512xf32, #tpu.memory_space<vmem>>, vector<1x128xf32>
    %c7 = arith.constant 7 : index
    %c0_40 = arith.constant 0 : index
    %100 = vector.load %arg2[%c7, %c0_40] : memref<21x512xf32, #tpu.memory_space<vmem>>, vector<1x128xf32>
    %cst_41 = arith.constant dense<0.000000e+00> : vector<16xf32>
    %101 = vector.multi_reduction <add>, %98, %cst_41 [1] : vector<16x128xf32> to vector<16xf32>
    %102 = vector.shape_cast %101 : vector<16xf32> to vector<16x1xf32>
    %cst_42 = arith.constant 1.280000e+02 : f32
    %103 = vector.broadcast %cst_42 : f32 to vector<16x1xf32>
    %104 = arith.divf %102, %103 : vector<16x1xf32>
    %105 = vector.broadcast %104 : vector<16x1xf32> to vector<16x128xf32>
    %106 = arith.subf %98, %105 : vector<16x128xf32>
    %107 = arith.mulf %106, %106 : vector<16x128xf32>
    %cst_43 = arith.constant dense<0.000000e+00> : vector<16xf32>
    %108 = vector.multi_reduction <add>, %107, %cst_43 [1] : vector<16x128xf32> to vector<16xf32>
    %109 = vector.shape_cast %108 : vector<16xf32> to vector<16x1xf32>
    %cst_44 = arith.constant 1.280000e+02 : f32
    %110 = vector.broadcast %cst_44 : f32 to vector<16x1xf32>
    %111 = arith.divf %109, %110 : vector<16x1xf32>
    %cst_45 = arith.constant 9.99999974E-6 : f32
    %112 = vector.broadcast %cst_45 : f32 to vector<16x1xf32>
    %113 = arith.addf %111, %112 : vector<16x1xf32>
    %114 = math.rsqrt %113 : vector<16x1xf32>
    %115 = vector.broadcast %114 : vector<16x1xf32> to vector<16x128xf32>
    %116 = arith.mulf %106, %115 : vector<16x128xf32>
    %117 = vector.broadcast %99 : vector<1x128xf32> to vector<16x128xf32>
    %118 = arith.mulf %116, %117 : vector<16x128xf32>
    %119 = vector.broadcast %100 : vector<1x128xf32> to vector<16x128xf32>
    %120 = arith.addf %118, %119 : vector<16x128xf32>
    %121 = arith.truncf %120 : vector<16x128xf32> to vector<16x128xbf16>
    %c0_46 = arith.constant 0 : index
    %c0_47 = arith.constant 0 : index
    %122 = vector.load %arg5[%c0_46, %c0_47] : memref<128x768xbf16, #tpu.memory_space<vmem>>, vector<128x768xbf16>
    %cst_48 = arith.constant dense<0.000000e+00> : vector<16x768xf32>
    %123 = tpu.matmul %121, %122, %cst_48 {dimension_numbers = #tpu.dot_dimension_numbers<[1], [0], [0], [1], [0, 0, 1, 1], [], []>} : vector<16x128xbf16>, vector<128x768xbf16>, vector<16x768xf32> -> vector<16x768xf32>
    %124 = vector.extract_strided_slice %123 {offsets = [0, 0], sizes = [16, 128], strides = [1, 1]} : vector<16x768xf32> to vector<16x128xf32>
    %125 = arith.truncf %124 : vector<16x128xf32> to vector<16x128xbf16>
    %126 = vector.extract_strided_slice %123 {offsets = [0, 256], sizes = [16, 128], strides = [1, 1]} : vector<16x768xf32> to vector<16x128xf32>
    %127 = arith.truncf %126 : vector<16x128xf32> to vector<16x128xbf16>
    %128 = vector.extract_strided_slice %123 {offsets = [0, 512], sizes = [16, 128], strides = [1, 1]} : vector<16x768xf32> to vector<16x128xf32>
    %129 = arith.truncf %128 : vector<16x128xf32> to vector<16x128xbf16>
    "tpu.trace_start"() <{level = 10 : i32, message = "nd,md->nm"}> : () -> ()
    %cst_49 = arith.constant dense<0.000000e+00> : vector<16x16xf32>
    %130 = tpu.matmul %125, %127, %cst_49 {dimension_numbers = #tpu.dot_dimension_numbers<[1], [1], [0], [0], [0, 0, 1, 0], [], []>} : vector<16x128xbf16>, vector<16x128xbf16>, vector<16x16xf32> -> vector<16x16xf32>
    "tpu.trace_stop"() : () -> ()
    %cst_50 = arith.constant dense<0xFF800000> : vector<16xf32>
    %131 = vector.multi_reduction <maximumf>, %130, %cst_50 [1] : vector<16x16xf32> to vector<16xf32>
    %132 = vector.shape_cast %131 : vector<16xf32> to vector<16x1xf32>
    %133 = vector.broadcast %132 : vector<16x1xf32> to vector<16x16xf32>
    %134 = arith.subf %130, %133 : vector<16x16xf32>
    %135 = math.exp %134 : vector<16x16xf32>
    %cst_51 = arith.constant dense<0.000000e+00> : vector<16xf32>
    %136 = vector.multi_reduction <add>, %135, %cst_51 [1] : vector<16x16xf32> to vector<16xf32>
    %137 = vector.shape_cast %136 : vector<16xf32> to vector<16x1xf32>
    %138 = tpu.reciprocal %137 {approx = true} : vector<16x1xf32> -> vector<16x1xf32>
    %139 = vector.broadcast %138 : vector<16x1xf32> to vector<16x16xf32>
    %140 = arith.mulf %135, %139 : vector<16x16xf32>
    %141 = arith.truncf %140 : vector<16x16xf32> to vector<16x16xbf16>
    %cst_52 = arith.constant dense<0.000000e+00> : vector<16x128xf32>
    %142 = tpu.matmul %141, %129, %cst_52 {dimension_numbers = #tpu.dot_dimension_numbers<[1], [0], [0], [1], [0, 0, 1, 1], [], []>} : vector<16x16xbf16>, vector<16x128xbf16>, vector<16x128xf32> -> vector<16x128xf32>
    %143 = arith.truncf %142 : vector<16x128xf32> to vector<16x128xbf16>
    %c0_53 = arith.constant 0 : index
    %c0_54 = arith.constant 0 : index
    %144 = vector.load %arg6[%c0_53, %c0_54] : memref<256x128xbf16, #tpu.memory_space<vmem>>, vector<128x128xbf16>
    %cst_55 = arith.constant dense<0.000000e+00> : vector<16x128xf32>
    %145 = tpu.matmul %143, %144, %cst_55 {dimension_numbers = #tpu.dot_dimension_numbers<[1], [0], [0], [1], [0, 0, 1, 1], [], []>} : vector<16x128xbf16>, vector<128x128xbf16>, vector<16x128xf32> -> vector<16x128xf32>
    %146 = vector.extract_strided_slice %123 {offsets = [0, 128], sizes = [16, 128], strides = [1, 1]} : vector<16x768xf32> to vector<16x128xf32>
    %147 = arith.truncf %146 : vector<16x128xf32> to vector<16x128xbf16>
    %148 = vector.extract_strided_slice %123 {offsets = [0, 384], sizes = [16, 128], strides = [1, 1]} : vector<16x768xf32> to vector<16x128xf32>
    %149 = arith.truncf %148 : vector<16x128xf32> to vector<16x128xbf16>
    %150 = vector.extract_strided_slice %123 {offsets = [0, 640], sizes = [16, 128], strides = [1, 1]} : vector<16x768xf32> to vector<16x128xf32>
    %151 = arith.truncf %150 : vector<16x128xf32> to vector<16x128xbf16>
    "tpu.trace_start"() <{level = 10 : i32, message = "nd,md->nm"}> : () -> ()
    %cst_56 = arith.constant dense<0.000000e+00> : vector<16x16xf32>
    %152 = tpu.matmul %147, %149, %cst_56 {dimension_numbers = #tpu.dot_dimension_numbers<[1], [1], [0], [0], [0, 0, 1, 0], [], []>} : vector<16x128xbf16>, vector<16x128xbf16>, vector<16x16xf32> -> vector<16x16xf32>
    "tpu.trace_stop"() : () -> ()
    %cst_57 = arith.constant dense<0xFF800000> : vector<16xf32>
    %153 = vector.multi_reduction <maximumf>, %152, %cst_57 [1] : vector<16x16xf32> to vector<16xf32>
    %154 = vector.shape_cast %153 : vector<16xf32> to vector<16x1xf32>
    %155 = vector.broadcast %154 : vector<16x1xf32> to vector<16x16xf32>
    %156 = arith.subf %152, %155 : vector<16x16xf32>
    %157 = math.exp %156 : vector<16x16xf32>
    %cst_58 = arith.constant dense<0.000000e+00> : vector<16xf32>
    %158 = vector.multi_reduction <add>, %157, %cst_58 [1] : vector<16x16xf32> to vector<16xf32>
    %159 = vector.shape_cast %158 : vector<16xf32> to vector<16x1xf32>
    %160 = tpu.reciprocal %159 {approx = true} : vector<16x1xf32> -> vector<16x1xf32>
    %161 = vector.broadcast %160 : vector<16x1xf32> to vector<16x16xf32>
    %162 = arith.mulf %157, %161 : vector<16x16xf32>
    %163 = arith.truncf %162 : vector<16x16xf32> to vector<16x16xbf16>
    %cst_59 = arith.constant dense<0.000000e+00> : vector<16x128xf32>
    %164 = tpu.matmul %163, %151, %cst_59 {dimension_numbers = #tpu.dot_dimension_numbers<[1], [0], [0], [1], [0, 0, 1, 1], [], []>} : vector<16x16xbf16>, vector<16x128xbf16>, vector<16x128xf32> -> vector<16x128xf32>
    %165 = arith.truncf %164 : vector<16x128xf32> to vector<16x128xbf16>
    %c128 = arith.constant 128 : index
    %c0_60 = arith.constant 0 : index
    %166 = vector.load %arg6[%c128, %c0_60] : memref<256x128xbf16, #tpu.memory_space<vmem>>, vector<128x128xbf16>
    %cst_61 = arith.constant dense<0.000000e+00> : vector<16x128xf32>
    %167 = tpu.matmul %165, %166, %cst_61 {dimension_numbers = #tpu.dot_dimension_numbers<[1], [0], [0], [1], [0, 0, 1, 1], [], []>} : vector<16x128xbf16>, vector<128x128xbf16>, vector<16x128xf32> -> vector<16x128xf32>
    %168 = arith.addf %145, %167 : vector<16x128xf32>
    %c8 = arith.constant 8 : index
    %c0_62 = arith.constant 0 : index
    %169 = vector.load %arg2[%c8, %c0_62] : memref<21x512xf32, #tpu.memory_space<vmem>>, vector<1x128xf32>
    %c9 = arith.constant 9 : index
    %c0_63 = arith.constant 0 : index
    %170 = vector.load %arg2[%c9, %c0_63] : memref<21x512xf32, #tpu.memory_space<vmem>>, vector<1x128xf32>
    %cst_64 = arith.constant dense<0.000000e+00> : vector<16xf32>
    %171 = vector.multi_reduction <add>, %168, %cst_64 [1] : vector<16x128xf32> to vector<16xf32>
    %172 = vector.shape_cast %171 : vector<16xf32> to vector<16x1xf32>
    %cst_65 = arith.constant 1.280000e+02 : f32
    %173 = vector.broadcast %cst_65 : f32 to vector<16x1xf32>
    %174 = arith.divf %172, %173 : vector<16x1xf32>
    %175 = vector.broadcast %174 : vector<16x1xf32> to vector<16x128xf32>
    %176 = arith.subf %168, %175 : vector<16x128xf32>
    %177 = arith.mulf %176, %176 : vector<16x128xf32>
    %cst_66 = arith.constant dense<0.000000e+00> : vector<16xf32>
    %178 = vector.multi_reduction <add>, %177, %cst_66 [1] : vector<16x128xf32> to vector<16xf32>
    %179 = vector.shape_cast %178 : vector<16xf32> to vector<16x1xf32>
    %cst_67 = arith.constant 1.280000e+02 : f32
    %180 = vector.broadcast %cst_67 : f32 to vector<16x1xf32>
    %181 = arith.divf %179, %180 : vector<16x1xf32>
    %cst_68 = arith.constant 9.99999974E-6 : f32
    %182 = vector.broadcast %cst_68 : f32 to vector<16x1xf32>
    %183 = arith.addf %181, %182 : vector<16x1xf32>
    %184 = math.rsqrt %183 : vector<16x1xf32>
    %185 = vector.broadcast %184 : vector<16x1xf32> to vector<16x128xf32>
    %186 = arith.mulf %176, %185 : vector<16x128xf32>
    %187 = vector.broadcast %169 : vector<1x128xf32> to vector<16x128xf32>
    %188 = arith.mulf %186, %187 : vector<16x128xf32>
    %189 = vector.broadcast %170 : vector<1x128xf32> to vector<16x128xf32>
    %190 = arith.addf %188, %189 : vector<16x128xf32>
    %191 = arith.addf %98, %190 : vector<16x128xf32>
    %c10 = arith.constant 10 : index
    %c0_69 = arith.constant 0 : index
    %192 = vector.load %arg2[%c10, %c0_69] : memref<21x512xf32, #tpu.memory_space<vmem>>, vector<1x128xf32>
    %c11 = arith.constant 11 : index
    %c0_70 = arith.constant 0 : index
    %193 = vector.load %arg2[%c11, %c0_70] : memref<21x512xf32, #tpu.memory_space<vmem>>, vector<1x128xf32>
    %cst_71 = arith.constant dense<0.000000e+00> : vector<16xf32>
    %194 = vector.multi_reduction <add>, %191, %cst_71 [1] : vector<16x128xf32> to vector<16xf32>
    %195 = vector.shape_cast %194 : vector<16xf32> to vector<16x1xf32>
    %cst_72 = arith.constant 1.280000e+02 : f32
    %196 = vector.broadcast %cst_72 : f32 to vector<16x1xf32>
    %197 = arith.divf %195, %196 : vector<16x1xf32>
    %198 = vector.broadcast %197 : vector<16x1xf32> to vector<16x128xf32>
    %199 = arith.subf %191, %198 : vector<16x128xf32>
    %200 = arith.mulf %199, %199 : vector<16x128xf32>
    %cst_73 = arith.constant dense<0.000000e+00> : vector<16xf32>
    %201 = vector.multi_reduction <add>, %200, %cst_73 [1] : vector<16x128xf32> to vector<16xf32>
    %202 = vector.shape_cast %201 : vector<16xf32> to vector<16x1xf32>
    %cst_74 = arith.constant 1.280000e+02 : f32
    %203 = vector.broadcast %cst_74 : f32 to vector<16x1xf32>
    %204 = arith.divf %202, %203 : vector<16x1xf32>
    %cst_75 = arith.constant 9.99999974E-6 : f32
    %205 = vector.broadcast %cst_75 : f32 to vector<16x1xf32>
    %206 = arith.addf %204, %205 : vector<16x1xf32>
    %207 = math.rsqrt %206 : vector<16x1xf32>
    %208 = vector.broadcast %207 : vector<16x1xf32> to vector<16x128xf32>
    %209 = arith.mulf %199, %208 : vector<16x128xf32>
    %210 = vector.broadcast %192 : vector<1x128xf32> to vector<16x128xf32>
    %211 = arith.mulf %209, %210 : vector<16x128xf32>
    %212 = vector.broadcast %193 : vector<1x128xf32> to vector<16x128xf32>
    %213 = arith.addf %211, %212 : vector<16x128xf32>
    %214 = arith.truncf %213 : vector<16x128xf32> to vector<16x128xbf16>
    %c0_76 = arith.constant 0 : index
    %c0_77 = arith.constant 0 : index
    %215 = vector.load %arg7[%c0_76, %c0_77] : memref<128x512xbf16, #tpu.memory_space<vmem>>, vector<128x512xbf16>
    %cst_78 = arith.constant dense<0.000000e+00> : vector<16x512xf32>
    %216 = tpu.matmul %214, %215, %cst_78 {dimension_numbers = #tpu.dot_dimension_numbers<[1], [0], [0], [1], [0, 0, 1, 1], [], []>} : vector<16x128xbf16>, vector<128x512xbf16>, vector<16x512xf32> -> vector<16x512xf32>
    %c12 = arith.constant 12 : index
    %c0_79 = arith.constant 0 : index
    %217 = vector.load %arg2[%c12, %c0_79] : memref<21x512xf32, #tpu.memory_space<vmem>>, vector<1x512xf32>
    %218 = vector.broadcast %217 : vector<1x512xf32> to vector<16x512xf32>
    %219 = arith.addf %216, %218 : vector<16x512xf32>
    %220 = vector.extract_strided_slice %219 {offsets = [0, 0], sizes = [16, 256], strides = [1, 1]} : vector<16x512xf32> to vector<16x256xf32>
    %221 = vector.extract_strided_slice %219 {offsets = [0, 256], sizes = [16, 256], strides = [1, 1]} : vector<16x512xf32> to vector<16x256xf32>
    %222 = arith.negf %221 : vector<16x256xf32>
    %223 = math.exp %222 : vector<16x256xf32>
    %cst_80 = arith.constant 1.000000e+00 : f32
    %224 = vector.broadcast %cst_80 : f32 to vector<16x256xf32>
    %225 = arith.addf %224, %223 : vector<16x256xf32>
    %226 = arith.divf %224, %225 : vector<16x256xf32>
    %227 = arith.mulf %220, %226 : vector<16x256xf32>
    %c0_81 = arith.constant 0 : index
    %c0_82 = arith.constant 0 : index
    %228 = vector.load %arg8[%c0_81, %c0_82] : memref<31x256xf32, #tpu.memory_space<vmem>>, vector<31x256xf32>
    %229 = tpu.iota {dimensions = array<i32: 1>} : vector<1x16x256xi32>
    %230 = vector.shape_cast %229 : vector<1x16x256xi32> to vector<16x256xi32>
    %231 = vector.extract_strided_slice %228 {offsets = [15, 0], sizes = [1, 256], strides = [1, 1]} : vector<31x256xf32> to vector<1x256xf32>
    %232 = vector.broadcast %231 : vector<1x256xf32> to vector<16x256xf32>
    %233 = arith.mulf %227, %232 : vector<16x256xf32>
    %c13 = arith.constant 13 : index
    %c0_83 = arith.constant 0 : index
    %234 = vector.load %arg2[%c13, %c0_83] : memref<21x512xf32, #tpu.memory_space<vmem>>, vector<1x256xf32>
    %235 = vector.broadcast %234 : vector<1x256xf32> to vector<16x256xf32>
    %236 = arith.addf %233, %235 : vector<16x256xf32>
    %c15_i32 = arith.constant 15 : i32
    %237 = tpu.dynamic_rotate %227 by %c15_i32 dim 0 : vector<16x256xf32>, i32 -> vector<16x256xf32>
    %c15_i32_84 = arith.constant 15 : i32
    %238 = vector.broadcast %c15_i32_84 : i32 to vector<16x256xi32>
    %239 = arith.cmpi sge, %230, %238 : vector<16x256xi32>
    %c15_i32_85 = arith.constant 15 : i32
    %240 = vector.broadcast %c15_i32_85 : i32 to vector<16x256xi32>
    %241 = arith.subi %230, %240 : vector<16x256xi32>
    %c16_i32 = arith.constant 16 : i32
    %242 = vector.broadcast %c16_i32 : i32 to vector<16x256xi32>
    %243 = arith.cmpi slt, %241, %242 : vector<16x256xi32>
    %244 = arith.andi %239, %243 : vector<16x256xi1>
    %cst_86 = arith.constant 0.000000e+00 : f32
    %245 = vector.broadcast %cst_86 : f32 to vector<16x256xf32>
    %246 = arith.select %244, %237, %245 : vector<16x256xi1>, vector<16x256xf32>
    %247 = vector.extract_strided_slice %228 {offsets = [0, 0], sizes = [1, 256], strides = [1, 1]} : vector<31x256xf32> to vector<1x256xf32>
    %248 = vector.broadcast %247 : vector<1x256xf32> to vector<16x256xf32>
    %249 = arith.mulf %246, %248 : vector<16x256xf32>
    %250 = arith.addf %236, %249 : vector<16x256xf32>
    %c14_i32 = arith.constant 14 : i32
    %251 = tpu.dynamic_rotate %227 by %c14_i32 dim 0 : vector<16x256xf32>, i32 -> vector<16x256xf32>
    %c14_i32_87 = arith.constant 14 : i32
    %252 = vector.broadcast %c14_i32_87 : i32 to vector<16x256xi32>
    %253 = arith.cmpi sge, %230, %252 : vector<16x256xi32>
    %c14_i32_88 = arith.constant 14 : i32
    %254 = vector.broadcast %c14_i32_88 : i32 to vector<16x256xi32>
    %255 = arith.subi %230, %254 : vector<16x256xi32>
    %c16_i32_89 = arith.constant 16 : i32
    %256 = vector.broadcast %c16_i32_89 : i32 to vector<16x256xi32>
    %257 = arith.cmpi slt, %255, %256 : vector<16x256xi32>
    %258 = arith.andi %253, %257 : vector<16x256xi1>
    %cst_90 = arith.constant 0.000000e+00 : f32
    %259 = vector.broadcast %cst_90 : f32 to vector<16x256xf32>
    %260 = arith.select %258, %251, %259 : vector<16x256xi1>, vector<16x256xf32>
    %261 = vector.extract_strided_slice %228 {offsets = [1, 0], sizes = [1, 256], strides = [1, 1]} : vector<31x256xf32> to vector<1x256xf32>
    %262 = vector.broadcast %261 : vector<1x256xf32> to vector<16x256xf32>
    %263 = arith.mulf %260, %262 : vector<16x256xf32>
    %264 = arith.addf %250, %263 : vector<16x256xf32>
    %c13_i32 = arith.constant 13 : i32
    %265 = tpu.dynamic_rotate %227 by %c13_i32 dim 0 : vector<16x256xf32>, i32 -> vector<16x256xf32>
    %c13_i32_91 = arith.constant 13 : i32
    %266 = vector.broadcast %c13_i32_91 : i32 to vector<16x256xi32>
    %267 = arith.cmpi sge, %230, %266 : vector<16x256xi32>
    %c13_i32_92 = arith.constant 13 : i32
    %268 = vector.broadcast %c13_i32_92 : i32 to vector<16x256xi32>
    %269 = arith.subi %230, %268 : vector<16x256xi32>
    %c16_i32_93 = arith.constant 16 : i32
    %270 = vector.broadcast %c16_i32_93 : i32 to vector<16x256xi32>
    %271 = arith.cmpi slt, %269, %270 : vector<16x256xi32>
    %272 = arith.andi %267, %271 : vector<16x256xi1>
    %cst_94 = arith.constant 0.000000e+00 : f32
    %273 = vector.broadcast %cst_94 : f32 to vector<16x256xf32>
    %274 = arith.select %272, %265, %273 : vector<16x256xi1>, vector<16x256xf32>
    %275 = vector.extract_strided_slice %228 {offsets = [2, 0], sizes = [1, 256], strides = [1, 1]} : vector<31x256xf32> to vector<1x256xf32>
    %276 = vector.broadcast %275 : vector<1x256xf32> to vector<16x256xf32>
    %277 = arith.mulf %274, %276 : vector<16x256xf32>
    %278 = arith.addf %264, %277 : vector<16x256xf32>
    %c12_i32 = arith.constant 12 : i32
    %279 = tpu.dynamic_rotate %227 by %c12_i32 dim 0 : vector<16x256xf32>, i32 -> vector<16x256xf32>
    %c12_i32_95 = arith.constant 12 : i32
    %280 = vector.broadcast %c12_i32_95 : i32 to vector<16x256xi32>
    %281 = arith.cmpi sge, %230, %280 : vector<16x256xi32>
    %c12_i32_96 = arith.constant 12 : i32
    %282 = vector.broadcast %c12_i32_96 : i32 to vector<16x256xi32>
    %283 = arith.subi %230, %282 : vector<16x256xi32>
    %c16_i32_97 = arith.constant 16 : i32
    %284 = vector.broadcast %c16_i32_97 : i32 to vector<16x256xi32>
    %285 = arith.cmpi slt, %283, %284 : vector<16x256xi32>
    %286 = arith.andi %281, %285 : vector<16x256xi1>
    %cst_98 = arith.constant 0.000000e+00 : f32
    %287 = vector.broadcast %cst_98 : f32 to vector<16x256xf32>
    %288 = arith.select %286, %279, %287 : vector<16x256xi1>, vector<16x256xf32>
    %289 = vector.extract_strided_slice %228 {offsets = [3, 0], sizes = [1, 256], strides = [1, 1]} : vector<31x256xf32> to vector<1x256xf32>
    %290 = vector.broadcast %289 : vector<1x256xf32> to vector<16x256xf32>
    %291 = arith.mulf %288, %290 : vector<16x256xf32>
    %292 = arith.addf %278, %291 : vector<16x256xf32>
    %c11_i32 = arith.constant 11 : i32
    %293 = tpu.dynamic_rotate %227 by %c11_i32 dim 0 : vector<16x256xf32>, i32 -> vector<16x256xf32>
    %c11_i32_99 = arith.constant 11 : i32
    %294 = vector.broadcast %c11_i32_99 : i32 to vector<16x256xi32>
    %295 = arith.cmpi sge, %230, %294 : vector<16x256xi32>
    %c11_i32_100 = arith.constant 11 : i32
    %296 = vector.broadcast %c11_i32_100 : i32 to vector<16x256xi32>
    %297 = arith.subi %230, %296 : vector<16x256xi32>
    %c16_i32_101 = arith.constant 16 : i32
    %298 = vector.broadcast %c16_i32_101 : i32 to vector<16x256xi32>
    %299 = arith.cmpi slt, %297, %298 : vector<16x256xi32>
    %300 = arith.andi %295, %299 : vector<16x256xi1>
    %cst_102 = arith.constant 0.000000e+00 : f32
    %301 = vector.broadcast %cst_102 : f32 to vector<16x256xf32>
    %302 = arith.select %300, %293, %301 : vector<16x256xi1>, vector<16x256xf32>
    %303 = vector.extract_strided_slice %228 {offsets = [4, 0], sizes = [1, 256], strides = [1, 1]} : vector<31x256xf32> to vector<1x256xf32>
    %304 = vector.broadcast %303 : vector<1x256xf32> to vector<16x256xf32>
    %305 = arith.mulf %302, %304 : vector<16x256xf32>
    %306 = arith.addf %292, %305 : vector<16x256xf32>
    %c10_i32 = arith.constant 10 : i32
    %307 = tpu.dynamic_rotate %227 by %c10_i32 dim 0 : vector<16x256xf32>, i32 -> vector<16x256xf32>
    %c10_i32_103 = arith.constant 10 : i32
    %308 = vector.broadcast %c10_i32_103 : i32 to vector<16x256xi32>
    %309 = arith.cmpi sge, %230, %308 : vector<16x256xi32>
    %c10_i32_104 = arith.constant 10 : i32
    %310 = vector.broadcast %c10_i32_104 : i32 to vector<16x256xi32>
    %311 = arith.subi %230, %310 : vector<16x256xi32>
    %c16_i32_105 = arith.constant 16 : i32
    %312 = vector.broadcast %c16_i32_105 : i32 to vector<16x256xi32>
    %313 = arith.cmpi slt, %311, %312 : vector<16x256xi32>
    %314 = arith.andi %309, %313 : vector<16x256xi1>
    %cst_106 = arith.constant 0.000000e+00 : f32
    %315 = vector.broadcast %cst_106 : f32 to vector<16x256xf32>
    %316 = arith.select %314, %307, %315 : vector<16x256xi1>, vector<16x256xf32>
    %317 = vector.extract_strided_slice %228 {offsets = [5, 0], sizes = [1, 256], strides = [1, 1]} : vector<31x256xf32> to vector<1x256xf32>
    %318 = vector.broadcast %317 : vector<1x256xf32> to vector<16x256xf32>
    %319 = arith.mulf %316, %318 : vector<16x256xf32>
    %320 = arith.addf %306, %319 : vector<16x256xf32>
    %c9_i32 = arith.constant 9 : i32
    %321 = tpu.dynamic_rotate %227 by %c9_i32 dim 0 : vector<16x256xf32>, i32 -> vector<16x256xf32>
    %c9_i32_107 = arith.constant 9 : i32
    %322 = vector.broadcast %c9_i32_107 : i32 to vector<16x256xi32>
    %323 = arith.cmpi sge, %230, %322 : vector<16x256xi32>
    %c9_i32_108 = arith.constant 9 : i32
    %324 = vector.broadcast %c9_i32_108 : i32 to vector<16x256xi32>
    %325 = arith.subi %230, %324 : vector<16x256xi32>
    %c16_i32_109 = arith.constant 16 : i32
    %326 = vector.broadcast %c16_i32_109 : i32 to vector<16x256xi32>
    %327 = arith.cmpi slt, %325, %326 : vector<16x256xi32>
    %328 = arith.andi %323, %327 : vector<16x256xi1>
    %cst_110 = arith.constant 0.000000e+00 : f32
    %329 = vector.broadcast %cst_110 : f32 to vector<16x256xf32>
    %330 = arith.select %328, %321, %329 : vector<16x256xi1>, vector<16x256xf32>
    %331 = vector.extract_strided_slice %228 {offsets = [6, 0], sizes = [1, 256], strides = [1, 1]} : vector<31x256xf32> to vector<1x256xf32>
    %332 = vector.broadcast %331 : vector<1x256xf32> to vector<16x256xf32>
    %333 = arith.mulf %330, %332 : vector<16x256xf32>
    %334 = arith.addf %320, %333 : vector<16x256xf32>
    %c8_i32 = arith.constant 8 : i32
    %335 = tpu.dynamic_rotate %227 by %c8_i32 dim 0 : vector<16x256xf32>, i32 -> vector<16x256xf32>
    %c8_i32_111 = arith.constant 8 : i32
    %336 = vector.broadcast %c8_i32_111 : i32 to vector<16x256xi32>
    %337 = arith.cmpi sge, %230, %336 : vector<16x256xi32>
    %c8_i32_112 = arith.constant 8 : i32
    %338 = vector.broadcast %c8_i32_112 : i32 to vector<16x256xi32>
    %339 = arith.subi %230, %338 : vector<16x256xi32>
    %c16_i32_113 = arith.constant 16 : i32
    %340 = vector.broadcast %c16_i32_113 : i32 to vector<16x256xi32>
    %341 = arith.cmpi slt, %339, %340 : vector<16x256xi32>
    %342 = arith.andi %337, %341 : vector<16x256xi1>
    %cst_114 = arith.constant 0.000000e+00 : f32
    %343 = vector.broadcast %cst_114 : f32 to vector<16x256xf32>
    %344 = arith.select %342, %335, %343 : vector<16x256xi1>, vector<16x256xf32>
    %345 = vector.extract_strided_slice %228 {offsets = [7, 0], sizes = [1, 256], strides = [1, 1]} : vector<31x256xf32> to vector<1x256xf32>
    %346 = vector.broadcast %345 : vector<1x256xf32> to vector<16x256xf32>
    %347 = arith.mulf %344, %346 : vector<16x256xf32>
    %348 = arith.addf %334, %347 : vector<16x256xf32>
    %c7_i32 = arith.constant 7 : i32
    %349 = tpu.dynamic_rotate %227 by %c7_i32 dim 0 : vector<16x256xf32>, i32 -> vector<16x256xf32>
    %c7_i32_115 = arith.constant 7 : i32
    %350 = vector.broadcast %c7_i32_115 : i32 to vector<16x256xi32>
    %351 = arith.cmpi sge, %230, %350 : vector<16x256xi32>
    %c7_i32_116 = arith.constant 7 : i32
    %352 = vector.broadcast %c7_i32_116 : i32 to vector<16x256xi32>
    %353 = arith.subi %230, %352 : vector<16x256xi32>
    %c16_i32_117 = arith.constant 16 : i32
    %354 = vector.broadcast %c16_i32_117 : i32 to vector<16x256xi32>
    %355 = arith.cmpi slt, %353, %354 : vector<16x256xi32>
    %356 = arith.andi %351, %355 : vector<16x256xi1>
    %cst_118 = arith.constant 0.000000e+00 : f32
    %357 = vector.broadcast %cst_118 : f32 to vector<16x256xf32>
    %358 = arith.select %356, %349, %357 : vector<16x256xi1>, vector<16x256xf32>
    %359 = vector.extract_strided_slice %228 {offsets = [8, 0], sizes = [1, 256], strides = [1, 1]} : vector<31x256xf32> to vector<1x256xf32>
    %360 = vector.broadcast %359 : vector<1x256xf32> to vector<16x256xf32>
    %361 = arith.mulf %358, %360 : vector<16x256xf32>
    %362 = arith.addf %348, %361 : vector<16x256xf32>
    %c6_i32 = arith.constant 6 : i32
    %363 = tpu.dynamic_rotate %227 by %c6_i32 dim 0 : vector<16x256xf32>, i32 -> vector<16x256xf32>
    %c6_i32_119 = arith.constant 6 : i32
    %364 = vector.broadcast %c6_i32_119 : i32 to vector<16x256xi32>
    %365 = arith.cmpi sge, %230, %364 : vector<16x256xi32>
    %c6_i32_120 = arith.constant 6 : i32
    %366 = vector.broadcast %c6_i32_120 : i32 to vector<16x256xi32>
    %367 = arith.subi %230, %366 : vector<16x256xi32>
    %c16_i32_121 = arith.constant 16 : i32
    %368 = vector.broadcast %c16_i32_121 : i32 to vector<16x256xi32>
    %369 = arith.cmpi slt, %367, %368 : vector<16x256xi32>
    %370 = arith.andi %365, %369 : vector<16x256xi1>
    %cst_122 = arith.constant 0.000000e+00 : f32
    %371 = vector.broadcast %cst_122 : f32 to vector<16x256xf32>
    %372 = arith.select %370, %363, %371 : vector<16x256xi1>, vector<16x256xf32>
    %373 = vector.extract_strided_slice %228 {offsets = [9, 0], sizes = [1, 256], strides = [1, 1]} : vector<31x256xf32> to vector<1x256xf32>
    %374 = vector.broadcast %373 : vector<1x256xf32> to vector<16x256xf32>
    %375 = arith.mulf %372, %374 : vector<16x256xf32>
    %376 = arith.addf %362, %375 : vector<16x256xf32>
    %c5_i32 = arith.constant 5 : i32
    %377 = tpu.dynamic_rotate %227 by %c5_i32 dim 0 : vector<16x256xf32>, i32 -> vector<16x256xf32>
    %c5_i32_123 = arith.constant 5 : i32
    %378 = vector.broadcast %c5_i32_123 : i32 to vector<16x256xi32>
    %379 = arith.cmpi sge, %230, %378 : vector<16x256xi32>
    %c5_i32_124 = arith.constant 5 : i32
    %380 = vector.broadcast %c5_i32_124 : i32 to vector<16x256xi32>
    %381 = arith.subi %230, %380 : vector<16x256xi32>
    %c16_i32_125 = arith.constant 16 : i32
    %382 = vector.broadcast %c16_i32_125 : i32 to vector<16x256xi32>
    %383 = arith.cmpi slt, %381, %382 : vector<16x256xi32>
    %384 = arith.andi %379, %383 : vector<16x256xi1>
    %cst_126 = arith.constant 0.000000e+00 : f32
    %385 = vector.broadcast %cst_126 : f32 to vector<16x256xf32>
    %386 = arith.select %384, %377, %385 : vector<16x256xi1>, vector<16x256xf32>
    %387 = vector.extract_strided_slice %228 {offsets = [10, 0], sizes = [1, 256], strides = [1, 1]} : vector<31x256xf32> to vector<1x256xf32>
    %388 = vector.broadcast %387 : vector<1x256xf32> to vector<16x256xf32>
    %389 = arith.mulf %386, %388 : vector<16x256xf32>
    %390 = arith.addf %376, %389 : vector<16x256xf32>
    %c4_i32 = arith.constant 4 : i32
    %391 = tpu.dynamic_rotate %227 by %c4_i32 dim 0 : vector<16x256xf32>, i32 -> vector<16x256xf32>
    %c4_i32_127 = arith.constant 4 : i32
    %392 = vector.broadcast %c4_i32_127 : i32 to vector<16x256xi32>
    %393 = arith.cmpi sge, %230, %392 : vector<16x256xi32>
    %c4_i32_128 = arith.constant 4 : i32
    %394 = vector.broadcast %c4_i32_128 : i32 to vector<16x256xi32>
    %395 = arith.subi %230, %394 : vector<16x256xi32>
    %c16_i32_129 = arith.constant 16 : i32
    %396 = vector.broadcast %c16_i32_129 : i32 to vector<16x256xi32>
    %397 = arith.cmpi slt, %395, %396 : vector<16x256xi32>
    %398 = arith.andi %393, %397 : vector<16x256xi1>
    %cst_130 = arith.constant 0.000000e+00 : f32
    %399 = vector.broadcast %cst_130 : f32 to vector<16x256xf32>
    %400 = arith.select %398, %391, %399 : vector<16x256xi1>, vector<16x256xf32>
    %401 = vector.extract_strided_slice %228 {offsets = [11, 0], sizes = [1, 256], strides = [1, 1]} : vector<31x256xf32> to vector<1x256xf32>
    %402 = vector.broadcast %401 : vector<1x256xf32> to vector<16x256xf32>
    %403 = arith.mulf %400, %402 : vector<16x256xf32>
    %404 = arith.addf %390, %403 : vector<16x256xf32>
    %c3_i32 = arith.constant 3 : i32
    %405 = tpu.dynamic_rotate %227 by %c3_i32 dim 0 : vector<16x256xf32>, i32 -> vector<16x256xf32>
    %c3_i32_131 = arith.constant 3 : i32
    %406 = vector.broadcast %c3_i32_131 : i32 to vector<16x256xi32>
    %407 = arith.cmpi sge, %230, %406 : vector<16x256xi32>
    %c3_i32_132 = arith.constant 3 : i32
    %408 = vector.broadcast %c3_i32_132 : i32 to vector<16x256xi32>
    %409 = arith.subi %230, %408 : vector<16x256xi32>
    %c16_i32_133 = arith.constant 16 : i32
    %410 = vector.broadcast %c16_i32_133 : i32 to vector<16x256xi32>
    %411 = arith.cmpi slt, %409, %410 : vector<16x256xi32>
    %412 = arith.andi %407, %411 : vector<16x256xi1>
    %cst_134 = arith.constant 0.000000e+00 : f32
    %413 = vector.broadcast %cst_134 : f32 to vector<16x256xf32>
    %414 = arith.select %412, %405, %413 : vector<16x256xi1>, vector<16x256xf32>
    %415 = vector.extract_strided_slice %228 {offsets = [12, 0], sizes = [1, 256], strides = [1, 1]} : vector<31x256xf32> to vector<1x256xf32>
    %416 = vector.broadcast %415 : vector<1x256xf32> to vector<16x256xf32>
    %417 = arith.mulf %414, %416 : vector<16x256xf32>
    %418 = arith.addf %404, %417 : vector<16x256xf32>
    %c2_i32 = arith.constant 2 : i32
    %419 = tpu.dynamic_rotate %227 by %c2_i32 dim 0 : vector<16x256xf32>, i32 -> vector<16x256xf32>
    %c2_i32_135 = arith.constant 2 : i32
    %420 = vector.broadcast %c2_i32_135 : i32 to vector<16x256xi32>
    %421 = arith.cmpi sge, %230, %420 : vector<16x256xi32>
    %c2_i32_136 = arith.constant 2 : i32
    %422 = vector.broadcast %c2_i32_136 : i32 to vector<16x256xi32>
    %423 = arith.subi %230, %422 : vector<16x256xi32>
    %c16_i32_137 = arith.constant 16 : i32
    %424 = vector.broadcast %c16_i32_137 : i32 to vector<16x256xi32>
    %425 = arith.cmpi slt, %423, %424 : vector<16x256xi32>
    %426 = arith.andi %421, %425 : vector<16x256xi1>
    %cst_138 = arith.constant 0.000000e+00 : f32
    %427 = vector.broadcast %cst_138 : f32 to vector<16x256xf32>
    %428 = arith.select %426, %419, %427 : vector<16x256xi1>, vector<16x256xf32>
    %429 = vector.extract_strided_slice %228 {offsets = [13, 0], sizes = [1, 256], strides = [1, 1]} : vector<31x256xf32> to vector<1x256xf32>
    %430 = vector.broadcast %429 : vector<1x256xf32> to vector<16x256xf32>
    %431 = arith.mulf %428, %430 : vector<16x256xf32>
    %432 = arith.addf %418, %431 : vector<16x256xf32>
    %c1_i32 = arith.constant 1 : i32
    %433 = tpu.dynamic_rotate %227 by %c1_i32 dim 0 : vector<16x256xf32>, i32 -> vector<16x256xf32>
    %c1_i32_139 = arith.constant 1 : i32
    %434 = vector.broadcast %c1_i32_139 : i32 to vector<16x256xi32>
    %435 = arith.cmpi sge, %230, %434 : vector<16x256xi32>
    %c1_i32_140 = arith.constant 1 : i32
    %436 = vector.broadcast %c1_i32_140 : i32 to vector<16x256xi32>
    %437 = arith.subi %230, %436 : vector<16x256xi32>
    %c16_i32_141 = arith.constant 16 : i32
    %438 = vector.broadcast %c16_i32_141 : i32 to vector<16x256xi32>
    %439 = arith.cmpi slt, %437, %438 : vector<16x256xi32>
    %440 = arith.andi %435, %439 : vector<16x256xi1>
    %cst_142 = arith.constant 0.000000e+00 : f32
    %441 = vector.broadcast %cst_142 : f32 to vector<16x256xf32>
    %442 = arith.select %440, %433, %441 : vector<16x256xi1>, vector<16x256xf32>
    %443 = vector.extract_strided_slice %228 {offsets = [14, 0], sizes = [1, 256], strides = [1, 1]} : vector<31x256xf32> to vector<1x256xf32>
    %444 = vector.broadcast %443 : vector<1x256xf32> to vector<16x256xf32>
    %445 = arith.mulf %442, %444 : vector<16x256xf32>
    %446 = arith.addf %432, %445 : vector<16x256xf32>
    %c15_i32_143 = arith.constant 15 : i32
    %447 = tpu.dynamic_rotate %227 by %c15_i32_143 dim 0 : vector<16x256xf32>, i32 -> vector<16x256xf32>
    %c-1_i32 = arith.constant -1 : i32
    %448 = vector.broadcast %c-1_i32 : i32 to vector<16x256xi32>
    %449 = arith.cmpi sge, %230, %448 : vector<16x256xi32>
    %c-1_i32_144 = arith.constant -1 : i32
    %450 = vector.broadcast %c-1_i32_144 : i32 to vector<16x256xi32>
    %451 = arith.subi %230, %450 : vector<16x256xi32>
    %c16_i32_145 = arith.constant 16 : i32
    %452 = vector.broadcast %c16_i32_145 : i32 to vector<16x256xi32>
    %453 = arith.cmpi slt, %451, %452 : vector<16x256xi32>
    %454 = arith.andi %449, %453 : vector<16x256xi1>
    %cst_146 = arith.constant 0.000000e+00 : f32
    %455 = vector.broadcast %cst_146 : f32 to vector<16x256xf32>
    %456 = arith.select %454, %447, %455 : vector<16x256xi1>, vector<16x256xf32>
    %457 = vector.extract_strided_slice %228 {offsets = [16, 0], sizes = [1, 256], strides = [1, 1]} : vector<31x256xf32> to vector<1x256xf32>
    %458 = vector.broadcast %457 : vector<1x256xf32> to vector<16x256xf32>
    %459 = arith.mulf %456, %458 : vector<16x256xf32>
    %460 = arith.addf %446, %459 : vector<16x256xf32>
    %c14_i32_147 = arith.constant 14 : i32
    %461 = tpu.dynamic_rotate %227 by %c14_i32_147 dim 0 : vector<16x256xf32>, i32 -> vector<16x256xf32>
    %c-2_i32 = arith.constant -2 : i32
    %462 = vector.broadcast %c-2_i32 : i32 to vector<16x256xi32>
    %463 = arith.cmpi sge, %230, %462 : vector<16x256xi32>
    %c-2_i32_148 = arith.constant -2 : i32
    %464 = vector.broadcast %c-2_i32_148 : i32 to vector<16x256xi32>
    %465 = arith.subi %230, %464 : vector<16x256xi32>
    %c16_i32_149 = arith.constant 16 : i32
    %466 = vector.broadcast %c16_i32_149 : i32 to vector<16x256xi32>
    %467 = arith.cmpi slt, %465, %466 : vector<16x256xi32>
    %468 = arith.andi %463, %467 : vector<16x256xi1>
    %cst_150 = arith.constant 0.000000e+00 : f32
    %469 = vector.broadcast %cst_150 : f32 to vector<16x256xf32>
    %470 = arith.select %468, %461, %469 : vector<16x256xi1>, vector<16x256xf32>
    %471 = vector.extract_strided_slice %228 {offsets = [17, 0], sizes = [1, 256], strides = [1, 1]} : vector<31x256xf32> to vector<1x256xf32>
    %472 = vector.broadcast %471 : vector<1x256xf32> to vector<16x256xf32>
    %473 = arith.mulf %470, %472 : vector<16x256xf32>
    %474 = arith.addf %460, %473 : vector<16x256xf32>
    %c13_i32_151 = arith.constant 13 : i32
    %475 = tpu.dynamic_rotate %227 by %c13_i32_151 dim 0 : vector<16x256xf32>, i32 -> vector<16x256xf32>
    %c-3_i32 = arith.constant -3 : i32
    %476 = vector.broadcast %c-3_i32 : i32 to vector<16x256xi32>
    %477 = arith.cmpi sge, %230, %476 : vector<16x256xi32>
    %c-3_i32_152 = arith.constant -3 : i32
    %478 = vector.broadcast %c-3_i32_152 : i32 to vector<16x256xi32>
    %479 = arith.subi %230, %478 : vector<16x256xi32>
    %c16_i32_153 = arith.constant 16 : i32
    %480 = vector.broadcast %c16_i32_153 : i32 to vector<16x256xi32>
    %481 = arith.cmpi slt, %479, %480 : vector<16x256xi32>
    %482 = arith.andi %477, %481 : vector<16x256xi1>
    %cst_154 = arith.constant 0.000000e+00 : f32
    %483 = vector.broadcast %cst_154 : f32 to vector<16x256xf32>
    %484 = arith.select %482, %475, %483 : vector<16x256xi1>, vector<16x256xf32>
    %485 = vector.extract_strided_slice %228 {offsets = [18, 0], sizes = [1, 256], strides = [1, 1]} : vector<31x256xf32> to vector<1x256xf32>
    %486 = vector.broadcast %485 : vector<1x256xf32> to vector<16x256xf32>
    %487 = arith.mulf %484, %486 : vector<16x256xf32>
    %488 = arith.addf %474, %487 : vector<16x256xf32>
    %c12_i32_155 = arith.constant 12 : i32
    %489 = tpu.dynamic_rotate %227 by %c12_i32_155 dim 0 : vector<16x256xf32>, i32 -> vector<16x256xf32>
    %c-4_i32 = arith.constant -4 : i32
    %490 = vector.broadcast %c-4_i32 : i32 to vector<16x256xi32>
    %491 = arith.cmpi sge, %230, %490 : vector<16x256xi32>
    %c-4_i32_156 = arith.constant -4 : i32
    %492 = vector.broadcast %c-4_i32_156 : i32 to vector<16x256xi32>
    %493 = arith.subi %230, %492 : vector<16x256xi32>
    %c16_i32_157 = arith.constant 16 : i32
    %494 = vector.broadcast %c16_i32_157 : i32 to vector<16x256xi32>
    %495 = arith.cmpi slt, %493, %494 : vector<16x256xi32>
    %496 = arith.andi %491, %495 : vector<16x256xi1>
    %cst_158 = arith.constant 0.000000e+00 : f32
    %497 = vector.broadcast %cst_158 : f32 to vector<16x256xf32>
    %498 = arith.select %496, %489, %497 : vector<16x256xi1>, vector<16x256xf32>
    %499 = vector.extract_strided_slice %228 {offsets = [19, 0], sizes = [1, 256], strides = [1, 1]} : vector<31x256xf32> to vector<1x256xf32>
    %500 = vector.broadcast %499 : vector<1x256xf32> to vector<16x256xf32>
    %501 = arith.mulf %498, %500 : vector<16x256xf32>
    %502 = arith.addf %488, %501 : vector<16x256xf32>
    %c11_i32_159 = arith.constant 11 : i32
    %503 = tpu.dynamic_rotate %227 by %c11_i32_159 dim 0 : vector<16x256xf32>, i32 -> vector<16x256xf32>
    %c-5_i32 = arith.constant -5 : i32
    %504 = vector.broadcast %c-5_i32 : i32 to vector<16x256xi32>
    %505 = arith.cmpi sge, %230, %504 : vector<16x256xi32>
    %c-5_i32_160 = arith.constant -5 : i32
    %506 = vector.broadcast %c-5_i32_160 : i32 to vector<16x256xi32>
    %507 = arith.subi %230, %506 : vector<16x256xi32>
    %c16_i32_161 = arith.constant 16 : i32
    %508 = vector.broadcast %c16_i32_161 : i32 to vector<16x256xi32>
    %509 = arith.cmpi slt, %507, %508 : vector<16x256xi32>
    %510 = arith.andi %505, %509 : vector<16x256xi1>
    %cst_162 = arith.constant 0.000000e+00 : f32
    %511 = vector.broadcast %cst_162 : f32 to vector<16x256xf32>
    %512 = arith.select %510, %503, %511 : vector<16x256xi1>, vector<16x256xf32>
    %513 = vector.extract_strided_slice %228 {offsets = [20, 0], sizes = [1, 256], strides = [1, 1]} : vector<31x256xf32> to vector<1x256xf32>
    %514 = vector.broadcast %513 : vector<1x256xf32> to vector<16x256xf32>
    %515 = arith.mulf %512, %514 : vector<16x256xf32>
    %516 = arith.addf %502, %515 : vector<16x256xf32>
    %c10_i32_163 = arith.constant 10 : i32
    %517 = tpu.dynamic_rotate %227 by %c10_i32_163 dim 0 : vector<16x256xf32>, i32 -> vector<16x256xf32>
    %c-6_i32 = arith.constant -6 : i32
    %518 = vector.broadcast %c-6_i32 : i32 to vector<16x256xi32>
    %519 = arith.cmpi sge, %230, %518 : vector<16x256xi32>
    %c-6_i32_164 = arith.constant -6 : i32
    %520 = vector.broadcast %c-6_i32_164 : i32 to vector<16x256xi32>
    %521 = arith.subi %230, %520 : vector<16x256xi32>
    %c16_i32_165 = arith.constant 16 : i32
    %522 = vector.broadcast %c16_i32_165 : i32 to vector<16x256xi32>
    %523 = arith.cmpi slt, %521, %522 : vector<16x256xi32>
    %524 = arith.andi %519, %523 : vector<16x256xi1>
    %cst_166 = arith.constant 0.000000e+00 : f32
    %525 = vector.broadcast %cst_166 : f32 to vector<16x256xf32>
    %526 = arith.select %524, %517, %525 : vector<16x256xi1>, vector<16x256xf32>
    %527 = vector.extract_strided_slice %228 {offsets = [21, 0], sizes = [1, 256], strides = [1, 1]} : vector<31x256xf32> to vector<1x256xf32>
    %528 = vector.broadcast %527 : vector<1x256xf32> to vector<16x256xf32>
    %529 = arith.mulf %526, %528 : vector<16x256xf32>
    %530 = arith.addf %516, %529 : vector<16x256xf32>
    %c9_i32_167 = arith.constant 9 : i32
    %531 = tpu.dynamic_rotate %227 by %c9_i32_167 dim 0 : vector<16x256xf32>, i32 -> vector<16x256xf32>
    %c-7_i32 = arith.constant -7 : i32
    %532 = vector.broadcast %c-7_i32 : i32 to vector<16x256xi32>
    %533 = arith.cmpi sge, %230, %532 : vector<16x256xi32>
    %c-7_i32_168 = arith.constant -7 : i32
    %534 = vector.broadcast %c-7_i32_168 : i32 to vector<16x256xi32>
    %535 = arith.subi %230, %534 : vector<16x256xi32>
    %c16_i32_169 = arith.constant 16 : i32
    %536 = vector.broadcast %c16_i32_169 : i32 to vector<16x256xi32>
    %537 = arith.cmpi slt, %535, %536 : vector<16x256xi32>
    %538 = arith.andi %533, %537 : vector<16x256xi1>
    %cst_170 = arith.constant 0.000000e+00 : f32
    %539 = vector.broadcast %cst_170 : f32 to vector<16x256xf32>
    %540 = arith.select %538, %531, %539 : vector<16x256xi1>, vector<16x256xf32>
    %541 = vector.extract_strided_slice %228 {offsets = [22, 0], sizes = [1, 256], strides = [1, 1]} : vector<31x256xf32> to vector<1x256xf32>
    %542 = vector.broadcast %541 : vector<1x256xf32> to vector<16x256xf32>
    %543 = arith.mulf %540, %542 : vector<16x256xf32>
    %544 = arith.addf %530, %543 : vector<16x256xf32>
    %c8_i32_171 = arith.constant 8 : i32
    %545 = tpu.dynamic_rotate %227 by %c8_i32_171 dim 0 : vector<16x256xf32>, i32 -> vector<16x256xf32>
    %c-8_i32 = arith.constant -8 : i32
    %546 = vector.broadcast %c-8_i32 : i32 to vector<16x256xi32>
    %547 = arith.cmpi sge, %230, %546 : vector<16x256xi32>
    %c-8_i32_172 = arith.constant -8 : i32
    %548 = vector.broadcast %c-8_i32_172 : i32 to vector<16x256xi32>
    %549 = arith.subi %230, %548 : vector<16x256xi32>
    %c16_i32_173 = arith.constant 16 : i32
    %550 = vector.broadcast %c16_i32_173 : i32 to vector<16x256xi32>
    %551 = arith.cmpi slt, %549, %550 : vector<16x256xi32>
    %552 = arith.andi %547, %551 : vector<16x256xi1>
    %cst_174 = arith.constant 0.000000e+00 : f32
    %553 = vector.broadcast %cst_174 : f32 to vector<16x256xf32>
    %554 = arith.select %552, %545, %553 : vector<16x256xi1>, vector<16x256xf32>
    %555 = vector.extract_strided_slice %228 {offsets = [23, 0], sizes = [1, 256], strides = [1, 1]} : vector<31x256xf32> to vector<1x256xf32>
    %556 = vector.broadcast %555 : vector<1x256xf32> to vector<16x256xf32>
    %557 = arith.mulf %554, %556 : vector<16x256xf32>
    %558 = arith.addf %544, %557 : vector<16x256xf32>
    %c7_i32_175 = arith.constant 7 : i32
    %559 = tpu.dynamic_rotate %227 by %c7_i32_175 dim 0 : vector<16x256xf32>, i32 -> vector<16x256xf32>
    %c-9_i32 = arith.constant -9 : i32
    %560 = vector.broadcast %c-9_i32 : i32 to vector<16x256xi32>
    %561 = arith.cmpi sge, %230, %560 : vector<16x256xi32>
    %c-9_i32_176 = arith.constant -9 : i32
    %562 = vector.broadcast %c-9_i32_176 : i32 to vector<16x256xi32>
    %563 = arith.subi %230, %562 : vector<16x256xi32>
    %c16_i32_177 = arith.constant 16 : i32
    %564 = vector.broadcast %c16_i32_177 : i32 to vector<16x256xi32>
    %565 = arith.cmpi slt, %563, %564 : vector<16x256xi32>
    %566 = arith.andi %561, %565 : vector<16x256xi1>
    %cst_178 = arith.constant 0.000000e+00 : f32
    %567 = vector.broadcast %cst_178 : f32 to vector<16x256xf32>
    %568 = arith.select %566, %559, %567 : vector<16x256xi1>, vector<16x256xf32>
    %569 = vector.extract_strided_slice %228 {offsets = [24, 0], sizes = [1, 256], strides = [1, 1]} : vector<31x256xf32> to vector<1x256xf32>
    %570 = vector.broadcast %569 : vector<1x256xf32> to vector<16x256xf32>
    %571 = arith.mulf %568, %570 : vector<16x256xf32>
    %572 = arith.addf %558, %571 : vector<16x256xf32>
    %c6_i32_179 = arith.constant 6 : i32
    %573 = tpu.dynamic_rotate %227 by %c6_i32_179 dim 0 : vector<16x256xf32>, i32 -> vector<16x256xf32>
    %c-10_i32 = arith.constant -10 : i32
    %574 = vector.broadcast %c-10_i32 : i32 to vector<16x256xi32>
    %575 = arith.cmpi sge, %230, %574 : vector<16x256xi32>
    %c-10_i32_180 = arith.constant -10 : i32
    %576 = vector.broadcast %c-10_i32_180 : i32 to vector<16x256xi32>
    %577 = arith.subi %230, %576 : vector<16x256xi32>
    %c16_i32_181 = arith.constant 16 : i32
    %578 = vector.broadcast %c16_i32_181 : i32 to vector<16x256xi32>
    %579 = arith.cmpi slt, %577, %578 : vector<16x256xi32>
    %580 = arith.andi %575, %579 : vector<16x256xi1>
    %cst_182 = arith.constant 0.000000e+00 : f32
    %581 = vector.broadcast %cst_182 : f32 to vector<16x256xf32>
    %582 = arith.select %580, %573, %581 : vector<16x256xi1>, vector<16x256xf32>
    %583 = vector.extract_strided_slice %228 {offsets = [25, 0], sizes = [1, 256], strides = [1, 1]} : vector<31x256xf32> to vector<1x256xf32>
    %584 = vector.broadcast %583 : vector<1x256xf32> to vector<16x256xf32>
    %585 = arith.mulf %582, %584 : vector<16x256xf32>
    %586 = arith.addf %572, %585 : vector<16x256xf32>
    %c5_i32_183 = arith.constant 5 : i32
    %587 = tpu.dynamic_rotate %227 by %c5_i32_183 dim 0 : vector<16x256xf32>, i32 -> vector<16x256xf32>
    %c-11_i32 = arith.constant -11 : i32
    %588 = vector.broadcast %c-11_i32 : i32 to vector<16x256xi32>
    %589 = arith.cmpi sge, %230, %588 : vector<16x256xi32>
    %c-11_i32_184 = arith.constant -11 : i32
    %590 = vector.broadcast %c-11_i32_184 : i32 to vector<16x256xi32>
    %591 = arith.subi %230, %590 : vector<16x256xi32>
    %c16_i32_185 = arith.constant 16 : i32
    %592 = vector.broadcast %c16_i32_185 : i32 to vector<16x256xi32>
    %593 = arith.cmpi slt, %591, %592 : vector<16x256xi32>
    %594 = arith.andi %589, %593 : vector<16x256xi1>
    %cst_186 = arith.constant 0.000000e+00 : f32
    %595 = vector.broadcast %cst_186 : f32 to vector<16x256xf32>
    %596 = arith.select %594, %587, %595 : vector<16x256xi1>, vector<16x256xf32>
    %597 = vector.extract_strided_slice %228 {offsets = [26, 0], sizes = [1, 256], strides = [1, 1]} : vector<31x256xf32> to vector<1x256xf32>
    %598 = vector.broadcast %597 : vector<1x256xf32> to vector<16x256xf32>
    %599 = arith.mulf %596, %598 : vector<16x256xf32>
    %600 = arith.addf %586, %599 : vector<16x256xf32>
    %c4_i32_187 = arith.constant 4 : i32
    %601 = tpu.dynamic_rotate %227 by %c4_i32_187 dim 0 : vector<16x256xf32>, i32 -> vector<16x256xf32>
    %c-12_i32 = arith.constant -12 : i32
    %602 = vector.broadcast %c-12_i32 : i32 to vector<16x256xi32>
    %603 = arith.cmpi sge, %230, %602 : vector<16x256xi32>
    %c-12_i32_188 = arith.constant -12 : i32
    %604 = vector.broadcast %c-12_i32_188 : i32 to vector<16x256xi32>
    %605 = arith.subi %230, %604 : vector<16x256xi32>
    %c16_i32_189 = arith.constant 16 : i32
    %606 = vector.broadcast %c16_i32_189 : i32 to vector<16x256xi32>
    %607 = arith.cmpi slt, %605, %606 : vector<16x256xi32>
    %608 = arith.andi %603, %607 : vector<16x256xi1>
    %cst_190 = arith.constant 0.000000e+00 : f32
    %609 = vector.broadcast %cst_190 : f32 to vector<16x256xf32>
    %610 = arith.select %608, %601, %609 : vector<16x256xi1>, vector<16x256xf32>
    %611 = vector.extract_strided_slice %228 {offsets = [27, 0], sizes = [1, 256], strides = [1, 1]} : vector<31x256xf32> to vector<1x256xf32>
    %612 = vector.broadcast %611 : vector<1x256xf32> to vector<16x256xf32>
    %613 = arith.mulf %610, %612 : vector<16x256xf32>
    %614 = arith.addf %600, %613 : vector<16x256xf32>
    %c3_i32_191 = arith.constant 3 : i32
    %615 = tpu.dynamic_rotate %227 by %c3_i32_191 dim 0 : vector<16x256xf32>, i32 -> vector<16x256xf32>
    %c-13_i32 = arith.constant -13 : i32
    %616 = vector.broadcast %c-13_i32 : i32 to vector<16x256xi32>
    %617 = arith.cmpi sge, %230, %616 : vector<16x256xi32>
    %c-13_i32_192 = arith.constant -13 : i32
    %618 = vector.broadcast %c-13_i32_192 : i32 to vector<16x256xi32>
    %619 = arith.subi %230, %618 : vector<16x256xi32>
    %c16_i32_193 = arith.constant 16 : i32
    %620 = vector.broadcast %c16_i32_193 : i32 to vector<16x256xi32>
    %621 = arith.cmpi slt, %619, %620 : vector<16x256xi32>
    %622 = arith.andi %617, %621 : vector<16x256xi1>
    %cst_194 = arith.constant 0.000000e+00 : f32
    %623 = vector.broadcast %cst_194 : f32 to vector<16x256xf32>
    %624 = arith.select %622, %615, %623 : vector<16x256xi1>, vector<16x256xf32>
    %625 = vector.extract_strided_slice %228 {offsets = [28, 0], sizes = [1, 256], strides = [1, 1]} : vector<31x256xf32> to vector<1x256xf32>
    %626 = vector.broadcast %625 : vector<1x256xf32> to vector<16x256xf32>
    %627 = arith.mulf %624, %626 : vector<16x256xf32>
    %628 = arith.addf %614, %627 : vector<16x256xf32>
    %c2_i32_195 = arith.constant 2 : i32
    %629 = tpu.dynamic_rotate %227 by %c2_i32_195 dim 0 : vector<16x256xf32>, i32 -> vector<16x256xf32>
    %c-14_i32 = arith.constant -14 : i32
    %630 = vector.broadcast %c-14_i32 : i32 to vector<16x256xi32>
    %631 = arith.cmpi sge, %230, %630 : vector<16x256xi32>
    %c-14_i32_196 = arith.constant -14 : i32
    %632 = vector.broadcast %c-14_i32_196 : i32 to vector<16x256xi32>
    %633 = arith.subi %230, %632 : vector<16x256xi32>
    %c16_i32_197 = arith.constant 16 : i32
    %634 = vector.broadcast %c16_i32_197 : i32 to vector<16x256xi32>
    %635 = arith.cmpi slt, %633, %634 : vector<16x256xi32>
    %636 = arith.andi %631, %635 : vector<16x256xi1>
    %cst_198 = arith.constant 0.000000e+00 : f32
    %637 = vector.broadcast %cst_198 : f32 to vector<16x256xf32>
    %638 = arith.select %636, %629, %637 : vector<16x256xi1>, vector<16x256xf32>
    %639 = vector.extract_strided_slice %228 {offsets = [29, 0], sizes = [1, 256], strides = [1, 1]} : vector<31x256xf32> to vector<1x256xf32>
    %640 = vector.broadcast %639 : vector<1x256xf32> to vector<16x256xf32>
    %641 = arith.mulf %638, %640 : vector<16x256xf32>
    %642 = arith.addf %628, %641 : vector<16x256xf32>
    %c1_i32_199 = arith.constant 1 : i32
    %643 = tpu.dynamic_rotate %227 by %c1_i32_199 dim 0 : vector<16x256xf32>, i32 -> vector<16x256xf32>
    %c-15_i32 = arith.constant -15 : i32
    %644 = vector.broadcast %c-15_i32 : i32 to vector<16x256xi32>
    %645 = arith.cmpi sge, %230, %644 : vector<16x256xi32>
    %c-15_i32_200 = arith.constant -15 : i32
    %646 = vector.broadcast %c-15_i32_200 : i32 to vector<16x256xi32>
    %647 = arith.subi %230, %646 : vector<16x256xi32>
    %c16_i32_201 = arith.constant 16 : i32
    %648 = vector.broadcast %c16_i32_201 : i32 to vector<16x256xi32>
    %649 = arith.cmpi slt, %647, %648 : vector<16x256xi32>
    %650 = arith.andi %645, %649 : vector<16x256xi1>
    %cst_202 = arith.constant 0.000000e+00 : f32
    %651 = vector.broadcast %cst_202 : f32 to vector<16x256xf32>
    %652 = arith.select %650, %643, %651 : vector<16x256xi1>, vector<16x256xf32>
    %653 = vector.extract_strided_slice %228 {offsets = [30, 0], sizes = [1, 256], strides = [1, 1]} : vector<31x256xf32> to vector<1x256xf32>
    %654 = vector.broadcast %653 : vector<1x256xf32> to vector<16x256xf32>
    %655 = arith.mulf %652, %654 : vector<16x256xf32>
    %656 = arith.addf %642, %655 : vector<16x256xf32>
    %657 = arith.negf %656 : vector<16x256xf32>
    %658 = math.exp %657 : vector<16x256xf32>
    %cst_203 = arith.constant 1.000000e+00 : f32
    %659 = vector.broadcast %cst_203 : f32 to vector<16x256xf32>
    %660 = arith.addf %659, %658 : vector<16x256xf32>
    %661 = arith.divf %659, %660 : vector<16x256xf32>
    %662 = arith.mulf %656, %661 : vector<16x256xf32>
    %663 = arith.truncf %662 : vector<16x256xf32> to vector<16x256xbf16>
    %c0_204 = arith.constant 0 : index
    %c0_205 = arith.constant 0 : index
    %664 = vector.load %arg9[%c0_204, %c0_205] : memref<256x128xbf16, #tpu.memory_space<vmem>>, vector<256x128xbf16>
    %cst_206 = arith.constant dense<0.000000e+00> : vector<16x128xf32>
    %665 = tpu.matmul %663, %664, %cst_206 {dimension_numbers = #tpu.dot_dimension_numbers<[1], [0], [0], [1], [0, 0, 1, 1], [], []>} : vector<16x256xbf16>, vector<256x128xbf16>, vector<16x128xf32> -> vector<16x128xf32>
    %c14 = arith.constant 14 : index
    %c0_207 = arith.constant 0 : index
    %666 = vector.load %arg2[%c14, %c0_207] : memref<21x512xf32, #tpu.memory_space<vmem>>, vector<1x128xf32>
    %667 = vector.broadcast %666 : vector<1x128xf32> to vector<16x128xf32>
    %668 = arith.addf %665, %667 : vector<16x128xf32>
    %669 = arith.addf %191, %668 : vector<16x128xf32>
    %c15 = arith.constant 15 : index
    %c0_208 = arith.constant 0 : index
    %670 = vector.load %arg2[%c15, %c0_208] : memref<21x512xf32, #tpu.memory_space<vmem>>, vector<1x128xf32>
    %c16 = arith.constant 16 : index
    %c0_209 = arith.constant 0 : index
    %671 = vector.load %arg2[%c16, %c0_209] : memref<21x512xf32, #tpu.memory_space<vmem>>, vector<1x128xf32>
    %cst_210 = arith.constant dense<0.000000e+00> : vector<16xf32>
    %672 = vector.multi_reduction <add>, %669, %cst_210 [1] : vector<16x128xf32> to vector<16xf32>
    %673 = vector.shape_cast %672 : vector<16xf32> to vector<16x1xf32>
    %cst_211 = arith.constant 1.280000e+02 : f32
    %674 = vector.broadcast %cst_211 : f32 to vector<16x1xf32>
    %675 = arith.divf %673, %674 : vector<16x1xf32>
    %676 = vector.broadcast %675 : vector<16x1xf32> to vector<16x128xf32>
    %677 = arith.subf %669, %676 : vector<16x128xf32>
    %678 = arith.mulf %677, %677 : vector<16x128xf32>
    %cst_212 = arith.constant dense<0.000000e+00> : vector<16xf32>
    %679 = vector.multi_reduction <add>, %678, %cst_212 [1] : vector<16x128xf32> to vector<16xf32>
    %680 = vector.shape_cast %679 : vector<16xf32> to vector<16x1xf32>
    %cst_213 = arith.constant 1.280000e+02 : f32
    %681 = vector.broadcast %cst_213 : f32 to vector<16x1xf32>
    %682 = arith.divf %680, %681 : vector<16x1xf32>
    %cst_214 = arith.constant 9.99999974E-6 : f32
    %683 = vector.broadcast %cst_214 : f32 to vector<16x1xf32>
    %684 = arith.addf %682, %683 : vector<16x1xf32>
    %685 = math.rsqrt %684 : vector<16x1xf32>
    %686 = vector.broadcast %685 : vector<16x1xf32> to vector<16x128xf32>
    %687 = arith.mulf %677, %686 : vector<16x128xf32>
    %688 = vector.broadcast %670 : vector<1x128xf32> to vector<16x128xf32>
    %689 = arith.mulf %687, %688 : vector<16x128xf32>
    %690 = vector.broadcast %671 : vector<1x128xf32> to vector<16x128xf32>
    %691 = arith.addf %689, %690 : vector<16x128xf32>
    %692 = arith.truncf %691 : vector<16x128xf32> to vector<16x128xbf16>
    %c0_215 = arith.constant 0 : index
    %c0_216 = arith.constant 0 : index
    %693 = vector.load %arg10[%c0_215, %c0_216] : memref<128x256xbf16, #tpu.memory_space<vmem>>, vector<128x256xbf16>
    %cst_217 = arith.constant dense<0.000000e+00> : vector<16x256xf32>
    %694 = tpu.matmul %692, %693, %cst_217 {dimension_numbers = #tpu.dot_dimension_numbers<[1], [0], [0], [1], [0, 0, 1, 1], [], []>} : vector<16x128xbf16>, vector<128x256xbf16>, vector<16x256xf32> -> vector<16x256xf32>
    %c17 = arith.constant 17 : index
    %c0_218 = arith.constant 0 : index
    %695 = vector.load %arg2[%c17, %c0_218] : memref<21x512xf32, #tpu.memory_space<vmem>>, vector<1x256xf32>
    %696 = vector.broadcast %695 : vector<1x256xf32> to vector<16x256xf32>
    %697 = arith.addf %694, %696 : vector<16x256xf32>
    %cst_219 = arith.constant 5.000000e-01 : f32
    %698 = vector.broadcast %cst_219 : f32 to vector<16x256xf32>
    %699 = arith.mulf %698, %697 : vector<16x256xf32>
    %cst_220 = arith.constant 0.707106769 : f32
    %700 = vector.broadcast %cst_220 : f32 to vector<16x256xf32>
    %701 = arith.mulf %697, %700 : vector<16x256xf32>
    %702 = math.absf %701 : vector<16x256xf32>
    %cst_221 = arith.constant 0.327591091 : f32
    %703 = vector.broadcast %cst_221 : f32 to vector<16x256xf32>
    %704 = arith.mulf %703, %702 : vector<16x256xf32>
    %cst_222 = arith.constant 1.000000e+00 : f32
    %705 = vector.broadcast %cst_222 : f32 to vector<16x256xf32>
    %706 = arith.addf %705, %704 : vector<16x256xf32>
    %cst_223 = arith.constant 1.000000e+00 : f32
    %707 = vector.broadcast %cst_223 : f32 to vector<16x256xf32>
    %708 = arith.divf %707, %706 : vector<16x256xf32>
    %cst_224 = arith.constant 1.06140542 : f32
    %709 = vector.broadcast %cst_224 : f32 to vector<16x256xf32>
    %710 = arith.mulf %708, %709 : vector<16x256xf32>
    %cst_225 = arith.constant -1.45315206 : f32
    %711 = vector.broadcast %cst_225 : f32 to vector<16x256xf32>
    %712 = arith.addf %711, %710 : vector<16x256xf32>
    %713 = arith.mulf %708, %712 : vector<16x256xf32>
    %cst_226 = arith.constant 1.42141378 : f32
    %714 = vector.broadcast %cst_226 : f32 to vector<16x256xf32>
    %715 = arith.addf %714, %713 : vector<16x256xf32>
    %716 = arith.mulf %708, %715 : vector<16x256xf32>
    %cst_227 = arith.constant -0.284496725 : f32
    %717 = vector.broadcast %cst_227 : f32 to vector<16x256xf32>
    %718 = arith.addf %717, %716 : vector<16x256xf32>
    %719 = arith.mulf %708, %718 : vector<16x256xf32>
    %cst_228 = arith.constant 0.254829586 : f32
    %720 = vector.broadcast %cst_228 : f32 to vector<16x256xf32>
    %721 = arith.addf %720, %719 : vector<16x256xf32>
    %722 = arith.mulf %708, %721 : vector<16x256xf32>
    %cst_229 = arith.constant 0.000000e+00 : f32
    %723 = vector.broadcast %cst_229 : f32 to vector<16x256xf32>
    %724 = arith.subf %723, %702 : vector<16x256xf32>
    %725 = arith.mulf %724, %702 : vector<16x256xf32>
    %726 = math.exp %725 : vector<16x256xf32>
    %727 = arith.mulf %722, %726 : vector<16x256xf32>
    %cst_230 = arith.constant 1.000000e+00 : f32
    %728 = vector.broadcast %cst_230 : f32 to vector<16x256xf32>
    %729 = arith.subf %728, %727 : vector<16x256xf32>
    %cst_231 = arith.constant 0.000000e+00 : f32
    %730 = vector.broadcast %cst_231 : f32 to vector<16x256xf32>
    %731 = arith.cmpf oge, %701, %730 : vector<16x256xf32>
    %cst_232 = arith.constant 0.000000e+00 : f32
    %732 = vector.broadcast %cst_232 : f32 to vector<16x256xf32>
    %733 = arith.subf %732, %729 : vector<16x256xf32>
    %734 = arith.select %731, %729, %733 : vector<16x256xi1>, vector<16x256xf32>
    %cst_233 = arith.constant 1.000000e+00 : f32
    %735 = vector.broadcast %cst_233 : f32 to vector<16x256xf32>
    %736 = arith.addf %735, %734 : vector<16x256xf32>
    %737 = arith.mulf %699, %736 : vector<16x256xf32>
    %738 = arith.truncf %737 : vector<16x256xf32> to vector<16x256xbf16>
    %c0_234 = arith.constant 0 : index
    %c0_235 = arith.constant 0 : index
    %739 = vector.load %arg11[%c0_234, %c0_235] : memref<256x128xbf16, #tpu.memory_space<vmem>>, vector<256x128xbf16>
    %cst_236 = arith.constant dense<0.000000e+00> : vector<16x128xf32>
    %740 = tpu.matmul %738, %739, %cst_236 {dimension_numbers = #tpu.dot_dimension_numbers<[1], [0], [0], [1], [0, 0, 1, 1], [], []>} : vector<16x256xbf16>, vector<256x128xbf16>, vector<16x128xf32> -> vector<16x128xf32>
    %c18 = arith.constant 18 : index
    %c0_237 = arith.constant 0 : index
    %741 = vector.load %arg2[%c18, %c0_237] : memref<21x512xf32, #tpu.memory_space<vmem>>, vector<1x128xf32>
    %742 = vector.broadcast %741 : vector<1x128xf32> to vector<16x128xf32>
    %743 = arith.addf %740, %742 : vector<16x128xf32>
    %c19 = arith.constant 19 : index
    %c0_238 = arith.constant 0 : index
    %744 = vector.load %arg2[%c19, %c0_238] : memref<21x512xf32, #tpu.memory_space<vmem>>, vector<1x128xf32>
    %c20 = arith.constant 20 : index
    %c0_239 = arith.constant 0 : index
    %745 = vector.load %arg2[%c20, %c0_239] : memref<21x512xf32, #tpu.memory_space<vmem>>, vector<1x128xf32>
    %cst_240 = arith.constant dense<0.000000e+00> : vector<16xf32>
    %746 = vector.multi_reduction <add>, %743, %cst_240 [1] : vector<16x128xf32> to vector<16xf32>
    %747 = vector.shape_cast %746 : vector<16xf32> to vector<16x1xf32>
    %cst_241 = arith.constant 1.280000e+02 : f32
    %748 = vector.broadcast %cst_241 : f32 to vector<16x1xf32>
    %749 = arith.divf %747, %748 : vector<16x1xf32>
    %750 = vector.broadcast %749 : vector<16x1xf32> to vector<16x128xf32>
    %751 = arith.subf %743, %750 : vector<16x128xf32>
    %752 = arith.mulf %751, %751 : vector<16x128xf32>
    %cst_242 = arith.constant dense<0.000000e+00> : vector<16xf32>
    %753 = vector.multi_reduction <add>, %752, %cst_242 [1] : vector<16x128xf32> to vector<16xf32>
    %754 = vector.shape_cast %753 : vector<16xf32> to vector<16x1xf32>
    %cst_243 = arith.constant 1.280000e+02 : f32
    %755 = vector.broadcast %cst_243 : f32 to vector<16x1xf32>
    %756 = arith.divf %754, %755 : vector<16x1xf32>
    %cst_244 = arith.constant 9.99999974E-6 : f32
    %757 = vector.broadcast %cst_244 : f32 to vector<16x1xf32>
    %758 = arith.addf %756, %757 : vector<16x1xf32>
    %759 = math.rsqrt %758 : vector<16x1xf32>
    %760 = vector.broadcast %759 : vector<16x1xf32> to vector<16x128xf32>
    %761 = arith.mulf %751, %760 : vector<16x128xf32>
    %762 = vector.broadcast %744 : vector<1x128xf32> to vector<16x128xf32>
    %763 = arith.mulf %761, %762 : vector<16x128xf32>
    %764 = vector.broadcast %745 : vector<1x128xf32> to vector<16x128xf32>
    %765 = arith.addf %763, %764 : vector<16x128xf32>
    %766 = arith.addf %669, %765 : vector<16x128xf32>
    %767 = vector.shape_cast %766 : vector<16x128xf32> to vector<1x16x128xf32>
    %c0_245 = arith.constant 0 : index
    %c0_246 = arith.constant 0 : index
    %c0_247 = arith.constant 0 : index
    %768 = vector.load %arg12[%c0_245, %c0_246, %c0_247] : memref<1x16x128xf32, #tpu.memory_space<vmem>>, vector<1x16x128xf32>
    tpu.vector_store %arg12[%c0_245, %c0_246, %c0_247], %767 {strides = array<i32>} : memref<1x16x128xf32, #tpu.memory_space<vmem>>, vector<1x16x128xf32>,
    return
  }
  func.func @transform_0(%arg0: i32) -> (i32, i32, i32) {
    %c0_i32 = arith.constant 0 : i32
    %c0_i32_0 = arith.constant 0 : i32
    %c0_i32_1 = arith.constant 0 : i32
    return %arg0, %c0_i32, %c0_i32_0 : i32, i32, i32
  }
  func.func @transform_1(%arg0: i32) -> (i32, i32) {
    %c0_i32 = arith.constant 0 : i32
    %c0_i32_0 = arith.constant 0 : i32
    %c0_i32_1 = arith.constant 0 : i32
    return %c0_i32, %c0_i32_0 : i32, i32
  }
  func.func @transform_2(%arg0: i32) -> (i32, i32) {
    %c0_i32 = arith.constant 0 : i32
    %c0_i32_0 = arith.constant 0 : i32
    %c0_i32_1 = arith.constant 0 : i32
    return %c0_i32, %c0_i32_0 : i32, i32
  }
  func.func @transform_3(%arg0: i32) -> (i32, i32) {
    %c0_i32 = arith.constant 0 : i32
    %c0_i32_0 = arith.constant 0 : i32
    %c0_i32_1 = arith.constant 0 : i32
    return %c0_i32, %c0_i32_0 : i32, i32
  }
  func.func @transform_4(%arg0: i32) -> (i32, i32) {
    %c0_i32 = arith.constant 0 : i32
    %c0_i32_0 = arith.constant 0 : i32
    %c0_i32_1 = arith.constant 0 : i32
    return %c0_i32, %c0_i32_0 : i32, i32
  }
  func.func @transform_5(%arg0: i32) -> (i32, i32) {
    %c0_i32 = arith.constant 0 : i32
    %c0_i32_0 = arith.constant 0 : i32
    %c0_i32_1 = arith.constant 0 : i32
    return %c0_i32, %c0_i32_0 : i32, i32
  }
  func.func @transform_6(%arg0: i32) -> (i32, i32) {
    %c0_i32 = arith.constant 0 : i32
    %c0_i32_0 = arith.constant 0 : i32
    %c0_i32_1 = arith.constant 0 : i32
    return %c0_i32, %c0_i32_0 : i32, i32
  }
  func.func @transform_7(%arg0: i32) -> (i32, i32) {
    %c0_i32 = arith.constant 0 : i32
    %c0_i32_0 = arith.constant 0 : i32
    %c0_i32_1 = arith.constant 0 : i32
    return %c0_i32, %c0_i32_0 : i32, i32
  }
  func.func @transform_8(%arg0: i32) -> (i32, i32) {
    %c0_i32 = arith.constant 0 : i32
    %c0_i32_0 = arith.constant 0 : i32
    %c0_i32_1 = arith.constant 0 : i32
    return %c0_i32, %c0_i32_0 : i32, i32
  }
  func.func @transform_9(%arg0: i32) -> (i32, i32) {
    %c0_i32 = arith.constant 0 : i32
    %c0_i32_0 = arith.constant 0 : i32
    %c0_i32_1 = arith.constant 0 : i32
    return %c0_i32, %c0_i32_0 : i32, i32
  }
  func.func @transform_10(%arg0: i32) -> (i32, i32) {
    %c0_i32 = arith.constant 0 : i32
    %c0_i32_0 = arith.constant 0 : i32
    %c0_i32_1 = arith.constant 0 : i32
    return %c0_i32, %c0_i32_0 : i32, i32
  }
  func.func @transform_11(%arg0: i32) -> (i32, i32, i32) {
    %c0_i32 = arith.constant 0 : i32
    %c0_i32_0 = arith.constant 0 : i32
    %c0_i32_1 = arith.constant 0 : i32
    return %arg0, %c0_i32, %c0_i32_0 : i32, i32, i32
  }
}

</mosaic_0001>

<bundles_post_ra>
// kernel: tpu_custom_call.1
= control target key start
LH: loop header
LB: loop body
LE: loop exit
PB: predicated region body
PF: predicated region fallthrough
CT: control target
= control target key end

     0   :  { %s7028_s0 = inlined_call_operand.hbm [shape: f32[2,16,128], index: 0, kind: input, shape index: {}]   ;;  %s7029_s1 = inlined_call_operand.hbm [shape: f32[21,512], index: 1, kind: input, shape index: {}]   ;;  %s7030_s2 = inlined_call_operand.hbm [shape: bf16[128,256], index: 2, kind: input, shape index: {}]   ;;  %s7031_s3 = inlined_call_operand.hbm [shape: bf16[256,128], index: 3, kind: input, shape index: {}]   ;;  %s7032_s4 = inlined_call_operand.hbm [shape: bf16[128,768], index: 4, kind: input, shape index: {}]   ;;  %s7033_s5 = inlined_call_operand.hbm [shape: bf16[256,128], index: 5, kind: input, shape index: {}]   ;;  %s7034_s6 = inlined_call_operand.hbm [shape: bf16[128,512], index: 6, kind: input, shape index: {}]   ;;  %s7035_s7 = inlined_call_operand.hbm [shape: f32[31,256], index: 7, kind: input, shape index: {}]   ;;  %s7036_s8 = inlined_call_operand.hbm [shape: bf16[256,128], index: 8, kind: input, shape index: {}]   ;;  %s7037_s9 = inlined_call_operand.hbm [shape: bf16[128,256], index: 9, kind: input, shape index: {}]   ;;  %s7038_s10 = inlined_call_operand.hbm [shape: bf16[256,128], index: 10, kind: input, shape index: {}]   ;;  %s7039_s11 = inlined_call_operand.hbm [shape: f32[2,16,128], index: 11, kind: output, shape index: {}]  }
   0x1   :  { %7069 = sst [smem:[#allocation29_spill]] %s7029_s1 }
   0x2   :  { %7070 = sst [smem:[#allocation30_spill]] %s7030_s2 }
   0x3   :  { %7071 = sst [smem:[#allocation31_spill]] %s7031_s3 }
   0x4   :  { %7072 = sst [smem:[#allocation32_spill]] %s7032_s4 }
   0x5   :  { %7073 = sst [smem:[#allocation33_spill]] %s7033_s5 }
   0x6   :  { %7074 = sst [smem:[#allocation34_spill]] %s7034_s6 }
   0x7   :  { %16 = vsyncpa [#allocation3], 0 }
   0x8   :  { %18 = vsyncpa [#allocation3 + $0x1], 0 }
   0x9   :  { %19 = vsyncpa [#allocation6], 0 }
   0xa   :  { %20 = vsyncpa [#allocation9], 0 }
   0xb   :  { %21 = vsyncpa [#allocation12], 0 }
   0xc   :  { %22 = vsyncpa [#allocation15], 0 }
   0xd   :  { %23 = vsyncpa [#allocation18], 0 }
   0xe   :  { %24 = vsyncpa [#allocation4], 0 }
   0xf   :  { %26 = vsyncpa [#allocation4 + $0x1], 0  ;;  %s5731_s17 = smov 0   ;;  %s5733_s18 = smov 0  }
  0x10   :  { %s5735_s19 = smov 0   ;;  %s5737_s20 = smov 0  }
  0x11 LB: > { %s7075_s1 = sld [smem:[#allocation29_spill]]  ;;  %s5755_s24 = sadd.s32 4294967295, %s5646_s20   ;;  %s5646_s20 = sphi %s5737_s20, %s7141_s20   ;;  %s5642_s19 = sphi %s5735_s19, %s7140_s19   ;;  %s5638_s18 = sphi %s5733_s18, %s7139_s18   ;;  %s5634_s17 = sphi %s5731_s17, %s7138_s17  }
  0x12   : > { %p3976_p0 = scmp.ge.s32.totalorder %s5646_s20, 1  ;;  %p53_p1 = scmp.eq.s32.totalorder %s5755_s24, 0 }
  0x13   : > { %p299_p2 = scmp.lt.s32.totalorder %s5646_s20, 3  ;;  %s5648_s26 = smov [#allocation5]  }
  0x14   : > { %s312_s27 = sshll.u32 %s5648_s26, 4  ;;  %s7077_s3 = sld [smem:[#allocation31_spill]]  ;;  %s313_s27 = int_to_ptr.vmem [resolvable:$true] %s312_s27 }
  0x15   : > { %p5760_p3 = pnand %p3976_p0, %p299_p2  ;;  %s5649_s13 = smov [#allocation8]  }
  0x16   : > { %s340_s14 = sshll.u32 %s5649_s13, 4  ;;  %s5650_s15 = smov 512   ;;  %s341_s14 = int_to_ptr.vmem [resolvable:$true] %s340_s14 }
  0x17   : > { %s310_s23 = sshll.u32 %s7075_s1, 4  ;;  %p5004_p4 = pneg %p5760_p3  ;;  %s311_s23 = int_to_ptr.hbm [resolvable:$true] %s310_s23 }
  0x18   : > { %s5651_s16 = smov 32   ;;  %s7040_s21 = smov 64  }
  0x19   : > { %p5772_p6 = pnand %p5004_p4, %p53_p1  ;;  %s7042_s22 = smov 4  }
  0x1a   : > { %s338_s30 = sshll.u32 %s7077_s3, 4  ;;  %s7079_s5 = sld [smem:[#allocation33_spill]]  ;;  %s339_s30 = int_to_ptr.hbm [resolvable:$true] %s338_s30 }
  0x1b   : > { %5007 = dma.hbm_to_vmem [thread:$0]  (!%p5772_p6), %s311_s23, 1536, %s313_s27, [#allocation6], %s5650_s15, %s5650_s15, %s5651_s16  }
  0x1c   : > { %5013 = dma.hbm_to_vmem [thread:$0]  (!%p5772_p6), %s339_s30, 2048, %s341_s14, [#allocation9], %s7040_s21, %s7040_s21, %s7042_s22  }
  0x1d   : > { %s5654_s1 = smov [#allocation11]   ;;  %s394_s15 = sshll.u32 %s7035_s7, 4  ;;  %s395_s15 = int_to_ptr.hbm [resolvable:$true] %s394_s15 }
  0x1e   : > { %s368_s13 = sshll.u32 %s5654_s1, 4  ;;  %s5655_s30 = smov [#allocation14]   ;;  %s369_s13 = int_to_ptr.vmem [resolvable:$true] %s368_s13 }
  0x1f   : > { %s396_s14 = sshll.u32 %s5655_s30, 4  ;;  %s7044_s16 = smov 256   ;;  %s397_s14 = int_to_ptr.vmem [resolvable:$true] %s396_s14 }
  0x20   : > { %s366_s29 = sshll.u32 %s7079_s5, 4  ;;  %s7045_s26 = smov 16   ;;  %s367_s29 = int_to_ptr.hbm [resolvable:$true] %s366_s29 }
  0x21   : > { %5019 = dma.hbm_to_vmem [thread:$0]  (!%p5772_p6), %s367_s29, 2048, %s369_s13, [#allocation12], %s7040_s21, %s7040_s21, %s7042_s22  }
  0x22   : > { %5025 = dma.hbm_to_vmem [thread:$0]  (!%p5772_p6), %s395_s15, 1024, %s397_s14, [#allocation15], %s7044_s16, %s7044_s16, %s7045_s26  }
  0x23   : > { %s422_s29 = sshll.u32 %s7037_s9, 4  ;;  %s5658_s13 = smov [#allocation17]   ;;  %s423_s29 = int_to_ptr.hbm [resolvable:$true] %s422_s29 }
  0x24   : > { %s424_s23 = sshll.u32 %s5658_s13, 4  ;;  %s7080_s2 = sld [smem:[#allocation30_spill]]  ;;  %s425_s23 = int_to_ptr.vmem [resolvable:$true] %s424_s23 }
  0x25   : > { %s7046_s22 = smov 128   ;;  %s7047_s3 = smov 8  }
  0x26   : > { %5031 = dma.hbm_to_vmem [thread:$0]  (!%p5772_p6), %s423_s29, 2048, %s425_s23, [#allocation18], %s7046_s22, %s7046_s22, %s7047_s3  }
  0x27   : > { %s5661_s15 = smov [#allocation7]   ;;  %s7081_s4 = sld [smem:[#allocation32_spill]] }
  0x28   : > { %s326_s14 = sshll.u32 %s5661_s15, 4  ;;  %s5662_s21 = smov [#allocation10]   ;;  %s327_s14 = int_to_ptr.vmem [resolvable:$true] %s326_s14 }
  0x29   : > { %s354_s27 = sshll.u32 %s5662_s21, 4  ;;  %s7082_s6 = sld [smem:[#allocation34_spill]]  ;;  %s355_s27 = int_to_ptr.vmem [resolvable:$true] %s354_s27 }
  0x2a   : > { %s324_s30 = sshll.u32 %s7080_s2, 4  ;;  %s5663_s15 = smov 384   ;;  %s325_s30 = int_to_ptr.hbm [resolvable:$true] %s324_s30 }
  0x2b   : > { %5010 = dma.hbm_to_vmem [thread:$0]  (!%p5772_p6), %s325_s30, 2048, %s327_s14, [#allocation6], %s7046_s22, %s7046_s22, %s7047_s3  }
  0x2c   : > { %s5664_s26 = smov 24   ;;  %s5665_s1 = smov [#allocation13]  }
  0x2d   : > { %s352_s13 = sshll.u32 %s7081_s4, 4  ;;  %s382_s28 = sshll.u32 %s5665_s1, 4  ;;  %s353_s13 = int_to_ptr.hbm [resolvable:$true] %s352_s13  ;;  %s383_s28 = int_to_ptr.vmem [resolvable:$true] %s382_s28 }
  0x2e   : > { %5016 = dma.hbm_to_vmem [thread:$0]  (!%p5772_p6), %s353_s13, 6144, %s355_s27, [#allocation9], %s5663_s15, %s5663_s15, %s5664_s26  }
  0x2f   : > { %s380_s23 = sshll.u32 %s7082_s6, 4  ;;  %s408_s30 = sshll.u32 %s7036_s8, 4  ;;  %s381_s23 = int_to_ptr.hbm [resolvable:$true] %s380_s23  ;;  %s409_s30 = int_to_ptr.hbm [resolvable:$true] %s408_s30 }
  0x30   : > { %s7083_s16 = smov 16   ;;  %s7084_s14 = smov 256  }
  0x31   : > { %5022 = dma.hbm_to_vmem [thread:$0]  (!%p5772_p6), %s381_s23, 4096, %s383_s28, [#allocation12], %s7084_s14, %s7084_s14, %s7083_s16  }
  0x32   : > { %s436_s21 = sshll.u32 %s7038_s10, 4  ;;  %s5666_s27 = smov [#allocation16]   ;;  %s437_s21 = int_to_ptr.hbm [resolvable:$true] %s436_s21 }
  0x33   : > { %s410_s2 = sshll.u32 %s5666_s27, 4  ;;  %s7085_s4 = smov 4   ;;  %s411_s2 = int_to_ptr.vmem [resolvable:$true] %s410_s2 }
  0x34   : > { %s7086_s29 = smov 64   ;;  %s5667_s23 = smov [#allocation19]  }
  0x35   : > { %5028 = dma.hbm_to_vmem [thread:$0]  (!%p5772_p6), %s409_s30, 2048, %s411_s2, [#allocation15], %s7086_s29, %s7086_s29, %s7085_s4  }
  0x36   : > { %s438_s15 = sshll.u32 %s5667_s23, 4  ;;  %s3975_s1 = sadd.s32 4294967294, %s5646_s20   ;;  %s439_s15 = int_to_ptr.vmem [resolvable:$true] %s438_s15 }
  0x37   : > { %5034 = dma.hbm_to_vmem [thread:$0]  (!%p5772_p6), %s437_s21, 2048, %s439_s15, [#allocation18], %s7086_s29, %s7086_s29, %s7085_s4  }
  0x38   : > { %s5846_s28 = sadd.s32 1, %s5646_s20   ;;  %s39_s14 = sadd.s32 1, %s5642_s19 }
  0x39   : > { %s36_s16 = ssub.s32 %s5646_s20, %s5846_s28  ;;  %p46_p8 = scmp.ne.s32.totalorder %s5642_s19, %s5638_s18 }
  0x3a   : > { %p37_p7 = scmp.eq.s32.totalorder %s36_s16, 0  ;;  %p47_p9 = scmp.eq.s32.totalorder %s5646_s20, 0 }
  0x3b   : > { %p52_p10 = scmp.ne.s32.totalorder %s5638_s18, %s5634_s17  ;;  %p286_p13 = scmp.eq.s32.totalorder %s5755_s24, 1 }
  0x3c   : > { %s5857_s30 = scalar_select %p37_p7, %s5642_s19, %s39_s14  }
  0x3d   : > { %p5859_p11 = por %p47_p9, %p46_p8  ;;  %p5865_p12 = por %p53_p1, %p52_p10 }
  0x3e   : > { %p292_p0 = scmp.eq.s32.totalorder %s3975_s1, 1  ;;  %p5053_p2 = scmp.lt.s32.totalorder %s5646_s20, 2 }
  0x3f   : > { %s452_s13 = sand.u32 1, %s5642_s19   ;;  %p5872_p4 = por %p286_p13, %p46_p8 }
  0x40   : > { %p5876_p6 = por %p292_p0, %p52_p10  ;;  %s3988_s2 = sshll.u32 %s452_s13, 4 }
  0x41   : > { %s4782_s4 = sshll.u32 %s5646_s20, 4  ;;  %s456_s16 = scalar_lea.vmem [#allocation2], %s3988_s2 }
  0x42   : > { %s461_s15 = scalar_lea.hbm %s7028_s0, %s4782_s4  ;;  %s464_s14 = sshll.u32 %s456_s16, 4  ;;  %s465_s14 = int_to_ptr.vmem [resolvable:$true] %s464_s14 }
  0x43   : > { %s462_s22 = sshll.u32 %s461_s15, 4  ;;  %p5886_p7 = pnand %p5053_p2, %p5859_p11  ;;  %s463_s22 = int_to_ptr.hbm [resolvable:$true] %s462_s22 }
  0x44   : > { %s453_s3 = scalar_lea.sflag [#allocation3], %s452_s13  ;;  %s5530_s5 = sshra.s32 %s463_s22, 4  ;;  %s5531_s5 = int_to_ptr.hbm [resolvable:$true] %s5530_s5 }
  0x45   : > { %s5532_s6 = scalar_lea.hbm %s5531_s5, 16  ;;  %p5534_p9 = pneg %p5886_p7 }
  0x46   : > { %p5533_p8 = scmp.ne.s32.totalorder %s5531_s5, %s5532_s6  ;;  %s5537_s29 = scalar_lea.hbm %s7028_s0, 32 }
  0x47   : > { %p5538_p11 = scmp.lt.s32.totalorder %s5531_s5, %s7028_s0  ;;  %p5539_p0 = scmp.lt.s32.totalorder %s5537_s29, %s5532_s6 }
  0x48   : > { %p5535_p10 = pnand %p5534_p9, %p5533_p8 }
  0x49   : > { %p5540_p2 = por %p5539_p0, %p5538_p11 }
  0x4a   : > { %p5536_p13 = pneg %p5535_p10 }
  0x4c   : > { %p5541_p5 = pnand %p5540_p2, %p5536_p13 }
  0x4e   : > { %5544 = shalt.err (!%p5541_p5)
}
  0x4f   : > { %s7092_s13 = smov 8   ;;  %s7093_s15 = smov 128  }
  0x50   : > { %5038 = dma.hbm_to_vmem [thread:$0]  (!%p5886_p7), %s463_s22, 256, %s465_s14, %s453_s3, %s7093_s15, %s7093_s15, %s7092_s13  }
  0x51   : > { %476 = sbr.rel (%p5760_p3) target bundleno = 3973 (0xf85), region = 64 }
  0x56   : > { %s5906_s16 = sand.u32 1, %s5638_s18  }
  0x57   : > { %s3992_s5 = sshll.u32 %s5906_s16, 4  ;;  %s479_s6 = scalar_lea.sflag [#allocation3], %s5906_s16 }
  0x58   : > { %s482_s2 = scalar_lea.vmem [#allocation2], %s3992_s5 }
  0x59   : > { %5605 = dma.done.wait (%p5865_p12), %s479_s6, 256  }
  0x5a   : > { %5607 = vsyncadd (%p5865_p12), %s479_s6, 4294967040 }
  0x5b   : > { %5609 = dma.done.wait (%p53_p1), [#allocation6], 3584  }
  0x5c   : > { %5611 = vsyncadd (%p53_p1), [#allocation6], 4294963712 }
  0x5d   : > { %5613 = dma.done.wait (%p53_p1), [#allocation9], 8192  }
  0x5e   : > { %5615 = vsyncadd (%p53_p1), [#allocation9], 4294959104 }
  0x5f   : > { %5617 = dma.done.wait (%p53_p1), [#allocation12], 6144  }
  0x60   : > { %5619 = vsyncadd (%p53_p1), [#allocation12], 4294961152 }
  0x61   : > { %5621 = dma.done.wait (%p53_p1), [#allocation15], 3072  }
  0x62   : > { %5623 = vsyncadd (%p53_p1), [#allocation15], 4294964224 }
  0x63   : > { %5625 = dma.done.wait (%p53_p1), [#allocation18], 4096  }
  0x64   : > { %5627 = vsyncadd (%p53_p1), [#allocation18], 4294963200  ;;  %v5936_v0 = vld [vmem:[%s482_s2] sm:$0xff]  ;;  %v5939_v1 = vld [vmem:[%s482_s2 + $0x8] sm:$0xff]  ;;  %v5668_v2 = vmov 128.0   ;;  %s4959_s3 = sshll.u32 %s5755_s24, 4 }
  0x65   : > { %577 = vadd.xlane.f32.xlu0 %v5936_v0  ;;  %5120 = vrcp.f32 %v5668_v2  ;;  %v4062_v17 = vld [vmem:[#allocation7 + $0x70] sm:$0xf]  ;;  %v4798_v18 = vld [vmem:[#allocation7 + $0x74] sm:$0xf0]  ;;  %v4797_v19 = vld [vmem:[#allocation7 + $0x74] sm:$0xf]  ;;  %s3803_s26 = scalar_lea.hbm %s7039_s11, %s4959_s3 }
  0x66   : > { %v4063_v20 = vor.u32 %v4798_v18, %v4062_v17  ;;  %v4064_v21 = vld [vmem:[#allocation7 + $0x78] sm:$0xf0]  ;;  %v4054_v23 = vld [vmem:[#allocation7 + $0x60] sm:$0xf]  ;;  %v4796_v24 = vld [vmem:[#allocation7 + $0x64] sm:$0xf0] }
  0x67   : > { %v4067_v22 = vor.u32 %v4797_v19, %v4064_v21  ;;  %v4795_v25 = vld [vmem:[#allocation7 + $0x64] sm:$0xf]  ;;  %v4055_v26 = vor.u32 %v4796_v24, %v4054_v23  ;;  %v4056_v27 = vld [vmem:[#allocation7 + $0x68] sm:$0xf0]  ;;  %v4046_v29 = vld [vmem:[#allocation7 + $0x50] sm:$0xf] }
  0x68   : > { %732 = vmatpush.bf16.msra.mxu0 %v4063_v20  ;;  %v4059_v28 = vor.u32 %v4795_v25, %v4056_v27  ;;  %v4794_v30 = vld [vmem:[#allocation7 + $0x54] sm:$0xf0]  ;;  %v4793_v31 = vld [vmem:[#allocation7 + $0x54] sm:$0xf]  ;;  %v4048_v33 = vld [vmem:[#allocation7 + $0x58] sm:$0xf0] }
  0x69   : > { %746 = vmatpush.bf16.msra.mxu1 %v4067_v22  ;;  %v4047_v32 = vor.u32 %v4794_v30, %v4046_v29  ;;  %v4051_v34 = vor.u32 %v4793_v31, %v4048_v33  ;;  %v4038_v35 = vld [vmem:[#allocation7 + $0x40] sm:$0xf]  ;;  %v4792_v36 = vld [vmem:[#allocation7 + $0x44] sm:$0xf0]  ;;  %v4791_v37 = vld [vmem:[#allocation7 + $0x44] sm:$0xf] }
  0x6a   : > { %v4039_v38 = vor.u32 %v4792_v36, %v4038_v35  ;;  %v4040_v39 = vld [vmem:[#allocation7 + $0x48] sm:$0xf0]  ;;  %v4030_v41 = vld [vmem:[#allocation7 + $0x30] sm:$0xf]  ;;  %v4790_v42 = vld [vmem:[#allocation7 + $0x34] sm:$0xf0] }
  0x6b   : > { %v5121_v3 = vpop.eup %5120  ;;  %v4043_v40 = vor.u32 %v4791_v37, %v4040_v39  ;;  %v4789_v43 = vld [vmem:[#allocation7 + $0x34] sm:$0xf]  ;;  %v4031_v44 = vor.u32 %v4790_v42, %v4030_v41  ;;  %v4032_v45 = vld [vmem:[#allocation7 + $0x38] sm:$0xf0]  ;;  %v4022_v47 = vld [vmem:[#allocation7 + $0x20] sm:$0xf] }
  0x6c   : > { %v582_v4 = vmul.f32 128.0, %v5121_v3  ;;  %vm586_vm0 = vweird.f32 %v5121_v3  ;;  %733 = vmatpush.bf16.msra.mxu0 %v4055_v26  ;;  %v4035_v46 = vor.u32 %v4789_v43, %v4032_v45  ;;  %v4788_v48 = vld [vmem:[#allocation7 + $0x24] sm:$0xf0]  ;;  %v4787_v49 = vld [vmem:[#allocation7 + $0x24] sm:$0xf]  ;;  %v4806_v41 = vld [vmem:[#allocation8 + $0x38] sm:$0xff] }
  0x6d   : > { %579 = vadd.xlane.f32.xlu0 %v5939_v1  ;;  %747 = vmatpush.bf16.msra.mxu1 %v4059_v28  ;;  %v4023_v50 = vor.u32 %v4788_v48, %v4022_v47  ;;  %v4024_v51 = vld [vmem:[#allocation7 + $0x28] sm:$0xf0]  ;;  %v4014_v53 = vld [vmem:[#allocation7 + $0x10] sm:$0xf]  ;;  %v4786_v54 = vld [vmem:[#allocation7 + $0x14] sm:$0xf0] }
  0x6e   : > { %v583_v5 = vsub.f32 1.0, %v582_v4  ;;  %v4027_v52 = vor.u32 %v4787_v49, %v4024_v51  ;;  %v4785_v55 = vld [vmem:[#allocation7 + $0x14] sm:$0xf]  ;;  %v4015_v56 = vor.u32 %v4786_v54, %v4014_v53  ;;  %v4016_v57 = vld [vmem:[#allocation7 + $0x18] sm:$0xf0]  ;;  %1051 = vmatpush.bf16.msra.mxu2 %v4806_v41  ;;  %v4812_v51 = vld [vmem:[#allocation8 + $0x68] sm:$0xff] }
  0x6f   : > { %v4006_v58 = vld [vmem:[#allocation7] sm:$0xf]  ;;  %v4784_v59 = vld [vmem:[#allocation7 + $0x4] sm:$0xf0]  ;;  %v4019_v60 = vor.u32 %v4785_v55, %v4016_v57  ;;  %v4783_v61 = vld [vmem:[#allocation7 + $0x4] sm:$0xf] }
  0x70   : > { %v584_v6 = vmul.f32 %v5121_v3, %v583_v5  ;;  %734 = vmatpush.bf16.msra.mxu0 %v4047_v32  ;;  %v4008_v62 = vld [vmem:[#allocation7 + $0x8] sm:$0xf0]  ;;  %v4007_v2 = vor.u32 %v4784_v59, %v4006_v58  ;;  %v575_v26 = vld [vmem:[#allocation5] ss:$0 sm:$0xff]  ;;  %v576_v30 = vld [vmem:[#allocation5 + $0x1] ss:$0 sm:$0xff] }
  0x71   : > { %748 = vmatpush.bf16.msra.mxu1 %v4051_v34  ;;  %v4011_v4 = vor.u32 %v4783_v61, %v4008_v62  ;;  %v646_v35 = vld [vmem:[#allocation5 + $0x2] ss:$8 sm:$0x3]  ;;  %v4814_v42 = vld [vmem:[#allocation8 + $0x78] sm:$0xff]  ;;  %v4813_v45 = vld [vmem:[#allocation8 + $0x70] sm:$0xff]  ;;  %s571_s14 = scalar_lea.vmem [#allocation20], %s3992_s5 }
  0x72   : > { %v585_v7 = vadd.f32 %v5121_v3, %v584_v6  ;;  %v648_v36 = vperm.slane %v646_v35, 0  ;;  %v649_v37 = vperm.slane %v646_v35, 1  ;;  %1065 = vmatpush.bf16.msra.mxu3 %v4814_v42  ;;  %v4803_v58 = vld [vmem:[#allocation8 + $0x20] sm:$0xff]  ;;  %s3804_s1 = sshll.u32 %s571_s14, 4  ;;  %s3806_s4 = sshll.u32 %s3803_s26, 4  ;;  %s3805_s1 = int_to_ptr.vmem [resolvable:$true] %s3804_s1  ;;  %s3807_s4 = int_to_ptr.hbm [resolvable:$true] %s3806_s4 }
  0x73   : > { %v4811_v59 = vld [vmem:[#allocation8 + $0x60] sm:$0xff]  ;;  %s3792_s24 = scalar_lea.sflag [#allocation4], %s5906_s16  ;;  %s5574_s29 = sshra.s32 %s3807_s4, 4  ;;  %s5575_s29 = int_to_ptr.hbm [resolvable:$true] %s5574_s29 }
  0x74   : > { %v5942_v8 = vsel %vm586_vm0, %v5121_v3, %v585_v7  ;;  %735 = vmatpush.bf16.msra.mxu0 %v4039_v38  ;;  %v4807_v41 = vld [vmem:[#allocation8 + $0x40] sm:$0xff]  ;;  %s5576_s23 = scalar_lea.hbm %s5575_s29, 16  ;;  %s5580_s15 = scalar_lea.hbm %s7039_s11, 32 }
  0x75   : > { %7094 = vst [vmem:[#allocation28_spill] sm:$0xff] %v5942_v8  ;;  %749 = vmatpush.bf16.msra.mxu1 %v4043_v40  ;;  %p5577_p1 = scmp.ne.s32.totalorder %s5575_s29, %s5576_s23  ;;  %p5581_p12 = scmp.lt.s32.totalorder %s5575_s29, %s7039_s11 }
  0x76   : > { %1066 = vmatpush.bf16.msra.mxu3 %v4813_v45  ;;  %p5582_p7 = scmp.lt.s32.totalorder %s5580_s15, %s5576_s23 }
  0x77   : > { %p5578_p3 = pnand %p5577_p1, %p5872_p4 }
  0x78   : > { %736 = vmatpush.bf16.msra.mxu0 %v4031_v44  ;;  %v4805_v44 = vld [vmem:[#allocation8 + $0x30] sm:$0xff]  ;;  %p5583_p8 = por %p5582_p7, %p5581_p12 }
  0x79   : > { %750 = vmatpush.bf16.msra.mxu1 %v4035_v46  ;;  %1052 = vmatpush.bf16.msra.mxu2 %v4805_v44  ;;  %p5579_p5 = pneg %p5578_p3 }
  0x7a   : > { %1067 = vmatpush.bf16.msra.mxu3 %v4812_v51 }
  0x7b   : > { %p5584_p9 = pnand %p5583_p8, %p5579_p5 }
  0x7c   : > { %737 = vmatpush.bf16.msra.mxu0 %v4023_v50  ;;  %v4804_v50 = vld [vmem:[#allocation8 + $0x28] sm:$0xff] }
  0x7d   : > { %751 = vmatpush.bf16.msra.mxu1 %v4027_v52  ;;  %1053 = vmatpush.bf16.msra.mxu2 %v4804_v50 }
  0x7e   : > { %1068 = vmatpush.bf16.msra.mxu3 %v4811_v59 }
  0x80   : > { %738 = vmatpush.bf16.msra.mxu0 %v4015_v56 }
  0x81   : > { %752 = vmatpush.bf16.msra.mxu1 %v4019_v60  ;;  %1054 = vmatpush.bf16.msra.mxu2 %v4803_v58 }
  0x84   : > { %739 = vmatpush.bf16.msra.mxu0 %v4007_v2  ;;  %v4810_v2 = vld [vmem:[#allocation8 + $0x58] sm:$0xff] }
  0x85   : > { %753 = vmatpush.bf16.msra.mxu1 %v4011_v4  ;;  %1069 = vmatpush.bf16.msra.mxu3 %v4810_v2 }
  0xd8   : > { %v578_v9 = vpop.xlane.xlu0 %577 }
  0xd9   : > { %v588_v10 = vmul.f32 %v5942_v8, %v578_v9 }
  0xdb   : > { %v5946_v11 = vsub.f32 %v5936_v0, %v588_v10 }
  0xdd   : > { %v592_v12 = vmul.f32 %v5946_v11, %v5946_v11 }
  0xdf   : > { %594 = vadd.xlane.f32.xlu1 %v592_v12 }
  0xe0   : > { %v580_v13 = vpop.xlane.xlu0 %579 }
  0xe1   : > { %v589_v14 = vmul.f32 %v5942_v8, %v580_v13 }
  0xe3   : > { %v5952_v15 = vsub.f32 %v5939_v1, %v589_v14 }
  0xe5   : > { %v593_v16 = vmul.f32 %v5952_v15, %v5952_v15 }
  0xe7   : > { %596 = vadd.xlane.f32.xlu1 %v593_v16 }
 0x152   : > { %v595_v63 = vpop.xlane.xlu1 %594 }
 0x153   : > { %v598_v3 = vmul.f32 %v595_v63, %v5942_v8  ;;  %v4802_v63 = vld [vmem:[#allocation8 + $0x18] sm:$0xff] }
 0x154   : > { %1055 = vmatpush.bf16.msra.mxu2 %v4802_v63 }
 0x155   : > { %v600_v5 = vadd.f32 1e-05, %v598_v3 }
 0x157   : > { %5122 = vrsqrt.f32 %v600_v5  ;;  %vm608_vm2 = vweird.f32 %v600_v5 }
 0x15a   : > { %v597_v6 = vpop.xlane.xlu1 %596 }
 0x15b   : > { %v599_v7 = vmul.f32 %v597_v6, %v5942_v8 }
 0x15d   : > { %v5123_v9 = vpop.eup %5122  ;;  %v601_v10 = vadd.f32 1e-05, %v599_v7 }
 0x15e   : > { %v603_v12 = vmul.f32 %v5123_v9, %v600_v5  ;;  %vm609_vm1 = vweird.f32 %v5123_v9 }
 0x15f   : > { %5124 = vrsqrt.f32 %v601_v10  ;;  %vm610_vm3 = vmor %vm608_vm2, %vm609_vm1  ;;  %vm618_vm5 = vweird.f32 %v601_v10 }
 0x160   : > { %v604_v13 = vmul.f32 %v5123_v9, %v603_v12 }
 0x162   : > { %v605_v14 = vmul.f32 0.5, %v604_v13  ;;  %v4801_v13 = vld [vmem:[#allocation8 + $0x10] sm:$0xff] }
 0x163   : > { %1056 = vmatpush.bf16.msra.mxu2 %v4801_v13 }
 0x164   : > { %v606_v16 = vsub.f32 1.5, %v605_v14  ;;  %v4809_v14 = vld [vmem:[#allocation8 + $0x50] sm:$0xff] }
 0x165   : > { %v5125_v17 = vpop.eup %5124  ;;  %1070 = vmatpush.bf16.msra.mxu3 %v4809_v14 }
 0x166   : > { %v607_v18 = vmul.f32 %v5123_v9, %v606_v16  ;;  %v613_v19 = vmul.f32 %v5125_v17, %v601_v10  ;;  %vm619_vm4 = vweird.f32 %v5125_v17 }
 0x167   : > { %vm620_vm6 = vmor %vm618_vm5, %vm619_vm4 }
 0x168   : > { %v614_v20 = vmul.f32 %v5125_v17, %v613_v19  ;;  %v611_v22 = vsel %vm610_vm3, %v5123_v9, %v607_v18 }
 0x169   : > { %v622_v24 = vmul.f32 %v611_v22, %v5946_v11 }
 0x16a   : > { %v615_v21 = vmul.f32 0.5, %v614_v20 }
 0x16b   : > { %v624_v29 = vmul.f32 %v622_v24, %v575_v26 }
 0x16c   : > { %v616_v23 = vsub.f32 1.5, %v615_v21 }
 0x16d   : > { %v626_v32 = vadd.f32 %v624_v29, %v576_v30 }
 0x16e   : > { %v617_v25 = vmul.f32 %v5125_v17, %v616_v23 }
 0x170   : > { %v621_v27 = vsel %vm620_vm6, %v5125_v17, %v617_v25 }
 0x171   : > { %v623_v28 = vmul.f32 %v621_v27, %v5952_v15  ;;  %v4808_v27 = vld [vmem:[#allocation8 + $0x48] sm:$0xff] }
 0x172   : > { %1071 = vmatpush.bf16.msra.mxu3 %v4808_v27 }
 0x173   : > { %v625_v31 = vmul.f32 %v623_v28, %v575_v26  ;;  %v4800_v26 = vld [vmem:[#allocation8 + $0x8] sm:$0xff] }
 0x174   : > { %1057 = vmatpush.bf16.msra.mxu2 %v4800_v26 }
 0x175   : > { %v627_v33 = vadd.f32 %v625_v31, %v576_v30 }
 0x176   : > { %1072 = vmatpush.bf16.msra.mxu3 %v4807_v41 }
 0x177   : > { %v628_v34 = vpack.c.bf16 %v627_v33, %v626_v32 }
 0x179   : > { %740 = vmatmul.bf16.vlgmr.msra.gmra.mxu0 %v628_v34  ;;  %754 = vmatmul.bf16.vlgmr.msra.gmra.mxu1 %v628_v34 }
 0x1f6   : > { %v741_v38 = vpop.f32.mrf.mxu0  ;;  %v755_v11 = vpop.f32.mrf.mxu1 }
 0x1f7   : > { %v5960_v39 = vadd.f32 %v741_v38, %v648_v36  ;;  %v5962_v40 = vadd.f32 %v755_v11, %v649_v37  ;;  %v4799_v11 = vld [vmem:[#allocation8] sm:$0xff] }
 0x1f8   : > { %1058 = vmatpush.bf16.msra.mxu2 %v4799_v11 }
 0x1f9   : > { %v5965_v15 = vmul.f32 0.70710677, %v5960_v39  ;;  %v5968_v43 = vmul.f32 0.70710677, %v5962_v40 }
 0x1fb   : > { %v768_v46 = vand.u32 2147483647, %v5965_v15  ;;  %v5972_v47 = vand.u32 2147483647, %v5968_v43 }
 0x1fd   : > { %v772_v48 = vmul.f32 0.3275911, %v768_v46  ;;  %v773_v49 = vmul.f32 0.3275911, %v5972_v47  ;;  %v876_v17 = vsub.f32 0.0, %v768_v46  ;;  %v877_v18 = vsub.f32 0.0, %v5972_v47 }
 0x1fe   : > { %v743_v52 = vpop.f32.mrf.mxu0  ;;  %v757_v53 = vpop.f32.mrf.mxu1 }
 0x1ff   : > { %v776_v54 = vadd.f32 1.0, %v772_v48  ;;  %v5975_v55 = vadd.f32 1.0, %v773_v49  ;;  %v5977_v56 = vadd.f32 %v743_v52, %v648_v36  ;;  %v5979_v57 = vadd.f32 %v757_v53, %v649_v37 }
 0x200   : > { %v880_v32 = vmul.f32 %v876_v17, %v768_v46  ;;  %v881_v36 = vmul.f32 %v877_v18, %v5972_v47 }
 0x201   : > { %5126 = vrcp.f32 %v776_v54  ;;  %v5983_v60 = vmul.f32 0.70710677, %v5977_v56  ;;  %v5986_v61 = vmul.f32 0.70710677, %v5979_v57  ;;  %v791_v20 = vand.u32 2147483648, %v776_v54 }
 0x202   : > { %5128 = vrcp.f32 %v5975_v55  ;;  %v806_v22 = vand.u32 2147483648, %v5975_v55  ;;  %v789_v24 = vand.u32 2147483647, %v776_v54  ;;  %v804_v28 = vand.u32 2147483647, %v5975_v55 }
 0x203   : > { %v5989_v62 = vand.u32 2147483647, %v5983_v60  ;;  %v5992_v3 = vand.u32 2147483647, %v5986_v61  ;;  %vm785_vm9 = vweird.f32 %v776_v54  ;;  %v792_v31 = vor.u32 1.1754944e-38, %v791_v20 }
 0x204   : > { %vm800_vm11 = vweird.f32 %v5975_v55  ;;  %v807_v35 = vor.u32 1.1754944e-38, %v806_v22  ;;  %vm790_vm13 = vcmp.eq.f32.partialorder %v789_v24, 8.507059e+37  ;;  %vm805_vm14 = vcmp.eq.f32.partialorder %v804_v28, 8.507059e+37 }
 0x205   : > { %v774_v5 = vmul.f32 0.3275911, %v5989_v62  ;;  %v775_v9 = vmul.f32 0.3275911, %v5992_v3  ;;  %v884_v49 = vmul.f32 1.442695, %v880_v32 }
 0x206   : > { %v886_v52 = vmul.f32 1.442695, %v881_v36 }
 0x207   : > { %v5127_v4 = vpop.eup %5126  ;;  %v5997_v12 = vadd.f32 1.0, %v774_v5  ;;  %v6000_v19 = vadd.f32 1.0, %v775_v9 }
 0x208   : > { %v5129_v6 = vpop.eup %5128  ;;  %v781_v7 = vmul.f32 %v5127_v4, %v776_v54  ;;  %vm786_vm7 = vweird.f32 %v5127_v4 }
 0x209   : > { %v796_v10 = vmul.f32 %v5129_v6, %v5975_v55  ;;  %5130 = vrcp.f32 %v5997_v12  ;;  %vm801_vm8 = vweird.f32 %v5129_v6  ;;  %vm6006_vm10 = vmor %vm785_vm9, %vm786_vm7  ;;  %v821_v55 = vand.u32 2147483648, %v5997_v12 }
 0x20a   : > { %v782_v16 = vsub.f32 1.0, %v781_v7  ;;  %5132 = vrcp.f32 %v6000_v19  ;;  %vm6011_vm12 = vmor %vm800_vm11, %vm801_vm8  ;;  %v836_v59 = vand.u32 2147483648, %v6000_v19  ;;  %v834_v7 = vand.u32 2147483647, %v6000_v19 }
 0x20b   : > { %v797_v21 = vsub.f32 1.0, %v796_v10  ;;  %vm815_vm1 = vweird.f32 %v5997_v12  ;;  %v878_v10 = vsub.f32 0.0, %v5989_v62  ;;  %vm830_vm3 = vweird.f32 %v6000_v19 }
 0x20c   : > { %v783_v23 = vmul.f32 %v5127_v4, %v782_v16  ;;  %v822_v16 = vor.u32 1.1754944e-38, %v821_v55  ;;  %v837_v20 = vor.u32 1.1754944e-38, %v836_v59  ;;  %vm835_vm6 = vcmp.eq.f32.partialorder %v834_v7, 8.507059e+37 }
 0x20d   : > { %v798_v25 = vmul.f32 %v5129_v6, %v797_v21  ;;  %5134 = vpow2.f32 %v884_v49  ;;  %v882_v32 = vmul.f32 %v878_v10, %v5989_v62  ;;  %vm900_vm7 = vcmp.ge.f32.partialorder %v5965_v15, 0.0 }
 0x20e   : > { %v784_v29 = vadd.f32 %v5127_v4, %v783_v23  ;;  %5136 = vpow2.f32 %v886_v52  ;;  %vm901_vm8 = vcmp.ge.f32.partialorder %v5968_v43, 0.0  ;;  %vm902_vm9 = vcmp.ge.f32.partialorder %v5983_v60, 0.0 }
 0x20f   : > { %v799_v33 = vadd.f32 %v5129_v6, %v798_v25  ;;  %v5131_v38 = vpop.eup %5130  ;;  %v879_v25 = vsub.f32 0.0, %v5992_v3  ;;  %v762_v15 = vmul.f32 0.5, %v5977_v56  ;;  %v761_v43 = vmul.f32 0.5, %v5962_v40 }
 0x210   : > { %v788_v37 = vsel %vm6006_vm10, %v5127_v4, %v784_v29  ;;  %v5133_v45 = vpop.eup %5132  ;;  %v811_v46 = vmul.f32 %v5131_v38, %v5997_v12  ;;  %vm816_vm15 = vweird.f32 %v5131_v38  ;;  %v819_v4 = vand.u32 2147483647, %v5997_v12 }
 0x211   : > { %v6018_v42 = vsel %vm790_vm13, %v792_v31, %v788_v37  ;;  %v803_v44 = vsel %vm6011_vm12, %v5129_v6, %v799_v33  ;;  %v826_v50 = vmul.f32 %v5133_v45, %v6000_v19  ;;  %vm831_vm0 = vweird.f32 %v5133_v45  ;;  %vm817_vm2 = vmor %vm815_vm1, %vm816_vm15 }
 0x212   : > { %v840_v47 = vmul.f32 1.0614054, %v6018_v42  ;;  %v808_v48 = vsel %vm805_vm14, %v807_v35, %v803_v44  ;;  %v812_v53 = vsub.f32 1.0, %v811_v46  ;;  %vm832_vm4 = vmor %vm830_vm3, %vm831_vm0  ;;  %vm820_vm5 = vcmp.eq.f32.partialorder %v819_v4, 8.507059e+37 }
 0x213   : > { %v841_v51 = vmul.f32 1.0614054, %v808_v48  ;;  %v827_v58 = vsub.f32 1.0, %v826_v50  ;;  %v883_v35 = vmul.f32 %v879_v25, %v5992_v3  ;;  %v888_v46 = vmul.f32 1.442695, %v882_v32 }
 0x214   : > { %v844_v54 = vadd.f32 -1.4531521, %v840_v47  ;;  %v813_v2 = vmul.f32 %v5131_v38, %v812_v53  ;;  %vm903_vm10 = vcmp.ge.f32.partialorder %v5986_v61, 0.0  ;;  %v760_v25 = vmul.f32 0.5, %v5960_v39  ;;  %v954_v61 = vld [vmem:[#allocation5 + $0x3] ss:$0 sm:$0xff] }
 0x215   : > { %v845_v63 = vadd.f32 -1.4531521, %v841_v51  ;;  %v828_v6 = vmul.f32 %v5133_v45, %v827_v58  ;;  %v890_v51 = vmul.f32 1.442695, %v883_v35  ;;  %5138 = vpow2.f32 %v888_v46 }
 0x216   : > { %v848_v5 = vmul.f32 %v844_v54, %v6018_v42  ;;  %v814_v13 = vadd.f32 %v5131_v38, %v813_v2 }
 0x217   : > { %v849_v9 = vmul.f32 %v845_v63, %v808_v48  ;;  %v829_v17 = vadd.f32 %v5133_v45, %v828_v6  ;;  %5140 = vpow2.f32 %v890_v51 }
 0x218   : > { %v852_v14 = vadd.f32 1.4214138, %v848_v5  ;;  %v818_v21 = vsel %vm817_vm2, %v5131_v38, %v814_v13 }
 0x219   : > { %v853_v18 = vadd.f32 1.4214138, %v849_v9  ;;  %v823_v23 = vsel %vm820_vm5, %v822_v16, %v818_v21  ;;  %v833_v24 = vsel %vm832_vm4, %v5133_v45, %v829_v17  ;;  %v5135_v45 = vpop.eup %5134 }
 0x21a   : > { %v856_v22 = vmul.f32 %v852_v14, %v6018_v42  ;;  %v842_v26 = vmul.f32 1.0614054, %v823_v23  ;;  %v838_v28 = vsel %vm835_vm6, %v837_v20, %v833_v24  ;;  %v5137_v50 = vpop.eup %5136 }
 0x21b   : > { %v857_v12 = vmul.f32 %v853_v18, %v808_v48  ;;  %v843_v29 = vmul.f32 1.0614054, %v838_v28  ;;  %v5139_v7 = vpop.eup %5138 }
 0x21c   : > { %v860_v27 = vadd.f32 -0.28449672, %v856_v22  ;;  %v846_v30 = vadd.f32 -1.4531521, %v842_v26 }
 0x21d   : > { %v861_v19 = vadd.f32 -0.28449672, %v857_v12  ;;  %v847_v33 = vadd.f32 -1.4531521, %v843_v29  ;;  %v5141_v10 = vpop.eup %5140 }
 0x21e   : > { %v864_v31 = vmul.f32 %v860_v27, %v6018_v42  ;;  %v850_v36 = vmul.f32 %v846_v30, %v823_v23 }
 0x21f   : > { %v865_v34 = vmul.f32 %v861_v19, %v808_v48  ;;  %v851_v38 = vmul.f32 %v847_v33, %v838_v28 }
 0x220   : > { %v868_v37 = vadd.f32 0.2548296, %v864_v31  ;;  %v854_v41 = vadd.f32 1.4214138, %v850_v36 }
 0x221   : > { %v869_v11 = vadd.f32 0.2548296, %v865_v34  ;;  %v855_v47 = vadd.f32 1.4214138, %v851_v38 }
 0x222   : > { %v872_v44 = vmul.f32 %v868_v37, %v6018_v42  ;;  %v858_v52 = vmul.f32 %v854_v41, %v823_v23 }
 0x223   : > { %v873_v49 = vmul.f32 %v869_v11, %v808_v48  ;;  %v859_v62 = vmul.f32 %v855_v47, %v838_v28 }
 0x224   : > { %v892_v53 = vmul.f32 %v5135_v45, %v872_v44  ;;  %v862_v55 = vadd.f32 -0.28449672, %v858_v52 }
 0x225   : > { %v893_v54 = vmul.f32 %v5137_v50, %v873_v49  ;;  %v863_v3 = vadd.f32 -0.28449672, %v859_v62 }
 0x226   : > { %v866_v58 = vmul.f32 %v862_v55, %v823_v23  ;;  %v896_v59 = vsub.f32 1.0, %v892_v53 }
 0x227   : > { %v867_v63 = vmul.f32 %v863_v3, %v838_v28  ;;  %v897_v2 = vsub.f32 1.0, %v893_v54 }
 0x228   : > { %v870_v4 = vadd.f32 0.2548296, %v866_v58  ;;  %v904_v6 = vsub.f32 0.0, %v896_v59 }
 0x229   : > { %v871_v42 = vadd.f32 0.2548296, %v867_v63  ;;  %v905_v9 = vsub.f32 0.0, %v897_v2 }
 0x22a   : > { %v874_v5 = vmul.f32 %v870_v4, %v823_v23  ;;  %v908_v17 = vsel %vm900_vm7, %v896_v59, %v904_v6  ;;  %vm1563_vm7 = vcmask 130048  }
 0x22b   : > { %v875_v48 = vmul.f32 %v871_v42, %v838_v28  ;;  %v909_v20 = vsel %vm901_vm8, %v897_v2, %v905_v9  ;;  %v912_v22 = vadd.f32 1.0, %v908_v17  ;;  %v763_v28 = vmul.f32 0.5, %v5979_v57 }
 0x22c   : > { %v894_v13 = vmul.f32 %v5139_v7, %v874_v5  ;;  %v913_v12 = vadd.f32 1.0, %v909_v20  ;;  %v1079_v7 = vld [vmem:[#allocation5 + $0x4] ss:$0 sm:$0xff] }
 0x22d   : > { %v895_v14 = vmul.f32 %v5141_v10, %v875_v48  ;;  %v916_v19 = vmul.f32 %v912_v22, %v760_v25  ;;  %v1080_v10 = vld [vmem:[#allocation5 + $0x5] ss:$0 sm:$0xff]  ;;  %v4860_v25 = vld [vmem:[#allocation10 + $0x164] sm:$0xf0] }
 0x22e   : > { %v898_v16 = vsub.f32 1.0, %v894_v13  ;;  %v917_v60 = vmul.f32 %v913_v12, %v761_v43  ;;  %v4302_v12 = vld [vmem:[#allocation10 + $0x150] sm:$0xf]  ;;  %v4278_v43 = vld [vmem:[#allocation10 + $0x120] sm:$0xf] }
 0x22f   : > { %v899_v18 = vsub.f32 1.0, %v895_v14 }
 0x230   : > { %v906_v21 = vsub.f32 0.0, %v898_v16 }
 0x231   : > { %v907_v23 = vsub.f32 0.0, %v899_v18 }
 0x232   : > { %v910_v24 = vsel %vm902_vm9, %v898_v16, %v906_v21 }
 0x233   : > { %v914_v26 = vadd.f32 1.0, %v910_v24  ;;  %v911_v27 = vsel %vm903_vm10, %v899_v18, %v907_v23 }
 0x234   : > { %v915_v29 = vadd.f32 1.0, %v911_v27  ;;  %v4304_v27 = vld [vmem:[#allocation10 + $0x168] sm:$0xf0] }
 0x235   : > { %v918_v30 = vmul.f32 %v914_v26, %v762_v15  ;;  %v4857_v15 = vld [vmem:[#allocation10 + $0x154] sm:$0xf]  ;;  %v4303_v26 = vor.u32 %v4860_v25, %v4302_v12  ;;  %v4158_v25 = vld [vmem:[#allocation10 + $0x30] sm:$0xf] }
 0x236   : > { %v919_v31 = vmul.f32 %v915_v29, %v763_v28  ;;  %v4854_v28 = vld [vmem:[#allocation10 + $0x134] sm:$0xf0]  ;;  %v4851_v29 = vld [vmem:[#allocation10 + $0x124] sm:$0xf] }
 0x237   : > { %v920_v32 = vpack.c.bf16 %v918_v30, %v916_v19  ;;  %v4280_v19 = vld [vmem:[#allocation10 + $0x138] sm:$0xf0]  ;;  %1462 = vmatpush.bf16.msrb.mxu0 %v4303_v26  ;;  %v4279_v30 = vor.u32 %v4854_v28, %v4278_v43  ;;  %v4821_v26 = vld [vmem:[#allocation10 + $0x34] sm:$0xf]  ;;  %v4160_v43 = vld [vmem:[#allocation10 + $0x48] sm:$0xf0] }
 0x238   : > { %v921_v33 = vpack.c.bf16 %v919_v31, %v917_v60  ;;  %v4283_v60 = vor.u32 %v4851_v29, %v4280_v19  ;;  %v4238_v28 = vld [vmem:[#allocation10 + $0xc8] sm:$0xf]  ;;  %v4163_v29 = vor.u32 %v4821_v26, %v4160_v43  ;;  %v4144_v26 = vld [vmem:[#allocation10 + $0x20] sm:$0xf0] }
 0x239   : > { %1059 = vmatmul.bf16.vlgmr.msra.gmra.mxu2 %v920_v32  ;;  %v4844_v43 = vld [vmem:[#allocation10 + $0xe4] sm:$0xf0] }
 0x23a   : > { %1073 = vmatmul.bf16.vlgmr.msra.gmra.mxu3 %v921_v33 }
 0x23b   : > { %1463 = vmatpush.bf16.msrb.mxu0 %v4279_v30  ;;  %v4840_v30 = vld [vmem:[#allocation10 + $0xcc] sm:$0xf] }
 0x2bc   : > { %v1060_v34 = vpop.f32.mrf.mxu2 }
 0x2bd   : > { %v1061_v39 = vadd.f32 %v1060_v34, %v954_v61  ;;  %v1074_v35 = vpop.f32.mrf.mxu3 }
 0x2bf   : > { %v1075_v56 = vadd.f32 %v1074_v35, %v1061_v39 }
 0x2c1   : > { %1081 = vadd.xlane.f32.xlu2 %v1075_v56 }
 0x2c4   : > { %v1062_v36 = vpop.f32.mrf.mxu2 }
 0x2c5   : > { %v1063_v37 = vadd.f32 %v1062_v36, %v954_v61  ;;  %v1076_v40 = vpop.f32.mrf.mxu3  ;;  %v4848_v36 = vld [vmem:[#allocation10 + $0x104] sm:$0xf0] }
 0x2c7   : > { %v1077_v38 = vadd.f32 %v1076_v40, %v1063_v37  ;;  %v4845_v37 = vld [vmem:[#allocation10 + $0xf4] sm:$0xf] }
 0x2c9   : > { %1083 = vadd.xlane.f32.xlu2 %v1077_v38 }
 0x334   : > { %v1082_v57 = vpop.xlane.xlu2 %1081 }
 0x335   : > { %v1085_v11 = vmul.f32 %v1082_v57, %v5942_v8 }
 0x337   : > { %v1087_v41 = vsub.f32 %v1075_v56, %v1085_v11  ;;  %v4254_v56 = vld [vmem:[#allocation10 + $0xf0] sm:$0xf]  ;;  %v4230_v11 = vld [vmem:[#allocation10 + $0xc0] sm:$0xf] }
 0x338   : > { %v4255_v40 = vor.u32 %v4848_v36, %v4254_v56  ;;  %v4214_v56 = vld [vmem:[#allocation10 + $0x98] sm:$0xf]  ;;  %v4837_v36 = vld [vmem:[#allocation10 + $0xac] sm:$0xf0] }
 0x339   : > { %v1089_v44 = vmul.f32 %v1087_v41, %v1087_v41 }
 0x33a   : > { %1464 = vmatpush.bf16.msrb.mxu0 %v4255_v40  ;;  %v4215_v40 = vor.u32 %v4837_v36, %v4214_v56 }
 0x33b   : > { %1091 = vadd.xlane.f32.xlu0 %v1089_v44  ;;  %v4839_v44 = vld [vmem:[#allocation10 + $0xc4] sm:$0xf] }
 0x33c   : > { %v1084_v45 = vpop.xlane.xlu2 %1083 }
 0x33d   : > { %v1086_v46 = vmul.f32 %v1084_v45, %v5942_v8 }
 0x33f   : > { %v1088_v47 = vsub.f32 %v1077_v38, %v1086_v46  ;;  %v4256_v38 = vld [vmem:[#allocation10 + $0x108] sm:$0xf0]  ;;  %v4232_v46 = vld [vmem:[#allocation10 + $0xd8] sm:$0xf0] }
 0x340   : > { %v4259_v57 = vor.u32 %v4845_v37, %v4256_v38  ;;  %v4834_v38 = vld [vmem:[#allocation10 + $0x9c] sm:$0xf] }
 0x341   : > { %v1090_v49 = vmul.f32 %v1088_v47, %v1088_v47 }
 0x343   : > { %1093 = vadd.xlane.f32.xlu1 %v1090_v49  ;;  %v4861_v49 = vld [vmem:[#allocation10 + $0x16c] sm:$0xf0] }
 0x3ae   : > { %v1092_v50 = vpop.xlane.xlu0 %1091 }
 0x3af   : > { %v1095_v51 = vmul.f32 %v1092_v50, %v5942_v8  ;;  %v4235_v50 = vor.u32 %v4839_v44, %v4232_v46  ;;  %v4862_v44 = vld [vmem:[#allocation10 + $0x174] sm:$0xf0]  ;;  %v4320_v46 = vld [vmem:[#allocation10 + $0x178] sm:$0xf0] }
 0x3b1   : > { %v1097_v52 = vadd.f32 1e-05, %v1095_v51 }
 0x3b3   : > { %5142 = vrsqrt.f32 %v1097_v52  ;;  %vm1105_vm12 = vweird.f32 %v1097_v52 }
 0x3b6   : > { %v1094_v53 = vpop.xlane.xlu1 %1093 }
 0x3b7   : > { %v1096_v62 = vmul.f32 %v1094_v53, %v5942_v8  ;;  %v4312_v53 = vld [vmem:[#allocation10 + $0x170] sm:$0xf0] }
 0x3b9   : > { %v5143_v54 = vpop.eup %5142  ;;  %v1098_v55 = vadd.f32 1e-05, %v1096_v62 }
 0x3ba   : > { %v1100_v3 = vmul.f32 %v5143_v54, %v1097_v52  ;;  %vm1106_vm11 = vweird.f32 %v5143_v54  ;;  %v4858_v52 = vld [vmem:[#allocation10 + $0x15c] sm:$0xf] }
 0x3bb   : > { %5144 = vrsqrt.f32 %v1098_v55  ;;  %vm1107_vm13 = vmor %vm1105_vm12, %vm1106_vm11  ;;  %vm1115_vm15 = vweird.f32 %v1098_v55  ;;  %v4315_v62 = vor.u32 %v4858_v52, %v4312_v53  ;;  %v4828_v52 = vld [vmem:[#allocation10 + $0x6c] sm:$0xf] }
 0x3bc   : > { %v1101_v58 = vmul.f32 %v5143_v54, %v1100_v3  ;;  %v4833_v3 = vld [vmem:[#allocation10 + $0x94] sm:$0xf] }
 0x3bd   : > { %1504 = vmatpush.bf16.msrb.mxu3 %v4315_v62  ;;  %v4192_v62 = vld [vmem:[#allocation10 + $0x80] sm:$0xf0] }
 0x3be   : > { %v1102_v59 = vmul.f32 0.5, %v1101_v58 }
 0x3c0   : > { %v1103_v63 = vsub.f32 1.5, %v1102_v59  ;;  %v4208_v59 = vld [vmem:[#allocation10 + $0xa8] sm:$0xf0] }
 0x3c1   : > { %v5145_v2 = vpop.eup %5144 }
 0x3c2   : > { %v1104_v4 = vmul.f32 %v5143_v54, %v1103_v63  ;;  %v1110_v42 = vmul.f32 %v5145_v2, %v1098_v55  ;;  %vm1116_vm14 = vweird.f32 %v5145_v2  ;;  %v4836_v55 = vld [vmem:[#allocation10 + $0xa4] sm:$0xf0] }
 0x3c3   : > { %vm1117_vm0 = vmor %vm1115_vm15, %vm1116_vm14  ;;  %v4286_v63 = vld [vmem:[#allocation10 + $0x128] sm:$0xf] }
 0x3c4   : > { %v1108_v5 = vsel %vm1107_vm13, %v5143_v54, %v1104_v4  ;;  %v1111_v6 = vmul.f32 %v5145_v2, %v1110_v42  ;;  %v4206_v54 = vld [vmem:[#allocation10 + $0x90] sm:$0xf]  ;;  %v4211_v4 = vor.u32 %v4833_v3, %v4208_v59 }
 0x3c5   : > { %v1119_v48 = vmul.f32 %v1108_v5, %v1087_v41  ;;  %v4842_v41 = vld [vmem:[#allocation10 + $0xd4] sm:$0xf0]  ;;  %v4207_v58 = vor.u32 %v4836_v55, %v4206_v54  ;;  %v4852_v5 = vld [vmem:[#allocation10 + $0x12c] sm:$0xf]  ;;  %v4294_v54 = vld [vmem:[#allocation10 + $0x130] sm:$0xf] }
 0x3c6   : > { %v1112_v9 = vmul.f32 0.5, %v1111_v6  ;;  %v4231_v45 = vor.u32 %v4842_v41, %v4230_v11  ;;  %v4288_v6 = vld [vmem:[#allocation10 + $0x140] sm:$0xf0]  ;;  %v4318_v11 = vld [vmem:[#allocation10 + $0x160] sm:$0xf] }
 0x3c7   : > { %v1121_v13 = vmul.f32 %v1119_v48, %v1079_v7  ;;  %v4182_v48 = vld [vmem:[#allocation10 + $0x60] sm:$0xf]  ;;  %v4856_v55 = vld [vmem:[#allocation10 + $0x144] sm:$0xf0] }
 0x3c8   : > { %v1113_v14 = vsub.f32 1.5, %v1112_v9  ;;  %1465 = vmatpush.bf16.msrb.mxu0 %v4231_v45  ;;  %v4830_v9 = vld [vmem:[#allocation10 + $0x74] sm:$0xf0]  ;;  %v4859_v45 = vld [vmem:[#allocation10 + $0x164] sm:$0xf]  ;;  %v4295_v59 = vor.u32 %v4856_v55, %v4294_v54 }
 0x3c9   : > { %v1123_v16 = vadd.f32 %v1121_v13, %v1080_v10  ;;  %v4183_v13 = vor.u32 %v4830_v9, %v4182_v48 }
 0x3ca   : > { %v1114_v17 = vmul.f32 %v5145_v2, %v1113_v14  ;;  %v4184_v14 = vld [vmem:[#allocation10 + $0x78] sm:$0xf0] }
 0x3cb   : > { %v6052_v18 = vadd.f32 %v1123_v16, %v5936_v0  ;;  %v4307_v0 = vor.u32 %v4857_v15, %v4304_v27  ;;  %v4262_v16 = vld [vmem:[#allocation10 + $0xf8] sm:$0xf]  ;;  %v4824_v15 = vld [vmem:[#allocation10 + $0x44] sm:$0xf0] }
 0x3cc   : > { %v1118_v20 = vsel %vm1117_vm0, %v5145_v2, %v1114_v17  ;;  %v4855_v2 = vld [vmem:[#allocation10 + $0x13c] sm:$0xf0]  ;;  %1466 = vmatpush.bf16.msrb.mxu0 %v4207_v58  ;;  %v4849_v17 = vld [vmem:[#allocation10 + $0x10c] sm:$0xf0]  ;;  %v4159_v27 = vor.u32 %v4824_v15, %v4158_v25  ;;  %v4195_v58 = vor.u32 %v4828_v52, %v4192_v62  ;;  %v4816_v25 = vld [vmem:[#allocation10 + $0xc] sm:$0xf] }
 0x3cd   : > { %v1120_v21 = vmul.f32 %v1118_v20, %v1088_v47  ;;  %1129 = vadd.xlane.f32.xlu2 %v6052_v18  ;;  %1476 = vmatpush.bf16.msrb.mxu1 %v4307_v0  ;;  %v4310_v47 = vld [vmem:[#allocation10 + $0x158] sm:$0xf]  ;;  %v4287_v42 = vor.u32 %v4855_v2, %v4286_v63  ;;  %v4843_v0 = vld [vmem:[#allocation10 + $0xdc] sm:$0xf0]  ;;  %v4853_v63 = vld [vmem:[#allocation10 + $0x134] sm:$0xf] }
 0x3ce   : > { %v4311_v51 = vor.u32 %v4861_v49, %v4310_v47  ;;  %v4239_v19 = vor.u32 %v4843_v0, %v4238_v28  ;;  %v4319_v47 = vor.u32 %v4862_v44, %v4318_v11  ;;  %v4323_v49 = vor.u32 %v4859_v45, %v4320_v46  ;;  %v4296_v2 = vld [vmem:[#allocation10 + $0x148] sm:$0xf0]  ;;  %v4829_v11 = vld [vmem:[#allocation10 + $0x74] sm:$0xf]  ;;  %v4176_v52 = vld [vmem:[#allocation10 + $0x58] sm:$0xf0] }
 0x3cf   : > { %v1122_v22 = vmul.f32 %v1120_v21, %v1079_v7  ;;  %v4291_v7 = vor.u32 %v4852_v5, %v4288_v6  ;;  %v4263_v21 = vor.u32 %v4849_v17, %v4262_v16  ;;  %v4166_v5 = vld [vmem:[#allocation10 + $0x38] sm:$0xf]  ;;  %v4825_v6 = vld [vmem:[#allocation10 + $0x4c] sm:$0xf0]  ;;  %v4847_v17 = vld [vmem:[#allocation10 + $0x104] sm:$0xf]  ;;  %v4147_v28 = vor.u32 %v4816_v25, %v4144_v26 }
 0x3d0   : > { %1490 = vmatpush.bf16.msrb.mxu2 %v4311_v51  ;;  %1467 = vmatpush.bf16.msrb.mxu0 %v4183_v13  ;;  %v4831_v51 = vld [vmem:[#allocation10 + $0x7c] sm:$0xf0]  ;;  %v4167_v9 = vor.u32 %v4825_v6, %v4166_v5  ;;  %v4850_v16 = vld [vmem:[#allocation10 + $0x114] sm:$0xf0] }
 0x3d1   : > { %v1124_v23 = vadd.f32 %v1122_v22, %v1080_v10  ;;  %1477 = vmatpush.bf16.msrb.mxu1 %v4283_v60  ;;  %v4827_v10 = vld [vmem:[#allocation10 + $0x64] sm:$0xf]  ;;  %1505 = vmatpush.bf16.msrb.mxu3 %v4291_v7  ;;  %v4846_v22 = vld [vmem:[#allocation10 + $0xfc] sm:$0xf]  ;;  %v4270_v13 = vld [vmem:[#allocation10 + $0x100] sm:$0xf] }
 0x3d2   : > { %v4187_v20 = vor.u32 %v4827_v10, %v4184_v14  ;;  %v4240_v60 = vld [vmem:[#allocation10 + $0xe0] sm:$0xf0]  ;;  %v4822_v7 = vld [vmem:[#allocation10 + $0x3c] sm:$0xf]  ;;  %v4168_v10 = vld [vmem:[#allocation10 + $0x50] sm:$0xf0] }
 0x3d3   : > { %v6056_v24 = vadd.f32 %v1124_v23, %v5939_v1  ;;  %v4264_v23 = vld [vmem:[#allocation10 + $0x110] sm:$0xf0]  ;;  %v4171_v14 = vor.u32 %v4822_v7, %v4168_v10 }
 0x3d4   : > { %1491 = vmatpush.bf16.msrb.mxu2 %v4287_v42  ;;  %v4267_v12 = vor.u32 %v4846_v22, %v4264_v23  ;;  %1468 = vmatpush.bf16.msrb.mxu0 %v4159_v27  ;;  %v4299_v42 = vor.u32 %v4853_v63, %v4296_v2  ;;  %v4142_v23 = vld [vmem:[#allocation10 + $0x8] sm:$0xf]  ;;  %v4246_v27 = vld [vmem:[#allocation10 + $0xd0] sm:$0xf]  ;;  %v4817_v2 = vld [vmem:[#allocation10 + $0x14] sm:$0xf] }
 0x3d5   : > { %1131 = vadd.xlane.f32.xlu0 %v6056_v24  ;;  %1478 = vmatpush.bf16.msrb.mxu1 %v4259_v57  ;;  %v4216_v57 = vld [vmem:[#allocation10 + $0xb0] sm:$0xf0]  ;;  %v4247_v0 = vor.u32 %v4844_v43, %v4246_v27  ;;  %v4820_v63 = vld [vmem:[#allocation10 + $0x24] sm:$0xf0] }
 0x3d6   : > { %1506 = vmatpush.bf16.msrb.mxu3 %v4267_v12  ;;  %v4219_v41 = vor.u32 %v4834_v38, %v4216_v57  ;;  %v4819_v12 = vld [vmem:[#allocation10 + $0x1c] sm:$0xf0]  ;;  %v4832_v57 = vld [vmem:[#allocation10 + $0x84] sm:$0xf0] }
 0x3d7   : > { %v4143_v15 = vor.u32 %v4819_v12, %v4142_v23 }
 0x3d8   : > { %1492 = vmatpush.bf16.msrb.mxu2 %v4263_v21  ;;  %v4271_v21 = vor.u32 %v4850_v16, %v4270_v13 }
 0x3d9   : > { %1479 = vmatpush.bf16.msrb.mxu1 %v4235_v50  ;;  %v4190_v50 = vld [vmem:[#allocation10 + $0x68] sm:$0xf] }
 0x3da   : > { %v4191_v53 = vor.u32 %v4831_v51, %v4190_v50  ;;  %v4823_v51 = vld [vmem:[#allocation10 + $0x44] sm:$0xf] }
 0x3db   : > { %v4179_v55 = vor.u32 %v4823_v51, %v4176_v52 }
 0x3dc   : > { %1493 = vmatpush.bf16.msrb.mxu2 %v4239_v19  ;;  %v4248_v19 = vld [vmem:[#allocation10 + $0xe8] sm:$0xf0] }
 0x3dd   : > { %1480 = vmatpush.bf16.msrb.mxu1 %v4211_v4 }
 0x3e0   : > { %1494 = vmatpush.bf16.msrb.mxu2 %v4215_v40  ;;  %v4198_v40 = vld [vmem:[#allocation10 + $0x70] sm:$0xf] }
 0x3e1   : > { %1481 = vmatpush.bf16.msrb.mxu1 %v4187_v20  ;;  %v4272_v20 = vld [vmem:[#allocation10 + $0x118] sm:$0xf0]  ;;  %v4199_v45 = vor.u32 %v4832_v57, %v4198_v40 }
 0x3e2   : > { %v4275_v22 = vor.u32 %v4847_v17, %v4272_v20 }
 0x3e4   : > { %1495 = vmatpush.bf16.msrb.mxu2 %v4191_v53 }
 0x3e5   : > { %1482 = vmatpush.bf16.msrb.mxu1 %v4163_v29  ;;  %v4841_v29 = vld [vmem:[#allocation10 + $0xd4] sm:$0xf] }
 0x3e8   : > { %1496 = vmatpush.bf16.msrb.mxu2 %v4167_v9 }
 0x3ec   : > { %1497 = vmatpush.bf16.msrb.mxu2 %v4143_v15 }
 0x440   : > { %v1130_v1 = vpop.xlane.xlu2 %1129 }
 0x441   : > { %v1133_v31 = vmul.f32 %v1130_v1, %v5942_v8  ;;  %v4243_v1 = vor.u32 %v4840_v30, %v4240_v60  ;;  %v4251_v60 = vor.u32 %v4841_v29, %v4248_v19 }
 0x443   : > { %v6061_v32 = vsub.f32 %v6052_v18, %v1133_v31  ;;  %v4134_v31 = vld [vmem:[#allocation10] sm:$0xf]  ;;  %1507 = vmatpush.bf16.msrb.mxu3 %v4243_v1 }
 0x444   : > { %v4222_v1 = vld [vmem:[#allocation10 + $0xa0] sm:$0xf] }
 0x445   : > { %v1137_v33 = vmul.f32 %v6061_v32, %v6061_v32 }
 0x447   : > { %1139 = vadd.xlane.f32.xlu1 %v1137_v33  ;;  %v4818_v33 = vld [vmem:[#allocation10 + $0x14] sm:$0xf0]  ;;  %1508 = vmatpush.bf16.msrb.mxu3 %v4219_v41  ;;  %v4200_v41 = vld [vmem:[#allocation10 + $0x88] sm:$0xf0] }
 0x448   : > { %v1132_v61 = vpop.xlane.xlu0 %1131  ;;  %v4203_v46 = vor.u32 %v4829_v11, %v4200_v41 }
 0x449   : > { %v1134_v34 = vmul.f32 %v1132_v61, %v5942_v8  ;;  %v4815_v61 = vld [vmem:[#allocation10 + $0x4] sm:$0xf] }
 0x44b   : > { %v6067_v39 = vsub.f32 %v6056_v24, %v1134_v34  ;;  %v4135_v34 = vor.u32 %v4818_v33, %v4134_v31  ;;  %1509 = vmatpush.bf16.msrb.mxu3 %v4195_v58  ;;  %v4838_v31 = vld [vmem:[#allocation10 + $0xb4] sm:$0xf0]  ;;  %v4835_v33 = vld [vmem:[#allocation10 + $0xa4] sm:$0xf] }
 0x44c   : > { %v4223_v36 = vor.u32 %v4838_v31, %v4222_v1 }
 0x44d   : > { %v1138_v35 = vmul.f32 %v6067_v39, %v6067_v39  ;;  %1469 = vmatpush.bf16.msrb.mxu0 %v4135_v34  ;;  %v4224_v34 = vld [vmem:[#allocation10 + $0xb8] sm:$0xf0] }
 0x44f   : > { %1141 = vadd.xlane.f32.xlu2 %v1138_v35  ;;  %v4136_v35 = vld [vmem:[#allocation10 + $0x18] sm:$0xf0]  ;;  %1510 = vmatpush.bf16.msrb.mxu3 %v4171_v14  ;;  %v1127_v14 = vld [vmem:[#allocation5 + $0x6] ss:$0 sm:$0xff] }
 0x450   : > { %v4139_v37 = vor.u32 %v4815_v61, %v4136_v35 }
 0x451   : > { %1518 = vmatpush.bf16.msra.mxu0 %v4319_v47  ;;  %v4174_v47 = vld [vmem:[#allocation10 + $0x40] sm:$0xf] }
 0x452   : > { %1483 = vmatpush.bf16.msrb.mxu1 %v4139_v37  ;;  %v4227_v37 = vor.u32 %v4835_v33, %v4224_v34 }
 0x453   : > { %1511 = vmatpush.bf16.msrb.mxu3 %v4147_v28 }
 0x455   : > { %1519 = vmatpush.bf16.msra.mxu0 %v4295_v59 }
 0x456   : > { %1532 = vmatpush.bf16.msra.mxu1 %v4323_v49  ;;  %v4826_v49 = vld [vmem:[#allocation10 + $0x54] sm:$0xf0] }
 0x457   : > { %v4175_v54 = vor.u32 %v4826_v49, %v4174_v47 }
 0x459   : > { %1520 = vmatpush.bf16.msra.mxu0 %v4271_v21  ;;  %v1128_v21 = vld [vmem:[#allocation5 + $0x7] ss:$0 sm:$0xff] }
 0x45a   : > { %1533 = vmatpush.bf16.msra.mxu1 %v4299_v42 }
 0x45d   : > { %1521 = vmatpush.bf16.msra.mxu0 %v4247_v0 }
 0x45e   : > { %1534 = vmatpush.bf16.msra.mxu1 %v4275_v22 }
 0x461   : > { %1522 = vmatpush.bf16.msra.mxu0 %v4223_v36 }
 0x462   : > { %1535 = vmatpush.bf16.msra.mxu1 %v4251_v60 }
 0x465   : > { %1523 = vmatpush.bf16.msra.mxu0 %v4199_v45 }
 0x466   : > { %1536 = vmatpush.bf16.msra.mxu1 %v4227_v37 }
 0x469   : > { %1524 = vmatpush.bf16.msra.mxu0 %v4175_v54 }
 0x46a   : > { %1537 = vmatpush.bf16.msra.mxu1 %v4203_v46 }
 0x46e   : > { %1538 = vmatpush.bf16.msra.mxu1 %v4179_v55 }
 0x4ba   : > { %v1140_v3 = vpop.xlane.xlu1 %1139 }
 0x4bb   : > { %v1143_v4 = vmul.f32 %v1140_v3, %v5942_v8  ;;  %v4150_v3 = vld [vmem:[#allocation10 + $0x10] sm:$0xf] }
 0x4bc   : > { %v4151_v5 = vor.u32 %v4820_v63, %v4150_v3 }
 0x4bd   : > { %v6072_v48 = vadd.f32 1e-05, %v1143_v4  ;;  %v4152_v4 = vld [vmem:[#allocation10 + $0x28] sm:$0xf0] }
 0x4be   : > { %v4155_v6 = vor.u32 %v4817_v2, %v4152_v4  ;;  %1525 = vmatpush.bf16.msra.mxu0 %v4151_v5 }
 0x4bf   : > { %5146 = vrsqrt.f32 %v6072_v48  ;;  %vm1153_vm2 = vweird.f32 %v6072_v48 }
 0x4c0   : > { %1539 = vmatpush.bf16.msra.mxu1 %v4155_v6 }
 0x4c2   : > { %v1142_v30 = vpop.xlane.xlu2 %1141 }
 0x4c3   : > { %v1144_v61 = vmul.f32 %v1142_v30, %v5942_v8 }
 0x4c5   : > { %v5147_v35 = vpop.eup %5146  ;;  %v1146_v56 = vadd.f32 1e-05, %v1144_v61 }
 0x4c6   : > { %v1148_v38 = vmul.f32 %v5147_v35, %v6072_v48  ;;  %vm1154_vm1 = vweird.f32 %v5147_v35 }
 0x4c7   : > { %5148 = vrsqrt.f32 %v1146_v56  ;;  %vm1155_vm3 = vmor %vm1153_vm2, %vm1154_vm1  ;;  %vm1163_vm5 = vweird.f32 %v1146_v56 }
 0x4c8   : > { %v1149_v44 = vmul.f32 %v5147_v35, %v1148_v38 }
 0x4ca   : > { %v1150_v50 = vmul.f32 0.5, %v1149_v44 }
 0x4cc   : > { %v1151_v53 = vsub.f32 1.5, %v1150_v50 }
 0x4cd   : > { %v5149_v62 = vpop.eup %5148 }
 0x4ce   : > { %v1152_v58 = vmul.f32 %v5147_v35, %v1151_v53  ;;  %v1158_v59 = vmul.f32 %v5149_v62, %v1146_v56  ;;  %vm1164_vm4 = vweird.f32 %v5149_v62 }
 0x4cf   : > { %vm1165_vm6 = vmor %vm1163_vm5, %vm1164_vm4 }
 0x4d0   : > { %v1159_v42 = vmul.f32 %v5149_v62, %v1158_v59  ;;  %v1156_v7 = vsel %vm1155_vm3, %v5147_v35, %v1152_v58 }
 0x4d1   : > { %v1167_v13 = vmul.f32 %v1156_v7, %v6061_v32  ;;  %v4870_v7 = vld [vmem:[#allocation11 + $0x38] sm:$0xff] }
 0x4d2   : > { %v1160_v9 = vmul.f32 0.5, %v1159_v42 }
 0x4d3   : > { %v1169_v48 = vmul.f32 %v1167_v13, %v1127_v14 }
 0x4d4   : > { %v1161_v10 = vsub.f32 1.5, %v1160_v9  ;;  %v4878_v9 = vld [vmem:[#allocation11 + $0x78] sm:$0xff] }
 0x4d5   : > { %v1171_v23 = vadd.f32 %v1169_v48, %v1128_v21 }
 0x4d6   : > { %v1162_v16 = vmul.f32 %v5149_v62, %v1161_v10  ;;  %v4869_v10 = vld [vmem:[#allocation11 + $0x30] sm:$0xff] }
 0x4d8   : > { %v1166_v17 = vsel %vm1165_vm6, %v5149_v62, %v1162_v16 }
 0x4d9   : > { %v1168_v20 = vmul.f32 %v1166_v17, %v6067_v39  ;;  %v4867_v17 = vld [vmem:[#allocation11 + $0x20] sm:$0xff] }
 0x4db   : > { %v1170_v22 = vmul.f32 %v1168_v20, %v1127_v14  ;;  %v4868_v14 = vld [vmem:[#allocation11 + $0x28] sm:$0xff] }
 0x4dd   : > { %v1172_v12 = vadd.f32 %v1170_v22, %v1128_v21 }
 0x4df   : > { %v1173_v25 = vpack.c.bf16 %v1172_v12, %v1171_v23  ;;  %v4866_v23 = vld [vmem:[#allocation11 + $0x18] sm:$0xff] }
 0x4e1   : > { %1470 = vmatmul.bf16.vlgmr.msrb.gmra.mxu0 %v1173_v25  ;;  %1484 = vmatmul.bf16.vlgmr.msrb.gmra.mxu1 %v1173_v25 }
 0x4e2   : > { %1498 = vmatmul.bf16.vlgmr.msrb.gmra.mxu2 %v1173_v25  ;;  %1512 = vmatmul.bf16.vlgmr.msrb.gmra.mxu3 %v1173_v25 }
 0x4e3   : > { %1805 = vmatpush.bf16.msrb.mxu1 %v4870_v7  ;;  %1743 = vmatpush.bf16.msrb.mxu0 %v4878_v9 }
 0x4e7   : > { %1806 = vmatpush.bf16.msrb.mxu1 %v4869_v10 }
 0x4eb   : > { %1807 = vmatpush.bf16.msrb.mxu1 %v4868_v14  ;;  %v1819_v14 = vld [vmem:[#allocation5 + $0x20] ss:$0 sm:$0xff] }
 0x4ef   : > { %1808 = vmatpush.bf16.msrb.mxu1 %v4867_v17 }
 0x4f1   : > { %1526 = vmatmul.bf16.vlgmr.msra.gmra.mxu0 %v1173_v25  ;;  %1540 = vmatmul.bf16.vlgmr.msra.gmra.mxu1 %v1173_v25 }
 0x4f3   : > { %1809 = vmatpush.bf16.msrb.mxu1 %v4866_v23 }
 0x55e   : > { %v1471_v32 = vpop.f32.mrf.mxu0  ;;  %v1485_v15 = vpop.f32.mrf.mxu1 }
 0x565   : > { %v1499_v26 = vpop.f32.mrf.mxu2  ;;  %v1513_v27 = vpop.f32.mrf.mxu3 }
 0x566   : > { %v1473_v43 = vpop.f32.mrf.mxu0  ;;  %v1487_v28 = vpop.f32.mrf.mxu1 }
 0x567   : > { %v1546_v1 = vpack.c.bf16 %v1473_v43, %v1471_v32  ;;  %v1621_v35 = vpack.c.bf16 %v1487_v28, %v1485_v15  ;;  %v4877_v28 = vld [vmem:[#allocation11 + $0x70] sm:$0xff] }
 0x568   : > { %1744 = vmatpush.bf16.msrb.mxu0 %v4877_v28 }
 0x56d   : > { %v1501_v0 = vpop.f32.mrf.mxu2  ;;  %v1515_v29 = vpop.f32.mrf.mxu3 }
 0x56e   : > { %v1547_v39 = vpack.c.bf16 %v1501_v0, %v1499_v26  ;;  %v1622_v19 = vpack.c.bf16 %v1515_v29, %v1513_v27  ;;  %v1527_v30 = vpop.f32.mrf.mxu0  ;;  %v1541_v60 = vpop.f32.mrf.mxu1  ;;  %v4865_v0 = vld [vmem:[#allocation11 + $0x10] sm:$0xff]  ;;  %v4876_v29 = vld [vmem:[#allocation11 + $0x68] sm:$0xff] }
 0x56f   : > { %1810 = vmatpush.bf16.msrb.mxu1 %v4865_v0  ;;  %1745 = vmatpush.bf16.msrb.mxu0 %v4876_v29 }
 0x570   : > { %1556 = vmatpush.bf16.xpose.msra.mxu2 %v1547_v39  ;;  %v4864_v39 = vld [vmem:[#allocation11 + $0x8] sm:$0xff] }
 0x573   : > { %1811 = vmatpush.bf16.msrb.mxu1 %v4864_v39 }
 0x576   : > { %v1529_v31 = vpop.f32.mrf.mxu0  ;;  %v1543_v33 = vpop.f32.mrf.mxu1 }
 0x577   : > { %v1548_v61 = vpack.c.bf16 %v1529_v31, %v1527_v30  ;;  %v1623_v34 = vpack.c.bf16 %v1543_v33, %v1541_v60  ;;  %1557 = vmatmul.bf16.vlgmr.msra.gmra.mxu2 %v1546_v1  ;;  %v4863_v30 = vld [vmem:[#allocation11] sm:$0xff]  ;;  %v4874_v60 = vld [vmem:[#allocation11 + $0x58] sm:$0xff]  ;;  %v4873_v1 = vld [vmem:[#allocation11 + $0x50] sm:$0xff] }
 0x578   : > { %1631 = vmatpush.bf16.xpose.msrb.mxu2 %v1622_v19  ;;  %v4875_v19 = vld [vmem:[#allocation11 + $0x60] sm:$0xff]  ;;  %1812 = vmatpush.bf16.msrb.mxu1 %v4863_v30  ;;  %v4872_v31 = vld [vmem:[#allocation11 + $0x48] sm:$0xff] }
 0x579   : > { %1597 = vmatpush.bf16.msra.mxu3 %v1548_v61  ;;  %1746 = vmatpush.bf16.msrb.mxu0 %v4875_v19  ;;  %v4871_v33 = vld [vmem:[#allocation11 + $0x40] sm:$0xff] }
 0x57a   : > { %v4504_v30 = vld [vmem:[#allocation13 + $0xe0] sm:$0xf] }
 0x57d   : > { %1671 = vmatpush.bf16.msrb.mxu3 %v1623_v34  ;;  %1747 = vmatpush.bf16.msrb.mxu0 %v4874_v60  ;;  %v4909_v60 = vld [vmem:[#allocation13 + $0xec] sm:$0xf0] }
 0x581   : > { %1748 = vmatpush.bf16.msrb.mxu0 %v4873_v1  ;;  %v4907_v1 = vld [vmem:[#allocation13 + $0xe4] sm:$0xf] }
 0x585   : > { %1749 = vmatpush.bf16.msrb.mxu0 %v4872_v31  ;;  %v4505_v31 = vor.u32 %v4909_v60, %v4504_v30  ;;  %v4424_v60 = vld [vmem:[#allocation13 + $0x40] sm:$0xf] }
 0x587   : > { %1632 = vmatmul.bf16.vlgmr.msrb.gmra.mxu2 %v1621_v35 }
 0x588   : > { %2117 = vmatpush.bf16.msra.mxu2 %v4505_v31  ;;  %v4887_v31 = vld [vmem:[#allocation13 + $0x44] sm:$0xf] }
 0x589   : > { %1750 = vmatpush.bf16.msrb.mxu0 %v4871_v33  ;;  %v4506_v33 = vld [vmem:[#allocation13 + $0xf0] sm:$0xf0] }
 0x5fa   : > { %v1558_v56 = vpop.f32.mrf.mxu2 }
 0x5fb   : > { %v1564_v36 = vsel %vm1563_vm7, %v1558_v56, -inf }
 0x5fc   : > { %1565 = vmax.xlane.f32.xlu0 %v1564_v36 }
 0x602   : > { %v1560_v37 = vpop.f32.mrf.mxu2 }
 0x603   : > { %v1567_v40 = vsel %vm1563_vm7, %v1560_v37, -inf }
 0x604   : > { %1568 = vmax.xlane.f32.xlu1 %v1567_v40 }
 0x60a   : > { %v1633_v38 = vpop.f32.mrf.mxu2 }
 0x60b   : > { %v1638_v57 = vsel %vm1563_vm7, %v1633_v38, -inf }
 0x60c   : > { %1639 = vmax.xlane.f32.xlu2 %v1638_v57 }
 0x612   : > { %v1635_v11 = vpop.f32.mrf.mxu2 }
 0x613   : > { %v1641_v41 = vsel %vm1563_vm7, %v1635_v11, -inf }
 0x614   : > { %1642 = vmax.xlane.f32.xlu0 %v1641_v41 }
 0x66f   : > { %v1566_v44 = vpop.xlane.xlu0 %1565 }
 0x670   : > { %v1570_v45 = vsub.f32 %v1558_v56, %v1566_v44 }
 0x672   : > { %v1572_v46 = vmul.f32 1.442695, %v1570_v45 }
 0x674   : > { %5150 = vpow2.f32 %v1572_v46 }
 0x677   : > { %v1569_v47 = vpop.xlane.xlu1 %1568 }
 0x678   : > { %v1571_v49 = vsub.f32 %v1560_v37, %v1569_v47 }
 0x67a   : > { %v5151_v50 = vpop.eup %5150  ;;  %v1574_v51 = vmul.f32 1.442695, %v1571_v49 }
 0x67b   : > { %v1576_v52 = vsel %vm1563_vm7, %v5151_v50, 0.0 }
 0x67c   : > { %5152 = vpow2.f32 %v1574_v51  ;;  %1577 = vadd.xlane.f32.xlu1 %v1576_v52 }
 0x67f   : > { %v1640_v53 = vpop.xlane.xlu2 %1639 }
 0x680   : > { %v1644_v62 = vsub.f32 %v1633_v38, %v1640_v53 }
 0x682   : > { %v5153_v54 = vpop.eup %5152  ;;  %v1646_v55 = vmul.f32 1.442695, %v1644_v62 }
 0x683   : > { %v1579_v3 = vsel %vm1563_vm7, %v5153_v54, 0.0 }
 0x684   : > { %5154 = vpow2.f32 %v1646_v55  ;;  %1580 = vadd.xlane.f32.xlu2 %v1579_v3 }
 0x687   : > { %v1643_v58 = vpop.xlane.xlu0 %1642 }
 0x688   : > { %v1645_v59 = vsub.f32 %v1635_v11, %v1643_v58 }
 0x68a   : > { %v5155_v63 = vpop.eup %5154  ;;  %v1648_v2 = vmul.f32 1.442695, %v1645_v59 }
 0x68b   : > { %v1650_v4 = vsel %vm1563_vm7, %v5155_v63, 0.0 }
 0x68c   : > { %5156 = vpow2.f32 %v1648_v2  ;;  %1651 = vadd.xlane.f32.xlu0 %v1650_v4 }
 0x692   : > { %v5157_v42 = vpop.eup %5156 }
 0x693   : > { %v1653_v5 = vsel %vm1563_vm7, %v5157_v42, 0.0 }
 0x694   : > { %1654 = vadd.xlane.f32.xlu1 %v1653_v5 }
 0x6ef   : > { %v1578_v6 = vpop.xlane.xlu1 %1577 }
 0x6f0   : > { %5158 = vrcp.f32 %v1578_v6 }
 0x6f6   : > { %v5159_v16 = vpop.eup %5158 }
 0x6f7   : > { %v1581_v13 = vpop.xlane.xlu2 %1580  ;;  %v1584_v20 = vmul.f32 %v5159_v16, %v5151_v50 }
 0x6f8   : > { %5160 = vrcp.f32 %v1581_v13 }
 0x6fe   : > { %v5161_v48 = vpop.eup %5160 }
 0x6ff   : > { %v1585_v21 = vmul.f32 %v5161_v48, %v5153_v54  ;;  %v1652_v12 = vpop.xlane.xlu0 %1651  ;;  %v1820_v48 = vld [vmem:[#allocation5 + $0x21] ss:$0 sm:$0xff] }
 0x700   : > { %5162 = vrcp.f32 %v1652_v12 }
 0x701   : > { %v1586_v22 = vpack.c.bf16 %v1585_v21, %v1584_v20 }
 0x703   : > { %4324 = vmatmul.msk.bf16.vlgmr.msra.gmra.mxu3 %vm1563_vm7, %v1586_v22 }
 0x706   : > { %v5163_v32 = vpop.eup %5162 }
 0x707   : > { %v1655_v25 = vpop.xlane.xlu1 %1654  ;;  %v1658_v26 = vmul.f32 %v5163_v32, %v5155_v63 }
 0x708   : > { %5164 = vrcp.f32 %v1655_v25 }
 0x70e   : > { %v5165_v15 = vpop.eup %5164 }
 0x70f   : > { %v1659_v27 = vmul.f32 %v5165_v15, %v5157_v42 }
 0x711   : > { %v1660_v43 = vpack.c.bf16 %v1659_v27, %v1658_v26 }
 0x713   : > { %4325 = vmatmul.msk.bf16.vlgmr.msrb.gmra.mxu3 %vm1563_vm7, %v1660_v43 }
 0x786   : > { %v1599_v61 = vpop.f32.mrf.mxu3 }
 0x78e   : > { %v1601_v34 = vpop.f32.mrf.mxu3 }
 0x78f   : > { %v1604_v35 = vpack.c.bf16 %v1601_v34, %v1599_v61  ;;  %v4512_v61 = vld [vmem:[#allocation13 + $0xe8] sm:$0xf]  ;;  %v4910_v34 = vld [vmem:[#allocation13 + $0xf4] sm:$0xf0] }
 0x791   : > { %1813 = vmatmul.bf16.vlgmr.msrb.gmra.mxu1 %v1604_v35  ;;  %v4509_v35 = vor.u32 %v4907_v1, %v4506_v33  ;;  %v4889_v1 = vld [vmem:[#allocation13 + $0x4c] sm:$0xf0] }
 0x792   : > { %v4425_v33 = vor.u32 %v4889_v1, %v4424_v60  ;;  %v1868_v1 = vld [vmem:[#allocation5 + $0x23] ss:$0 sm:$0xff] }
 0x793   : > { %2131 = vmatpush.bf16.msra.mxu3 %v4509_v35  ;;  %v4890_v35 = vld [vmem:[#allocation13 + $0x54] sm:$0xf0] }
 0x796   : > { %v1673_v56 = vpop.f32.mrf.mxu3 }
 0x79e   : > { %v1675_v36 = vpop.f32.mrf.mxu3 }
 0x79f   : > { %v1678_v37 = vpack.c.bf16 %v1675_v36, %v1673_v56  ;;  %v4513_v56 = vor.u32 %v4910_v34, %v4512_v61  ;;  %v4908_v36 = vld [vmem:[#allocation13 + $0xec] sm:$0xf]  ;;  %v4426_v61 = vld [vmem:[#allocation13 + $0x50] sm:$0xf0]  ;;  %v4432_v34 = vld [vmem:[#allocation13 + $0x48] sm:$0xf] }
 0x7a1   : > { %1751 = vmatmul.bf16.vlgmr.msrb.gmra.mxu0 %v1678_v37  ;;  %v4514_v37 = vld [vmem:[#allocation13 + $0xf8] sm:$0xf0] }
 0x7a2   : > { %2145 = vmatpush.bf16.msra.mxu0 %v4513_v56  ;;  %v4429_v56 = vor.u32 %v4887_v31, %v4426_v61 }
 0x80e   : > { %v1814_v40 = vpop.f32.mrf.mxu1 }
 0x816   : > { %v1816_v11 = vpop.f32.mrf.mxu1 }
 0x81e   : > { %v1752_v38 = vpop.f32.mrf.mxu0 }
 0x81f   : > { %v1815_v57 = vadd.f32 %v1814_v40, %v1752_v38  ;;  %v4517_v40 = vor.u32 %v4908_v36, %v4514_v37  ;;  %v4488_v38 = vld [vmem:[#allocation13 + $0xc0] sm:$0xf]  ;;  %v4433_v36 = vor.u32 %v4890_v35, %v4432_v34  ;;  %v4888_v37 = vld [vmem:[#allocation13 + $0x4c] sm:$0xf] }
 0x820   : > { %v6118_v35 = vld [vmem:[#allocation5 + $0x24] ss:$8 sm:$0xf] }
 0x821   : > { %1821 = vadd.xlane.f32.xlu2 %v1815_v57  ;;  %2159 = vmatpush.bf16.msra.mxu1 %v4517_v40  ;;  %v4434_v40 = vld [vmem:[#allocation13 + $0x58] sm:$0xf0] }
 0x826   : > { %v1754_v41 = vpop.f32.mrf.mxu0 }
 0x827   : > { %v1817_v44 = vadd.f32 %v1816_v11, %v1754_v41  ;;  %v4903_v11 = vld [vmem:[#allocation13 + $0xc4] sm:$0xf] }
 0x829   : > { %1823 = vadd.xlane.f32.xlu0 %v1817_v44 }
 0x894   : > { %v1822_v45 = vpop.xlane.xlu2 %1821 }
 0x895   : > { %v1825_v46 = vmul.f32 %v1822_v45, %v5942_v8  ;;  %v4496_v45 = vld [vmem:[#allocation13 + $0xc8] sm:$0xf] }
 0x897   : > { %v1827_v47 = vsub.f32 %v1815_v57, %v1825_v46  ;;  %v4905_v57 = vld [vmem:[#allocation13 + $0xcc] sm:$0xf0]  ;;  %v4906_v46 = vld [vmem:[#allocation13 + $0xd4] sm:$0xf0] }
 0x898   : > { %v4489_v41 = vor.u32 %v4905_v57, %v4488_v38  ;;  %v4408_v38 = vld [vmem:[#allocation13 + $0x20] sm:$0xf] }
 0x899   : > { %v1829_v49 = vmul.f32 %v1827_v47, %v1827_v47 }
 0x89a   : > { %2118 = vmatpush.bf16.msra.mxu2 %v4489_v41  ;;  %v4885_v41 = vld [vmem:[#allocation13 + $0x2c] sm:$0xf0] }
 0x89b   : > { %1831 = vadd.xlane.f32.xlu1 %v1829_v49  ;;  %v4497_v49 = vor.u32 %v4906_v46, %v4496_v45  ;;  %v4410_v45 = vld [vmem:[#allocation13 + $0x30] sm:$0xf0] }
 0x89c   : > { %v1824_v50 = vpop.xlane.xlu0 %1823 }
 0x89d   : > { %v1826_v51 = vmul.f32 %v1824_v50, %v5942_v8  ;;  %v4904_v50 = vld [vmem:[#allocation13 + $0xcc] sm:$0xf]  ;;  %2146 = vmatpush.bf16.msra.mxu0 %v4497_v49 }
 0x89f   : > { %v1828_v52 = vsub.f32 %v1817_v44, %v1826_v51  ;;  %v4490_v44 = vld [vmem:[#allocation13 + $0xd0] sm:$0xf0]  ;;  %v4498_v51 = vld [vmem:[#allocation13 + $0xd8] sm:$0xf0] }
 0x8a1   : > { %v1830_v53 = vmul.f32 %v1828_v52, %v1828_v52 }
 0x8a3   : > { %1833 = vadd.xlane.f32.xlu2 %v1830_v53  ;;  %v4472_v53 = vld [vmem:[#allocation13 + $0xa0] sm:$0xf] }
 0x90e   : > { %v1832_v62 = vpop.xlane.xlu1 %1831 }
 0x90f   : > { %v1835_v54 = vmul.f32 %v1832_v62, %v5942_v8  ;;  %v4901_v62 = vld [vmem:[#allocation13 + $0xac] sm:$0xf0] }
 0x911   : > { %v1837_v55 = vadd.f32 1e-05, %v1835_v54  ;;  %v4899_v54 = vld [vmem:[#allocation13 + $0xa4] sm:$0xf] }
 0x913   : > { %5166 = vrsqrt.f32 %v1837_v55  ;;  %vm1845_vm9 = vweird.f32 %v1837_v55 }
 0x916   : > { %v1834_v3 = vpop.xlane.xlu2 %1833 }
 0x917   : > { %v1836_v58 = vmul.f32 %v1834_v3, %v5942_v8  ;;  %v4474_v3 = vld [vmem:[#allocation13 + $0xb0] sm:$0xf0] }
 0x919   : > { %v5167_v59 = vpop.eup %5166  ;;  %v1838_v63 = vadd.f32 1e-05, %v1836_v58  ;;  %v4480_v58 = vld [vmem:[#allocation13 + $0xa8] sm:$0xf] }
 0x91a   : > { %v1840_v2 = vmul.f32 %v5167_v59, %v1837_v55  ;;  %vm1846_vm8 = vweird.f32 %v5167_v59  ;;  %v4473_v55 = vor.u32 %v4901_v62, %v4472_v53  ;;  %v4418_v62 = vld [vmem:[#allocation13 + $0x38] sm:$0xf0] }
 0x91b   : > { %5168 = vrsqrt.f32 %v1838_v63  ;;  %vm1847_vm10 = vmor %vm1845_vm9, %vm1846_vm8  ;;  %vm1855_vm12 = vweird.f32 %v1838_v63 }
 0x91c   : > { %v1841_v4 = vmul.f32 %v5167_v59, %v1840_v2  ;;  %2119 = vmatpush.bf16.msra.mxu2 %v4473_v55  ;;  %v4881_v55 = vld [vmem:[#allocation13 + $0xc] sm:$0xf0] }
 0x91e   : > { %v1842_v42 = vmul.f32 0.5, %v1841_v4  ;;  %v4900_v4 = vld [vmem:[#allocation13 + $0xac] sm:$0xf] }
 0x920   : > { %v1843_v5 = vsub.f32 1.5, %v1842_v42  ;;  %v4482_v42 = vld [vmem:[#allocation13 + $0xb8] sm:$0xf0] }
 0x921   : > { %v5169_v6 = vpop.eup %5168 }
 0x922   : > { %v1844_v7 = vmul.f32 %v5167_v59, %v1843_v5  ;;  %v1850_v9 = vmul.f32 %v5169_v6, %v1838_v63  ;;  %vm1856_vm11 = vweird.f32 %v5169_v6  ;;  %v4477_v63 = vor.u32 %v4899_v54, %v4474_v3  ;;  %v4392_v54 = vld [vmem:[#allocation13] sm:$0xf] }
 0x923   : > { %vm1857_vm13 = vmor %vm1855_vm12, %vm1856_vm11  ;;  %v4485_v5 = vor.u32 %v4900_v4, %v4482_v42  ;;  %v4400_v4 = vld [vmem:[#allocation13 + $0x8] sm:$0xf]  ;;  %v4882_v42 = vld [vmem:[#allocation13 + $0x14] sm:$0xf0] }
 0x924   : > { %v1848_v10 = vsel %vm1847_vm10, %v5167_v59, %v1844_v7  ;;  %v1851_v13 = vmul.f32 %v5169_v6, %v1850_v9  ;;  %v4902_v59 = vld [vmem:[#allocation13 + $0xb4] sm:$0xf0]  ;;  %v4897_v7 = vld [vmem:[#allocation13 + $0x8c] sm:$0xf0]  ;;  %v4895_v9 = vld [vmem:[#allocation13 + $0x84] sm:$0xf] }
 0x925   : > { %v1859_v16 = vmul.f32 %v1848_v10, %v1827_v47  ;;  %v4493_v47 = vor.u32 %v4903_v11, %v4490_v44  ;;  %v4481_v2 = vor.u32 %v4902_v59, %v4480_v58  ;;  %v4437_v11 = vor.u32 %v4888_v37, %v4434_v40  ;;  %v4883_v44 = vld [vmem:[#allocation13 + $0x24] sm:$0xf] }
 0x926   : > { %v1852_v17 = vmul.f32 0.5, %v1851_v13  ;;  %v4458_v13 = vld [vmem:[#allocation13 + $0x90] sm:$0xf0]  ;;  %v4413_v49 = vor.u32 %v4883_v44, %v4410_v45  ;;  %v4879_v59 = vld [vmem:[#allocation13 + $0x4] sm:$0xf] }
 0x927   : > { %v1861_v20 = vmul.f32 %v1859_v16, %v1819_v14  ;;  %2132 = vmatpush.bf16.msra.mxu3 %v4493_v47  ;;  %2147 = vmatpush.bf16.msra.mxu0 %v4481_v2  ;;  %v4898_v16 = vld [vmem:[#allocation13 + $0x94] sm:$0xf0]  ;;  %v4409_v47 = vor.u32 %v4885_v41, %v4408_v38  ;;  %v4393_v2 = vor.u32 %v4881_v55, %v4392_v54  ;;  %v4925_v54 = vld [vmem:[#allocation16 + $0x70] sm:$0xff]  ;;  %v2261_v55 = vlaneseq }
 0x928   : > { %v1853_v21 = vsub.f32 1.5, %v1852_v17  ;;  %v4461_v17 = vor.u32 %v4895_v9, %v4458_v13  ;;  %v4402_v9 = vld [vmem:[#allocation13 + $0x18] sm:$0xf0] }
 0x929   : > { %v1863_v22 = vadd.f32 %v1861_v20, %v1820_v48  ;;  %v4896_v20 = vld [vmem:[#allocation13 + $0x8c] sm:$0xf] }
 0x92a   : > { %v1854_v23 = vmul.f32 %v5169_v6, %v1853_v21  ;;  %v4466_v21 = vld [vmem:[#allocation13 + $0x98] sm:$0xf0] }
 0x92b   : > { %v6095_v12 = vadd.f32 %v1863_v22, %v6052_v18  ;;  %2133 = vmatpush.bf16.msra.mxu3 %v4477_v63  ;;  %v4469_v22 = vor.u32 %v4896_v20, %v4466_v21  ;;  %v4394_v63 = vld [vmem:[#allocation13 + $0x10] sm:$0xf0] }
 0x92c   : > { %v1858_v25 = vsel %vm1857_vm13, %v5169_v6, %v1854_v23  ;;  %v4456_v6 = vld [vmem:[#allocation13 + $0x80] sm:$0xf] }
 0x92d   : > { %v1860_v32 = vmul.f32 %v1858_v25, %v1828_v52  ;;  %1869 = vadd.xlane.f32.xlu0 %v6095_v12  ;;  %v4501_v52 = vor.u32 %v4904_v50, %v4498_v51  ;;  %v4457_v10 = vor.u32 %v4897_v7, %v4456_v6  ;;  %v4440_v23 = vld [vmem:[#allocation13 + $0x60] sm:$0xf]  ;;  %v4893_v25 = vld [vmem:[#allocation13 + $0x6c] sm:$0xf0]  ;;  %v4416_v50 = vld [vmem:[#allocation13 + $0x28] sm:$0xf]  ;;  %v4397_v6 = vor.u32 %v4879_v59, %v4394_v63 }
 0x92e   : > { %v4886_v51 = vld [vmem:[#allocation13 + $0x34] sm:$0xf0]  ;;  %v4401_v7 = vor.u32 %v4882_v42, %v4400_v4  ;;  %v1949_v59 = vperm.slane %v6118_v35, 0  ;;  %v1950_v63 = vperm.slane %v6118_v35, 1  ;;  %v6129_v4 = vld [vmem:[#allocation14] sm:$0xff]  ;;  %v6132_v42 = vld [vmem:[#allocation14 + $0x10] sm:$0xff] }
 0x92f   : > { %v1862_v15 = vmul.f32 %v1860_v32, %v1819_v14  ;;  %2160 = vmatpush.bf16.msra.mxu1 %v4501_v52  ;;  %v4464_v14 = vld [vmem:[#allocation13 + $0x88] sm:$0xf]  ;;  %2120 = vmatpush.bf16.msra.mxu2 %v4457_v10  ;;  %v4891_v32 = vld [vmem:[#allocation13 + $0x64] sm:$0xf]  ;;  %v4884_v52 = vld [vmem:[#allocation13 + $0x2c] sm:$0xf]  ;;  %v4417_v53 = vor.u32 %v4886_v51, %v4416_v50 }
 0x930   : > { %2134 = vmatpush.bf16.msra.mxu3 %v4461_v17  ;;  %v4421_v58 = vor.u32 %v4884_v52, %v4418_v62  ;;  %v4917_v62 = vld [vmem:[#allocation16 + $0x30] sm:$0xff] }
 0x931   : > { %v1864_v26 = vadd.f32 %v1862_v15, %v1820_v48  ;;  %v4465_v48 = vor.u32 %v4898_v16, %v4464_v14  ;;  %v4441_v15 = vor.u32 %v4893_v25, %v4440_v23 }
 0x933   : > { %v6099_v27 = vadd.f32 %v1864_v26, %v6056_v24  ;;  %2161 = vmatpush.bf16.msra.mxu1 %v4485_v5  ;;  %2148 = vmatpush.bf16.msra.mxu0 %v4465_v48  ;;  %v4442_v26 = vld [vmem:[#allocation13 + $0x70] sm:$0xf0]  ;;  %v4880_v5 = vld [vmem:[#allocation13 + $0xc] sm:$0xf] }
 0x934   : > { %2121 = vmatpush.bf16.msra.mxu2 %v4441_v15  ;;  %v4405_v10 = vor.u32 %v4880_v5, %v4402_v9  ;;  %v6134_v5 = vld [vmem:[#allocation14 + $0x18] sm:$0xff]  ;;  %v4916_v9 = vld [vmem:[#allocation16 + $0x28] sm:$0xff] }
 0x935   : > { %1871 = vadd.xlane.f32.xlu1 %v6099_v27 }
 0x937   : > { %2162 = vmatpush.bf16.msra.mxu1 %v4469_v22 }
 0x938   : > { %2122 = vmatpush.bf16.msra.mxu2 %v4425_v33 }
 0x93c   : > { %2123 = vmatpush.bf16.msra.mxu2 %v4409_v47  ;;  %v4926_v47 = vld [vmem:[#allocation16 + $0x78] sm:$0xff] }
 0x940   : > { %2124 = vmatpush.bf16.msra.mxu2 %v4393_v2 }
 0x9a0   : > { %v1870_v43 = vpop.xlane.xlu0 %1869 }
 0x9a1   : > { %v1873_v28 = vmul.f32 %v1870_v43, %v5942_v8  ;;  %v4448_v43 = vld [vmem:[#allocation13 + $0x68] sm:$0xf] }
 0x9a3   : > { %v6104_v0 = vsub.f32 %v6095_v12, %v1873_v28  ;;  %v4894_v28 = vld [vmem:[#allocation13 + $0x74] sm:$0xf0] }
 0x9a5   : > { %v1877_v18 = vmul.f32 %v6104_v0, %v6104_v0 }
 0x9a7   : > { %1879 = vadd.xlane.f32.xlu2 %v1877_v18  ;;  %v4445_v18 = vor.u32 %v4891_v32, %v4442_v26 }
 0x9a8   : > { %v1872_v29 = vpop.xlane.xlu1 %1871 }
 0x9a9   : > { %v1874_v39 = vmul.f32 %v1872_v29, %v5942_v8  ;;  %v4449_v29 = vor.u32 %v4894_v28, %v4448_v43  ;;  %2135 = vmatpush.bf16.msra.mxu3 %v4445_v18 }
 0x9ab   : > { %v6110_v19 = vsub.f32 %v6099_v27, %v1874_v39  ;;  %v4892_v39 = vld [vmem:[#allocation13 + $0x6c] sm:$0xf]  ;;  %2149 = vmatpush.bf16.msra.mxu0 %v4449_v29 }
 0x9ad   : > { %v1878_v24 = vmul.f32 %v6110_v19, %v6110_v19  ;;  %2136 = vmatpush.bf16.msra.mxu3 %v4429_v56  ;;  %v1952_v56 = vperm.slane %v6118_v35, 3 }
 0x9af   : > { %1881 = vadd.xlane.f32.xlu0 %v1878_v24  ;;  %v4450_v24 = vld [vmem:[#allocation13 + $0x78] sm:$0xf0]  ;;  %2150 = vmatpush.bf16.msra.mxu0 %v4433_v36 }
 0x9b0   : > { %v4453_v30 = vor.u32 %v4892_v39, %v4450_v24  ;;  %v1867_v39 = vld [vmem:[#allocation5 + $0x22] ss:$0 sm:$0xff] }
 0x9b1   : > { %2137 = vmatpush.bf16.msra.mxu3 %v4413_v49 }
 0x9b2   : > { %2163 = vmatpush.bf16.msra.mxu1 %v4453_v30 }
 0x9b3   : > { %2151 = vmatpush.bf16.msra.mxu0 %v4417_v53 }
 0x9b5   : > { %2138 = vmatpush.bf16.msra.mxu3 %v4397_v6  ;;  %v6136_v6 = vld [vmem:[#allocation5 + $0x25] ss:$8 sm:$0x3] }
 0x9b6   : > { %2164 = vmatpush.bf16.msra.mxu1 %v4437_v11 }
 0x9b7   : > { %2152 = vmatpush.bf16.msra.mxu0 %v4401_v7  ;;  %v2302_v7 = vperm.slane %v6129_v4, 0 }
 0x9b9   : > { %3228 = vmatpush.bf16.msrb.mxu3 %v4926_v47  ;;  %v2457_v47 = vperm.slane %v6129_v4, 5 }
 0x9ba   : > { %2165 = vmatpush.bf16.msra.mxu1 %v4421_v58 }
 0x9bd   : > { %3229 = vmatpush.bf16.msrb.mxu3 %v4925_v54 }
 0x9be   : > { %2166 = vmatpush.bf16.msra.mxu1 %v4405_v10  ;;  %v4924_v10 = vld [vmem:[#allocation16 + $0x68] sm:$0xff] }
 0x9c1   : > { %3230 = vmatpush.bf16.msrb.mxu3 %v4924_v10 }
 0xa1a   : > { %v1880_v57 = vpop.xlane.xlu2 %1879 }
 0xa1b   : > { %v1883_v46 = vmul.f32 %v1880_v57, %v5942_v8 }
 0xa1d   : > { %v1885_v3 = vadd.f32 1e-05, %v1883_v46  ;;  %v4918_v46 = vld [vmem:[#allocation16 + $0x38] sm:$0xff] }
 0xa1e   : > { %3214 = vmatpush.bf16.msrb.mxu2 %v4918_v46 }
 0xa1f   : > { %5170 = vrsqrt.f32 %v1885_v3  ;;  %vm1893_vm15 = vweird.f32 %v1885_v3 }
 0xa22   : > { %v1882_v13 = vpop.xlane.xlu0 %1881  ;;  %3215 = vmatpush.bf16.msrb.mxu2 %v4917_v62 }
 0xa23   : > { %v1884_v14 = vmul.f32 %v1882_v13, %v5942_v8  ;;  %v6139_v13 = vshrl.u32 %v2261_v55, 7 }
 0xa25   : > { %v5171_v16 = vpop.eup %5170  ;;  %v1886_v17 = vadd.f32 1e-05, %v1884_v14  ;;  %v2333_v14 = vperm.slane %v6129_v4, 1 }
 0xa26   : > { %v1888_v48 = vmul.f32 %v5171_v16, %v1885_v3  ;;  %vm1894_vm14 = vweird.f32 %v5171_v16  ;;  %3216 = vmatpush.bf16.msrb.mxu2 %v4916_v9  ;;  %v4921_v9 = vld [vmem:[#allocation16 + $0x50] sm:$0xff] }
 0xa27   : > { %5172 = vrsqrt.f32 %v1886_v17  ;;  %vm1895_vm0 = vmor %vm1893_vm15, %vm1894_vm14  ;;  %vm1903_vm2 = vweird.f32 %v1886_v17  ;;  %vm7049_vm15 = vcmp.lt.s32.totalorder %v6139_v13, 7 }
 0xa28   : > { %v1889_v20 = vmul.f32 %v5171_v16, %v1888_v48  ;;  %v2264_v48 = vperm.slane %v6132_v42, 7 }
 0xa2a   : > { %v1890_v21 = vmul.f32 0.5, %v1889_v20  ;;  %v2265_v20 = vperm.slane %v6134_v5, 7 }
 0xa2c   : > { %v1891_v22 = vsub.f32 1.5, %v1890_v21  ;;  %v2273_v21 = vperm.slane %v6136_v6, 0 }
 0xa2d   : > { %v5173_v23 = vpop.eup %5172 }
 0xa2e   : > { %v1892_v25 = vmul.f32 %v5171_v16, %v1891_v22  ;;  %v1898_v32 = vmul.f32 %v5173_v23, %v1886_v17  ;;  %vm1904_vm1 = vweird.f32 %v5173_v23 }
 0xa2f   : > { %vm1905_vm3 = vmor %vm1903_vm2, %vm1904_vm1  ;;  %vm2316_vm2 = vcmp.lt.s32.totalorder %v6139_v13, 6 }
 0xa30   : > { %v1899_v15 = vmul.f32 %v5173_v23, %v1898_v32  ;;  %v1896_v26 = vsel %vm1895_vm0, %v5171_v16, %v1892_v25  ;;  %v2364_v16 = vperm.slane %v6129_v4, 2  ;;  %v6157_v32 = vmul.f32 0.0, %v2302_v7 }
 0xa31   : > { %v1907_v18 = vmul.f32 %v1896_v26, %v6104_v0  ;;  %v1951_v0 = vperm.slane %v6118_v35, 2 }
 0xa32   : > { %v1900_v43 = vmul.f32 0.5, %v1899_v15  ;;  %v2509_v15 = vperm.slane %v6129_v4, 7 }
 0xa33   : > { %v1909_v60 = vmul.f32 %v1907_v18, %v1867_v39  ;;  %v4915_v18 = vld [vmem:[#allocation16 + $0x20] sm:$0xff] }
 0xa34   : > { %v1901_v28 = vsub.f32 1.5, %v1900_v43  ;;  %3217 = vmatpush.bf16.msrb.mxu2 %v4915_v18 }
 0xa35   : > { %v1911_v33 = vadd.f32 %v1909_v60, %v1868_v1 }
 0xa36   : > { %v1902_v29 = vmul.f32 %v5173_v23, %v1901_v28 }
 0xa38   : > { %v1906_v24 = vsel %vm1905_vm3, %v5173_v23, %v1902_v29  ;;  %v4923_v29 = vld [vmem:[#allocation16 + $0x60] sm:$0xff]  ;;  %vm2347_vm3 = vcmp.lt.s32.totalorder %v6139_v13, 5 }
 0xa39   : > { %v1908_v30 = vmul.f32 %v1906_v24, %v6110_v19  ;;  %v6168_v24 = vmul.f32 0.0, %v2333_v14  ;;  %3231 = vmatpush.bf16.msrb.mxu3 %v4923_v29 }
 0xa3b   : > { %v1910_v31 = vmul.f32 %v1908_v30, %v1867_v39  ;;  %v6164_v39 = vadd.s32 8, %v6139_v13 }
 0xa3d   : > { %v1912_v61 = vadd.f32 %v1910_v31, %v1868_v1  ;;  %v6174_v1 = vmul.f32 0.0, %v2364_v16  ;;  %v2395_v31 = vperm.slane %v6129_v4, 3  ;;  %vm7048_vm1 = vcmp.ge.s32.totalorder %v6164_v39, 15 }
 0xa3f   : > { %v1913_v34 = vpack.c.bf16 %v1912_v61, %v1911_v33  ;;  %v6213_v10 = vmul.f32 0.0, %v2395_v31 }
 0xa41   : > { %2125 = vmatmul.bf16.vlgmr.msra.gmra.mxu2 %v1913_v34  ;;  %2139 = vmatmul.bf16.vlgmr.msra.gmra.mxu3 %v1913_v34 }
 0xa42   : > { %2153 = vmatmul.bf16.vlgmr.msra.gmra.mxu0 %v1913_v34  ;;  %2167 = vmatmul.bf16.vlgmr.msra.gmra.mxu1 %v1913_v34 }
 0xabf   : > { %v2154_v36 = vpop.f32.mrf.mxu0  ;;  %v2168_v37 = vpop.f32.mrf.mxu1 }
 0xac0   : > { %v2155_v40 = vadd.f32 %v2154_v36, %v1951_v0  ;;  %v2169_v19 = vadd.f32 %v2168_v37, %v1952_v56 }
 0xac2   : > { %v4518_v38 = vmul.f32 -1.442695, %v2155_v40  ;;  %v4519_v57 = vmul.f32 -1.442695, %v2169_v19 }
 0xac4   : > { %5174 = vpow2.f32 %v4518_v38  ;;  %v2126_v58 = vpop.f32.mrf.mxu2  ;;  %v2140_v2 = vpop.f32.mrf.mxu3 }
 0xac5   : > { %5176 = vpow2.f32 %v4519_v57  ;;  %v6145_v17 = vadd.f32 %v2126_v58, %v1949_v59  ;;  %v6153_v25 = vadd.f32 %v2140_v2, %v1950_v63 }
 0xac7   : > { %v2156_v11 = vpop.f32.mrf.mxu0  ;;  %v2170_v41 = vpop.f32.mrf.mxu1 }
 0xac8   : > { %v2157_v44 = vadd.f32 %v2156_v11, %v1951_v0  ;;  %v2171_v45 = vadd.f32 %v2170_v41, %v1952_v56  ;;  %v4914_v11 = vld [vmem:[#allocation16 + $0x18] sm:$0xff]  ;;  %v4920_v56 = vld [vmem:[#allocation16 + $0x48] sm:$0xff] }
 0xac9   : > { %v4922_v41 = vld [vmem:[#allocation16 + $0x58] sm:$0xff]  ;;  %3218 = vmatpush.bf16.msrb.mxu2 %v4914_v11 }
 0xaca   : > { %v5175_v49 = vpop.eup %5174  ;;  %v4520_v50 = vmul.f32 -1.442695, %v2157_v44  ;;  %v4521_v53 = vmul.f32 -1.442695, %v2171_v45  ;;  %v2426_v44 = vperm.slane %v6129_v4, 4  ;;  %3232 = vmatpush.bf16.msrb.mxu3 %v4922_v41 }
 0xacb   : > { %v5177_v51 = vpop.eup %5176  ;;  %v6122_v52 = vadd.f32 1.0, %v5175_v49 }
 0xacc   : > { %v6124_v3 = vadd.f32 1.0, %v5177_v51  ;;  %5178 = vpow2.f32 %v4520_v50  ;;  %v2128_v40 = vpop.f32.mrf.mxu2  ;;  %v2142_v57 = vpop.f32.mrf.mxu3  ;;  %v6217_v35 = vmul.f32 0.0, %v2426_v44  ;;  %v2553_v50 = vperm.slane %v6132_v42, 1 }
 0xacd   : > { %5180 = vrcp.f32 %v6122_v52  ;;  %v2198_v23 = vand.u32 2147483647, %v6122_v52  ;;  %v2200_v43 = vand.u32 2147483648, %v6122_v52  ;;  %vm2194_vm4 = vweird.f32 %v6122_v52 }
 0xace   : > { %5182 = vrcp.f32 %v6124_v3  ;;  %vm2209_vm5 = vweird.f32 %v6124_v3  ;;  %v2213_v34 = vand.u32 2147483647, %v6124_v3  ;;  %v2215_v36 = vand.u32 2147483648, %v6124_v3  ;;  %3233 = vmatpush.bf16.msrb.mxu3 %v4921_v9 }
 0xacf   : > { %5184 = vpow2.f32 %v4521_v53  ;;  %vm6181_vm6 = vcmp.eq.f32.partialorder %v2198_v23, 8.507059e+37  ;;  %v2201_v19 = vor.u32 1.1754944e-38, %v2200_v43  ;;  %v6198_v51 = vadd.f32 %v2128_v40, %v1949_v59  ;;  %v4913_v59 = vld [vmem:[#allocation16 + $0x10] sm:$0xff] }
 0xad0   : > { %vm6192_vm9 = vcmp.eq.f32.partialorder %v2213_v34, 8.507059e+37  ;;  %v2216_v62 = vor.u32 1.1754944e-38, %v2215_v36  ;;  %v6203_v55 = vadd.f32 %v2142_v57, %v1950_v63  ;;  %v6230_v23 = vmul.f32 0.0, %v2457_v47  ;;  %3219 = vmatpush.bf16.msrb.mxu2 %v4913_v59 }
 0xad1   : > { %v2488_v36 = vperm.slane %v6129_v4, 6 }
 0xad2   : > { %v5179_v22 = vpop.eup %5178  ;;  %3234 = vmatpush.bf16.msrb.mxu3 %v4920_v56 }
 0xad3   : > { %v5181_v26 = vpop.eup %5180  ;;  %v6161_v28 = vadd.f32 1.0, %v5179_v22 }
 0xad4   : > { %v5183_v30 = vpop.eup %5182  ;;  %v2190_v60 = vmul.f32 %v5181_v26, %v6122_v52  ;;  %vm2195_vm7 = vweird.f32 %v5181_v26 }
 0xad5   : > { %v5185_v33 = vpop.eup %5184  ;;  %v2205_v61 = vmul.f32 %v5183_v30, %v6124_v3  ;;  %5186 = vrcp.f32 %v6161_v28  ;;  %v2228_v46 = vand.u32 2147483647, %v6161_v28  ;;  %vm2210_vm8 = vweird.f32 %v5183_v30  ;;  %vm2196_vm10 = vmor %vm2194_vm4, %vm2195_vm7 }
 0xad6   : > { %v2191_v0 = vsub.f32 1.0, %v2190_v60  ;;  %v6186_v37 = vadd.f32 1.0, %v5185_v33  ;;  %v2230_v54 = vand.u32 2147483648, %v6161_v28  ;;  %vm2224_vm11 = vweird.f32 %v6161_v28  ;;  %vm2211_vm12 = vmor %vm2209_vm5, %vm2210_vm8 }
 0xad7   : > { %v2206_v38 = vsub.f32 1.0, %v2205_v61  ;;  %vm6224_vm13 = vcmp.eq.f32.partialorder %v2228_v46, 8.507059e+37  ;;  %vm2322_vm5 = vcmp.ge.s32.totalorder %v6164_v39, 14  ;;  %vm2378_vm7 = vcmp.lt.s32.totalorder %v6139_v13, 4 }
 0xad8   : > { %v2192_v45 = vmul.f32 %v5181_v26, %v2191_v0  ;;  %5188 = vrcp.f32 %v6186_v37  ;;  %v2245_v3 = vand.u32 2147483648, %v6186_v37  ;;  %v2231_v34 = vor.u32 1.1754944e-38, %v2230_v54  ;;  %v4919_v54 = vld [vmem:[#allocation16 + $0x40] sm:$0xff] }
 0xad9   : > { %v2207_v49 = vmul.f32 %v5183_v30, %v2206_v38  ;;  %vm2239_vm14 = vweird.f32 %v6186_v37  ;;  %3235 = vmatpush.bf16.msrb.mxu3 %v4919_v54 }
 0xada   : > { %v2193_v53 = vadd.f32 %v5181_v26, %v2192_v45  ;;  %v2246_v41 = vor.u32 1.1754944e-38, %v2245_v3 }
 0xadb   : > { %v6205_v58 = vpop.eup %5186  ;;  %v2208_v2 = vadd.f32 %v5183_v30, %v2207_v49  ;;  %v2531_v49 = vperm.slane %v6132_v42, 0 }
 0xadc   : > { %v2197_v63 = vsel %vm2196_vm10, %v5181_v26, %v2193_v53  ;;  %v2220_v52 = vmul.f32 %v6205_v58, %v6161_v28  ;;  %v2243_v26 = vand.u32 2147483647, %v6186_v37  ;;  %vm2225_vm0 = vweird.f32 %v6205_v58 }
 0xadd   : > { %v2202_v43 = vsel %vm6181_vm6, %v2201_v19, %v2197_v63  ;;  %v2212_v18 = vsel %vm2211_vm12, %v5183_v30, %v2208_v2  ;;  %v4912_v30 = vld [vmem:[#allocation16 + $0x8] sm:$0xff]  ;;  %vm7050_vm6 = vcmp.ge.s32.totalorder %v6164_v39, 13  ;;  %vm2226_vm8 = vmor %vm2224_vm11, %vm2225_vm0  ;;  %vm2384_vm10 = vcmp.ge.s32.totalorder %v6164_v39, 12 }
 0xade   : > { %v6236_v29 = vpop.eup %5188  ;;  %v6239_v60 = vmul.f32 %v2202_v43, %v6145_v17  ;;  %v2217_v33 = vsel %vm6192_vm9, %v2216_v62, %v2212_v18  ;;  %v2221_v61 = vsub.f32 1.0, %v2220_v52  ;;  %v6250_v17 = vmul.f32 0.0, %v2509_v15  ;;  %3220 = vmatpush.bf16.msrb.mxu2 %v4912_v30  ;;  %v4911_v62 = vld [vmem:[#allocation16] sm:$0xff] }
 0xadf   : > { %v2235_v0 = vmul.f32 %v6236_v29, %v6186_v37  ;;  %v6256_v19 = vmul.f32 %v2217_v33, %v6153_v25  ;;  %vm6263_vm4 = vcmp.eq.f32.partialorder %v2243_v26, 8.507059e+37  ;;  %v6270_v25 = vmul.f32 0.0, %v2488_v36 }
 0xae0   : > { %v2266_v40 = vmul.f32 %v2264_v48, %v6239_v60  ;;  %v2222_v38 = vmul.f32 %v6205_v58, %v2221_v61  ;;  %vm2240_vm9 = vweird.f32 %v6236_v29  ;;  %v2281_v2 = vrot.slane %v6239_v60, 1 }
 0xae1   : > { %v2236_v57 = vsub.f32 1.0, %v2235_v0  ;;  %v2312_v59 = vrot.slane %v6239_v60, 2  ;;  %v6291_v9 = vmul.f32 %v2265_v20, %v6256_v19  ;;  %v2343_v52 = vrot.slane %v6239_v60, 3  ;;  %vm6309_vm12 = vmor %vm2239_vm14, %vm2240_vm9 }
 0xae2   : > { %v2223_v45 = vadd.f32 %v6205_v58, %v2222_v38  ;;  %v2277_v46 = vadd.f32 %v2273_v21, %v2266_v40  ;;  %v2374_v26 = vrot.slane %v6239_v60, 4  ;;  %v2405_v3 = vrot.slane %v6239_v60, 5  ;;  %3221 = vmatpush.bf16.msrb.mxu2 %v4911_v62 }
 0xae3   : > { %v2237_v53 = vmul.f32 %v6236_v29, %v2236_v57  ;;  %vm2409_vm11 = vcmp.lt.s32.totalorder %v6139_v13, 3  ;;  %v2436_v22 = vrot.slane %v6239_v60, 6  ;;  %vm2440_vm0 = vcmp.lt.s32.totalorder %v6139_v13, 2 }
 0xae4   : > { %v2227_v28 = vsel %vm2226_vm8, %v6205_v58, %v2223_v45  ;;  %v2308_v63 = vadd.f32 %v6157_v32, %v2277_v46  ;;  %v2467_v61 = vrot.slane %v6239_v60, 7  ;;  %vm2446_vm14 = vcmp.ge.s32.totalorder %v6164_v39, 10 }
 0xae5   : > { %v2232_v43 = vsel %vm6224_vm13, %v2231_v34, %v2227_v28  ;;  %v2238_v18 = vadd.f32 %v6236_v29, %v2237_v53  ;;  %vm7051_vm13 = vcmp.ge.s32.totalorder %v6164_v39, 11  ;;  %vm2471_vm8 = vcmp.lt.s32.totalorder %v6139_v13, 1 }
 0xae6   : > { %v6303_v33 = vmul.f32 %v2232_v43, %v6198_v51  ;;  %v2339_v58 = vadd.f32 %v6168_v24, %v2308_v63  ;;  %v6326_v24 = vmul.f32 %v2509_v15, %v6239_v60  ;;  %v2575_v37 = vperm.slane %v6132_v42, 2 }
 0xae7   : > { %v2242_v51 = vsel %vm6309_vm12, %v6236_v29, %v2238_v18  ;;  %v2597_v34 = vperm.slane %v6132_v42, 3  ;;  %vm2477_vm12 = vcmp.ge.s32.totalorder %v6164_v39, 9  ;;  %vm2541_vm9 = vcmp.ge.s32.totalorder %v6139_v13, 6 }
 0xae8   : > { %v2247_v29 = vsel %vm6263_vm4, %v2246_v41, %v2242_v51  ;;  %v2268_v0 = vmul.f32 %v2264_v48, %v6303_v33  ;;  %v2283_v30 = vrot.slane %v6303_v33, 1  ;;  %v2314_v56 = vrot.slane %v6303_v33, 2 }
 0xae9   : > { %v2345_v15 = vrot.slane %v6303_v33, 3  ;;  %v2370_v40 = vadd.f32 %v6174_v1, %v2339_v58  ;;  %v2376_v38 = vrot.slane %v6303_v33, 4  ;;  %v2619_v57 = vperm.slane %v6132_v42, 4 }
 0xaea   : > { %v6346_v11 = vsel %vm7049_vm15, %v2283_v30, %v2281_v2  ;;  %v2641_v48 = vperm.slane %v6132_v42, 5  ;;  %v2663_v41 = vperm.slane %v6132_v42, 6  ;;  %v6352_v45 = vadd.s32 1, %v6164_v39 }
 0xaeb   : > { %v6355_v1 = vmul.f32 %v2247_v29, %v6203_v55  ;;  %v2300_v46 = vsel %vm7048_vm1, %v6346_v11, 0.0  ;;  %v6362_v53 = vsel %vm2316_vm2, %v2314_v56, %v2312_v59  ;;  %v6366_v62 = vsel %vm2347_vm3, %v2345_v15, %v2343_v52 }
 0xaec   : > { %vm2585_vm4 = vcmp.ge.s32.totalorder %v6139_v13, 4  ;;  %v2279_v54 = vadd.f32 %v2273_v21, %v2268_v0  ;;  %v6373_v55 = vsel %vm7049_vm15, %v2281_v2, %v2283_v30  ;;  %v2306_v28 = vmul.f32 %v2302_v7, %v2300_v46 }
 0xaed   : > { %v2331_v63 = vsel %vm2322_vm5, %v6362_v53, 0.0  ;;  %vm2607_vm1 = vcmp.ge.s32.totalorder %v6139_v13, 3  ;;  %v2362_v21 = vsel %vm7050_vm6, %v6366_v62, 0.0  ;;  %v6388_v2 = vsel %vm2378_vm7, %v2376_v38, %v2374_v26 }
 0xaee   : > { %v2337_v43 = vmul.f32 %v2333_v14, %v2331_v63  ;;  %v2401_v18 = vadd.f32 %v6213_v10, %v2370_v40  ;;  %vm7053_vm15 = vcmp.ge.s32.totalorder %v6139_v13, 2  ;;  %v2310_v7 = vadd.f32 %v2306_v28, %v2279_v54 }
 0xaef   : > { %v2393_v32 = vsel %vm2384_vm10, %v6388_v2, 0.0  ;;  %v2407_v58 = vrot.slane %v6303_v33, 5  ;;  %v2438_v14 = vrot.slane %v6303_v33, 6  ;;  %v6399_v51 = vsel %vm2316_vm2, %v2312_v59, %v2314_v56 }
 0xaf0   : > { %v6403_v29 = vsel %vm2347_vm3, %v2343_v52, %v2345_v15  ;;  %v2432_v10 = vadd.f32 %v6217_v35, %v2401_v18  ;;  %v2469_v0 = vrot.slane %v6303_v33, 7  ;;  %vm7052_vm6 = vcmp.ge.s32.totalorder %v6139_v13, 1 }
 0xaf1   : > { %v2341_v30 = vadd.f32 %v2337_v43, %v2310_v7  ;;  %v2368_v40 = vmul.f32 %v2364_v16, %v2362_v21  ;;  %v6412_v46 = vsel %vm2378_vm7, %v2374_v26, %v2376_v38  ;;  %v6418_v59 = vsel %vm2409_vm11, %v2407_v58, %v2405_v3 }
 0xaf2   : > { %v2399_v35 = vmul.f32 %v2395_v31, %v2393_v32  ;;  %v2424_v52 = vsel %vm7051_vm13, %v6418_v59, 0.0  ;;  %v6429_v16 = vsel %vm2440_vm0, %v2438_v14, %v2436_v22  ;;  %v2463_v26 = vadd.f32 %v6230_v23, %v2432_v10 }
 0xaf3   : > { %v2372_v56 = vadd.f32 %v2368_v40, %v2341_v30  ;;  %v2455_v15 = vsel %vm2446_vm14, %v6429_v16, 0.0  ;;  %v6439_v31 = vsel %vm2471_vm8, %v2469_v0, %v2467_v61  ;;  %vm7109_vm13 = vcmp.ge.s32.totalorder %v6139_v13, 7 }
 0xaf4   : > { %v2527_v38 = vsel %vm7109_vm13, %v6346_v11, 0.0  ;;  %v6448_v23 = vsel %vm2409_vm11, %v2405_v3, %v2407_v58  ;;  %v6454_v54 = vsel %vm2440_vm0, %v2436_v22, %v2438_v14  ;;  %v2486_v28 = vsel %vm2477_vm12, %v6439_v31, 0.0 }
 0xaf5   : > { %v2494_v63 = vadd.f32 %v6270_v25, %v2463_v26  ;;  %v2403_v43 = vadd.f32 %v2399_v35, %v2372_v56  ;;  %v2430_v21 = vmul.f32 %v2426_v44, %v2424_v52  ;;  %v6466_v3 = vsel %vm2471_vm8, %v2467_v61, %v2469_v0  ;;  %v6510_v52 = vld [vmem:[#allocation14 + $0x20] sm:$0xff] }
 0xaf6   : > { %v2549_v22 = vsel %vm2541_vm9, %v6362_v53, 0.0  ;;  %v2461_v18 = vmul.f32 %v2457_v47, %v2455_v15  ;;  %v2533_v25 = vmul.f32 %v2531_v49, %v2527_v38  ;;  %vm7110_vm13 = vcmp.ge.s32.totalorder %v6139_v13, 5 }
 0xaf7   : > { %v2515_v7 = vadd.f32 %v6250_v17, %v2494_v63  ;;  %v2571_v44 = vsel %vm7110_vm13, %v6366_v62, 0.0  ;;  %v2434_v60 = vadd.f32 %v2430_v21, %v2403_v43  ;;  %v2492_v61 = vmul.f32 %v2488_v36, %v2486_v28 }
 0xaf8   : > { %v2535_v32 = vmul.f32 %v2531_v49, %v6373_v55  ;;  %v2593_v47 = vsel %vm2585_vm4, %v6388_v2, 0.0  ;;  %v2555_v58 = vmul.f32 %v2553_v50, %v2549_v22  ;;  %v2557_v14 = vmul.f32 %v2553_v50, %v6399_v51 }
 0xaf9   : > { %v2537_v17 = vadd.f32 %v2533_v25, %v2515_v7  ;;  %v2615_v4 = vsel %vm2607_vm1, %v6418_v59, 0.0  ;;  %v2465_v36 = vadd.f32 %v2461_v18, %v2434_v60  ;;  %v2577_v49 = vmul.f32 %v2575_v37, %v2571_v44 }
 0xafa   : > { %v2579_v10 = vmul.f32 %v2575_v37, %v6403_v29  ;;  %v2637_v0 = vsel %vm7053_vm15, %v6429_v16, 0.0  ;;  %v2599_v50 = vmul.f32 %v2597_v34, %v2593_v47  ;;  %v2601_v40 = vmul.f32 %v2597_v34, %v6412_v46 }
 0xafb   : > { %v2559_v30 = vadd.f32 %v2555_v58, %v2537_v17  ;;  %v2621_v35 = vmul.f32 %v2619_v57, %v2615_v4  ;;  %v2496_v26 = vadd.f32 %v2492_v61, %v2465_v36  ;;  %v2623_v37 = vmul.f32 %v2619_v57, %v6448_v23 }
 0xafc   : > { %v2659_v56 = vsel %vm7052_vm6, %v6439_v31, 0.0  ;;  %vm7056_vm13 = vcmp.lt.s32.totalorder %v6352_v45, 16  ;;  %v2643_v34 = vmul.f32 %v2641_v48, %v2637_v0  ;;  %v2685_v38 = vperm.slane %v6510_v52, 0 }
 0xafd   : > { %v2581_v15 = vadd.f32 %v2577_v49, %v2559_v30  ;;  %v6523_v28 = vadd.s32 2, %v6164_v39  ;;  %v2517_v63 = vadd.f32 %v6326_v24, %v2496_v26  ;;  %v2645_v57 = vmul.f32 %v2641_v48, %v6454_v54 }
 0xafe   : > { %v2683_v43 = vsel %vm7056_vm13, %v6346_v11, 0.0  ;;  %v6533_v21 = vadd.s32 3, %v6164_v39  ;;  %v2665_v18 = vmul.f32 %v2663_v41, %v2659_v56  ;;  %v2667_v7 = vmul.f32 %v2663_v41, %v6466_v3 }
 0xaff   : > { %v2603_v22 = vadd.f32 %v2599_v50, %v2581_v15  ;;  %vm7055_vm6 = vcmp.lt.s32.totalorder %v6523_v28, 16  ;;  %v2539_v24 = vadd.f32 %v2535_v32, %v2517_v63  ;;  %v2707_v48 = vperm.slane %v6510_v52, 1 }
 0xb00   : > { %vm7054_vm15 = vcmp.lt.s32.totalorder %v6533_v21, 16  ;;  %v2729_v25 = vperm.slane %v6510_v52, 2  ;;  %v2687_v60 = vmul.f32 %v2685_v38, %v6373_v55  ;;  %v2689_v61 = vmul.f32 %v2685_v38, %v2683_v43  ;;  %v6576_v38 = vld [vmem:[#allocation14 + $0x30] sm:$0x7f] }
 0xb01   : > { %v2625_v44 = vadd.f32 %v2621_v35, %v2603_v22  ;;  %v2705_v47 = vsel %vm7055_vm6, %v6362_v53, 0.0  ;;  %v2561_v17 = vadd.f32 %v2557_v14, %v2539_v24  ;;  %v2727_v42 = vsel %vm7054_vm15, %v6366_v62, 0.0 }
 0xb02   : > { %v6552_v41 = vadd.s32 4, %v6164_v39  ;;  %v2751_v32 = vperm.slane %v6510_v52, 3  ;;  %v6556_v4 = vadd.s32 5, %v6164_v39  ;;  %v2773_v55 = vperm.slane %v6510_v52, 4 }
 0xb03   : > { %v2647_v58 = vadd.f32 %v2643_v34, %v2625_v44  ;;  %v6560_v36 = vadd.s32 6, %v6164_v39  ;;  %v2583_v49 = vadd.f32 %v2579_v10, %v2561_v17  ;;  %v2709_v14 = vmul.f32 %v2707_v48, %v6399_v51 }
 0xb04   : > { %v2711_v0 = vmul.f32 %v2707_v48, %v2705_v47  ;;  %vm7059_vm15 = vcmp.lt.s32.totalorder %v6552_v41, 16  ;;  %v2731_v50 = vmul.f32 %v2729_v25, %v6403_v29  ;;  %v2733_v35 = vmul.f32 %v2729_v25, %v2727_v42 }
 0xb05   : > { %v2669_v30 = vadd.f32 %v2665_v18, %v2647_v58  ;;  %vm7057_vm6 = vcmp.lt.s32.totalorder %v6556_v4, 16  ;;  %v2605_v26 = vadd.f32 %v2601_v40, %v2583_v49  ;;  %v2749_v56 = vsel %vm7059_vm15, %v6388_v2, 0.0 }
 0xb06   : > { %v2771_v10 = vsel %vm7057_vm6, %v6418_v59, 0.0  ;;  %vm7058_vm13 = vcmp.lt.s32.totalorder %v6560_v36, 16  ;;  %v2753_v15 = vmul.f32 %v2751_v32, %v6412_v46  ;;  %v2775_v34 = vmul.f32 %v2773_v55, %v6448_v23 }
 0xb07   : > { %v2691_v51 = vadd.f32 %v2687_v60, %v2669_v30  ;;  %v2795_v29 = vperm.slane %v6510_v52, 5  ;;  %v2627_v40 = vadd.f32 %v2623_v37, %v2605_v26  ;;  %v2793_v63 = vsel %vm7058_vm13, %v6429_v16, 0.0 }
 0xb08   : > { %v6582_v43 = vadd.s32 7, %v6164_v39  ;;  %v2817_v22 = vperm.slane %v6510_v52, 6  ;;  %v2755_v24 = vmul.f32 %v2751_v32, %v2749_v56  ;;  %v2777_v48 = vmul.f32 %v2773_v55, %v2771_v10 }
 0xb09   : > { %v2713_v18 = vadd.f32 %v2709_v14, %v2691_v51  ;;  %v6586_v46 = vadd.s32 9, %v6139_v13  ;;  %v2649_v23 = vadd.f32 %v2645_v57, %v2627_v40  ;;  %v2839_v37 = vperm.slane %v6510_v52, 7 }
 0xb0a   : > { %vm7062_vm6 = vcmp.lt.s32.totalorder %v6582_v43, 16  ;;  %v6591_v25 = vadd.s32 10, %v6139_v13  ;;  %v2797_v60 = vmul.f32 %v2795_v29, %v6454_v54  ;;  %v2799_v47 = vmul.f32 %v2795_v29, %v2793_v63 }
 0xb0b   : > { %v2735_v44 = vadd.f32 %v2731_v50, %v2713_v18  ;;  %v2861_v17 = vperm.slane %v6576_v38, 0  ;;  %v2671_v42 = vadd.f32 %v2667_v7, %v2649_v23  ;;  %v2815_v32 = vsel %vm7062_vm6, %v6439_v31, 0.0 }
 0xb0c   : > { %v2819_v57 = vmul.f32 %v2817_v22, %v6466_v3  ;;  %vm7060_vm13 = vcmp.lt.s32.totalorder %v6586_v46, 16  ;;  %vm7061_vm15 = vcmp.lt.s32.totalorder %v6591_v25, 16  ;;  %v2883_v54 = vperm.slane %v6576_v38, 1 }
 0xb0d   : > { %v2757_v58 = vadd.f32 %v2753_v15, %v2735_v44  ;;  %v2857_v52 = vsel %vm7060_vm13, %v6346_v11, 0.0  ;;  %v2693_v55 = vadd.f32 %v2689_v61, %v2671_v42  ;;  %v2841_v7 = vmul.f32 %v2839_v37, %v6303_v33 }
 0xb0e   : > { %v2879_v49 = vsel %vm7061_vm15, %v6362_v53, 0.0  ;;  %v6610_v3 = vadd.s32 11, %v6139_v13  ;;  %v2821_v30 = vmul.f32 %v2817_v22, %v2815_v32  ;;  %v2843_v50 = vmul.f32 0.0, %v2839_v37 }
 0xb0f   : > { %v2779_v14 = vadd.f32 %v2775_v34, %v2757_v58  ;;  %v2865_v26 = vmul.f32 0.0, %v2861_v17  ;;  %v2715_v56 = vadd.f32 %v2711_v0, %v2693_v55  ;;  %v2863_v11 = vmul.f32 %v2861_v17, %v2857_v52 }
 0xb10   : > { %vm2897_vm13 = vcmp.lt.s32.totalorder %v6610_v3, 16  ;;  %v6614_v10 = vadd.s32 12, %v6139_v13  ;;  %v2885_v33 = vmul.f32 %v2883_v54, %v2879_v49  ;;  %v2905_v51 = vperm.slane %v6576_v38, 2 }
 0xb11   : > { %v2801_v61 = vadd.f32 %v2797_v60, %v2779_v14  ;;  %v6618_v53 = vadd.s32 13, %v6139_v13  ;;  %v2737_v15 = vadd.f32 %v2733_v35, %v2715_v56  ;;  %v2901_v34 = vsel %vm2897_vm13, %v6366_v62, 0.0 }
 0xb12   : > { %vm7063_vm15 = vcmp.lt.s32.totalorder %v6614_v10, 16  ;;  %v2927_v0 = vperm.slane %v6576_v38, 3  ;;  %v2949_v63 = vperm.slane %v6576_v38, 4  ;;  %v2887_v18 = vmul.f32 0.0, %v2883_v54 }
 0xb13   : > { %v2823_v29 = vadd.f32 %v2819_v57, %v2801_v61  ;;  %v2923_v40 = vsel %vm7063_vm15, %v6388_v2, 0.0  ;;  %vm7064_vm6 = vcmp.lt.s32.totalorder %v6618_v53, 16  ;;  %v2759_v22 = vadd.f32 %v2755_v24, %v2737_v15 }
 0xb14   : > { %v2945_v35 = vsel %vm7064_vm6, %v6418_v59, 0.0  ;;  %v6634_v62 = vadd.s32 14, %v6139_v13  ;;  %v2907_v37 = vmul.f32 %v2905_v51, %v2901_v34  ;;  %v2909_v44 = vmul.f32 0.0, %v2905_v51 }
 0xb15   : > { %v2845_v23 = vadd.f32 %v2841_v7, %v2823_v29  ;;  %v2931_v60 = vmul.f32 0.0, %v2927_v0  ;;  %v2781_v17 = vadd.f32 %v2777_v48, %v2759_v22  ;;  %v2929_v42 = vmul.f32 %v2927_v0, %v2923_v40  ;;  %v6649_v7 = vld [vmem:[#allocation14 + $0x8] sm:$0xff] }
 0xb16   : > { %vm7066_vm15 = vcmp.lt.s32.totalorder %v6634_v62, 16  ;;  %v6638_v2 = vadd.s32 15, %v6139_v13  ;;  %v2951_v32 = vmul.f32 %v2949_v63, %v2945_v35  ;;  %v2971_v57 = vperm.slane %v6576_v38, 5 }
 0xb17   : > { %v2867_v24 = vadd.f32 %v2863_v11, %v2845_v23  ;;  %v2993_v59 = vperm.slane %v6576_v38, 6  ;;  %v2803_v58 = vadd.f32 %v2799_v47, %v2781_v17  ;;  %v2953_v52 = vmul.f32 0.0, %v2949_v63 }
 0xb18   : > { %v2967_v54 = vsel %vm7066_vm15, %v6429_v16, 0.0  ;;  %vm7065_vm6 = vcmp.lt.s32.totalorder %v6638_v2, 16  ;;  %v2269_v49 = vmul.f32 %v2265_v20, %v6355_v1  ;;  %v2274_v38 = vperm.slane %v6136_v6, 1 }
 0xb19   : > { %v2889_v48 = vadd.f32 %v2885_v33, %v2867_v24  ;;  %v2989_v55 = vsel %vm7065_vm6, %v6439_v31, 0.0  ;;  %v2825_v47 = vadd.f32 %v2821_v30, %v2803_v58  ;;  %v2282_v14 = vrot.slane %v6256_v19, 1 }
 0xb1a   : > { %v2284_v16 = vrot.slane %v6355_v1, 1  ;;  %v2303_v56 = vperm.slane %v6649_v7, 0  ;;  %v2973_v61 = vmul.f32 %v2971_v57, %v2967_v54  ;;  %v2995_v33 = vmul.f32 %v2993_v59, %v2989_v55 }
 0xb1b   : > { %v2911_v11 = vadd.f32 %v2907_v37, %v2889_v48  ;;  %v2278_v31 = vadd.f32 %v2274_v38, %v6291_v9  ;;  %v2847_v51 = vadd.f32 %v2843_v50, %v2825_v47  ;;  %vm7111_vm6 = vcmp.lt.s32.totalorder %v6139_v13, 7 }
 0xb1c   : > { %v6665_v6 = vsel %vm7111_vm6, %v2284_v16, %v2282_v14  ;;  %v2305_v20 = vmul.f32 0.0, %v2303_v56  ;;  %v2313_v30 = vrot.slane %v6256_v19, 2  ;;  %vm7112_vm15 = vcmp.ge.s32.totalorder %v6164_v39, 15 }
 0xb1d   : > { %v2933_v15 = vadd.f32 %v2929_v42, %v2911_v11  ;;  %v2301_v34 = vsel %vm7112_vm15, %v6665_v6, 0.0  ;;  %v2315_v0 = vrot.slane %v6355_v1, 2  ;;  %v2334_v9 = vperm.slane %v6649_v7, 1 }
 0xb1e   : > { %v2869_v50 = vadd.f32 %v2865_v26, %v2847_v51  ;;  %v2280_v29 = vadd.f32 %v2274_v38, %v2269_v49  ;;  %v2307_v40 = vmul.f32 %v2303_v56, %v2301_v34  ;;  %v2309_v63 = vadd.f32 %v2305_v20, %v2278_v31 }
 0xb1f   : > { %v2955_v22 = vadd.f32 %v2951_v32, %v2933_v15  ;;  %v6675_v35 = vsel %vm2316_vm2, %v2315_v0, %v2313_v30  ;;  %v2336_v23 = vmul.f32 0.0, %v2334_v9  ;;  %v2344_v37 = vrot.slane %v6256_v19, 3 }
 0xb20   : > { %v2891_v17 = vadd.f32 %v2887_v18, %v2869_v50  ;;  %v2311_v42 = vadd.f32 %v2307_v40, %v2280_v29  ;;  %v2332_v24 = vsel %vm2322_vm5, %v6675_v35, 0.0  ;;  %v2346_v58 = vrot.slane %v6355_v1, 3 }
 0xb21   : > { %v2977_v26 = vadd.f32 %v2973_v61, %v2955_v22  ;;  %v2338_v54 = vmul.f32 %v2334_v9, %v2332_v24  ;;  %v2340_v48 = vadd.f32 %v2336_v23, %v2309_v63  ;;  %v2365_v32 = vperm.slane %v6649_v7, 2 }
 0xb22   : > { %v2913_v55 = vadd.f32 %v2909_v44, %v2891_v17  ;;  %v2975_v49 = vmul.f32 0.0, %v2971_v57  ;;  %v6685_v38 = vsel %vm2347_vm3, %v2346_v58, %v2344_v37  ;;  %v2375_v18 = vrot.slane %v6256_v19, 4 }
 0xb23   : > { %v6688_v47 = vadd.f32 %v2995_v33, %v2977_v26  ;;  %v2342_v56 = vadd.f32 %v2338_v54, %v2311_v42  ;;  %vm7113_vm15 = vcmp.ge.s32.totalorder %v6164_v39, 13  ;;  %v2367_v61 = vmul.f32 0.0, %v2365_v32 }
 0xb24   : > { %v2363_v11 = vsel %vm7113_vm15, %v6685_v38, 0.0  ;;  %v2935_v31 = vadd.f32 %v2931_v60, %v2913_v55  ;;  %v2377_v20 = vrot.slane %v6355_v1, 4  ;;  %v2396_v44 = vperm.slane %v6649_v7, 3 }
 0xb25   : > { %v2369_v51 = vmul.f32 %v2365_v32, %v2363_v11  ;;  %v2997_v57 = vmul.f32 0.0, %v2993_v59  ;;  %v4581_v15 = vmul.f32 -1.442695, %v6688_v47  ;;  %v2371_v34 = vadd.f32 %v2367_v61, %v2340_v48 }
 0xb26   : > { %v2408_v9 = vrot.slane %v6355_v1, 5  ;;  %v2957_v33 = vadd.f32 %v2953_v52, %v2935_v31  ;;  %v6699_v29 = vsel %vm2378_vm7, %v2377_v20, %v2375_v18  ;;  %v2406_v40 = vrot.slane %v6256_v19, 5 }
 0xb27   : > { %v2373_v50 = vadd.f32 %v2369_v51, %v2342_v56  ;;  %5190 = vpow2.f32 %v4581_v15  ;;  %v2394_v60 = vsel %vm2384_vm10, %v6699_v29, 0.0  ;;  %v2398_v63 = vmul.f32 0.0, %v2396_v44 }
 0xb28   : > { %v2979_v59 = vadd.f32 %v2975_v49, %v2957_v33  ;;  %v2400_v22 = vmul.f32 %v2396_v44, %v2394_v60  ;;  %v6707_v23 = vsel %vm2409_vm11, %v2408_v9, %v2406_v40  ;;  %v2427_v52 = vperm.slane %v6649_v7, 4 }
 0xb29   : > { %v2402_v17 = vadd.f32 %v2398_v63, %v2371_v34  ;;  %vm7114_vm5 = vcmp.ge.s32.totalorder %v6164_v39, 11  ;;  %v2437_v24 = vrot.slane %v6256_v19, 6  ;;  %v2439_v26 = vrot.slane %v6355_v1, 6 }
 0xb2a   : > { %v2425_v42 = vsel %vm7114_vm5, %v6707_v23, 0.0  ;;  %v6715_v54 = vadd.f32 %v2997_v57, %v2979_v59  ;;  %v2404_v48 = vadd.f32 %v2400_v22, %v2373_v50  ;;  %v2429_v32 = vmul.f32 0.0, %v2427_v52 }
 0xb2b   : > { %v2431_v55 = vmul.f32 %v2427_v52, %v2425_v42  ;;  %v6723_v49 = vsel %vm7111_vm6, %v2282_v14, %v2284_v16  ;;  %v6727_v56 = vsel %vm2316_vm2, %v2313_v30, %v2315_v0  ;;  %v6731_v11 = vsel %vm2440_vm0, %v2439_v26, %v2437_v24 }
 0xb2c   : > { %v2458_v61 = vperm.slane %v6649_v7, 5  ;;  %v4583_v31 = vmul.f32 -1.442695, %v6715_v54  ;;  %v2433_v51 = vadd.f32 %v2429_v32, %v2402_v17  ;;  %v2456_v57 = vsel %vm2446_vm14, %v6731_v11, 0.0 }
 0xb2d   : > { %v2435_v44 = vadd.f32 %v2431_v55, %v2404_v48  ;;  %v5191_v14 = vpop.eup %5190  ;;  %v6740_v16 = vsel %vm2347_vm3, %v2344_v37, %v2346_v58  ;;  %v2468_v0 = vrot.slane %v6256_v19, 7  ;;  %v2470_v15 = vrot.slane %v6355_v1, 7 }
 0xb2e   : > { %v2460_v30 = vmul.f32 0.0, %v2458_v61  ;;  %5192 = vpow2.f32 %v4583_v31  ;;  %v6744_v34 = vadd.f32 1.0, %v5191_v14  ;;  %v2462_v33 = vmul.f32 %v2458_v61, %v2456_v57 }
 0xb2f   : > { %v2489_v50 = vperm.slane %v6649_v7, 6  ;;  %v6749_v60 = vsel %vm2378_vm7, %v2375_v18, %v2377_v20  ;;  %v6753_v37 = vsel %vm2471_vm8, %v2470_v15, %v2468_v0  ;;  %v2510_v58 = vperm.slane %v6649_v7, 7 }
 0xb30   : > { %v2464_v63 = vadd.f32 %v2460_v30, %v2433_v51  ;;  %5194 = vrcp.f32 %v6744_v34  ;;  %v6759_v59 = vsel %vm2409_vm11, %v2406_v40, %v2408_v9  ;;  %v6763_v22 = vsel %vm2440_vm0, %v2437_v24, %v2439_v26 }
 0xb31   : > { %v2466_v52 = vadd.f32 %v2462_v33, %v2435_v44  ;;  %v3030_v18 = vand.u32 2147483648, %v6744_v34  ;;  %v2487_v20 = vsel %vm2477_vm12, %v6753_v37, 0.0  ;;  %v2491_v17 = vmul.f32 0.0, %v2489_v50 }
 0xb32   : > { %v2512_v42 = vmul.f32 0.0, %v2510_v58  ;;  %v6771_v7 = vsel %vm2471_vm8, %v2468_v0, %v2470_v15  ;;  %v2493_v48 = vmul.f32 %v2489_v50, %v2487_v20  ;;  %vm7115_vm2 = vcmp.ge.s32.totalorder %v6139_v13, 7 }
 0xb33   : > { %v2528_v9 = vsel %vm7115_vm2, %v6665_v6, 0.0  ;;  %v2532_v40 = vperm.slane %v6134_v5, 0  ;;  %v3028_v24 = vand.u32 2147483647, %v6744_v34  ;;  %v2495_v26 = vadd.f32 %v2491_v17, %v2464_v63 }
 0xb34   : > { %v2550_v39 = vsel %vm2541_vm9, %v6675_v35, 0.0  ;;  %v2554_v32 = vperm.slane %v6134_v5, 1  ;;  %v5193_v55 = vpop.eup %5192  ;;  %v2497_v61 = vadd.f32 %v2493_v48, %v2466_v52  ;;  %v2514_v31 = vmul.f32 %v2510_v58, %v6256_v19 }
 0xb35   : > { %vm7116_vm3 = vcmp.ge.s32.totalorder %v6139_v13, 5  ;;  %v2576_v44 = vperm.slane %v6134_v5, 2  ;;  %v6787_v57 = vadd.f32 1.0, %v5193_v55  ;;  %vm3024_vm7 = vweird.f32 %v6744_v34 }
 0xb36   : > { %v2572_v51 = vsel %vm7116_vm3, %v6685_v38, 0.0  ;;  %v3031_v14 = vor.u32 1.1754944e-38, %v3030_v18  ;;  %v2516_v30 = vadd.f32 %v2512_v42, %v2495_v26  ;;  %v5195_v0 = vpop.eup %5194  ;;  %v2518_v15 = vadd.f32 %v2514_v31, %v2497_v61 }
 0xb37   : > { %v2534_v33 = vmul.f32 %v2532_v40, %v2528_v9  ;;  %v2536_v50 = vmul.f32 %v2532_v40, %v6723_v49  ;;  %v2556_v63 = vmul.f32 %v2554_v32, %v2550_v39  ;;  %v3020_v19 = vmul.f32 %v5195_v0, %v6744_v34 }
 0xb38   : > { %5196 = vrcp.f32 %v6787_v57  ;;  %v2558_v58 = vmul.f32 %v2554_v32, %v6727_v56  ;;  %v2578_v52 = vmul.f32 %v2576_v44, %v2572_v51  ;;  %vm6794_vm10 = vcmp.eq.f32.partialorder %v3028_v24, 8.507059e+37 }
 0xb39   : > { %v2538_v17 = vadd.f32 %v2534_v33, %v2516_v30  ;;  %v2540_v18 = vadd.f32 %v2536_v50, %v2518_v15  ;;  %v2580_v42 = vmul.f32 %v2576_v44, %v6740_v16  ;;  %v2594_v48 = vsel %vm2585_vm4, %v6699_v29, 0.0 }
 0xb3a   : > { %v3021_v9 = vsub.f32 1.0, %v3020_v19  ;;  %v2598_v40 = vperm.slane %v6134_v5, 3  ;;  %v2616_v26 = vsel %vm2607_vm1, %v6707_v23, 0.0  ;;  %v2620_v24 = vperm.slane %v6134_v5, 4 }
 0xb3b   : > { %vm3025_vm11 = vweird.f32 %v5195_v0  ;;  %v3058_v39 = vand.u32 2147483647, %v6787_v57  ;;  %v2560_v32 = vadd.f32 %v2556_v63, %v2538_v17  ;;  %v2562_v55 = vadd.f32 %v2558_v58, %v2540_v18 }
 0xb3c   : > { %v3022_v61 = vmul.f32 %v5195_v0, %v3021_v9  ;;  %v3060_v31 = vand.u32 2147483648, %v6787_v57  ;;  %v2600_v51 = vmul.f32 %v2598_v40, %v2594_v48  ;;  %v2602_v44 = vmul.f32 %v2598_v40, %v6749_v60  ;;  %vm3026_vm14 = vmor %vm3024_vm7, %vm3025_vm11 }
 0xb3d   : > { %vm3054_vm0 = vweird.f32 %v6787_v57  ;;  %v2582_v30 = vadd.f32 %v2578_v52, %v2560_v32  ;;  %v2584_v15 = vadd.f32 %v2580_v42, %v2562_v55  ;;  %v2622_v33 = vmul.f32 %v2620_v24, %v2616_v26 }
 0xb3e   : > { %vm7119_vm1 = vcmp.ge.s32.totalorder %v6139_v13, 2  ;;  %v5197_v19 = vpop.eup %5196  ;;  %v3023_v8 = vadd.f32 %v5195_v0, %v3022_v61  ;;  %v2624_v63 = vmul.f32 %v2620_v24, %v6759_v59  ;;  %v2642_v58 = vperm.slane %v6134_v5, 5  ;;  %v6828_v24 = vld [vmem:[#allocation14 + $0x28] sm:$0xff] }
 0xb3f   : > { %v2638_v50 = vsel %vm7119_vm1, %v6731_v11, 0.0  ;;  %v2664_v17 = vperm.slane %v6134_v5, 6  ;;  %v3050_v52 = vmul.f32 %v5197_v19, %v6787_v57  ;;  %v2604_v18 = vadd.f32 %v2600_v51, %v2582_v30 }
 0xb40   : > { %v2606_v42 = vadd.f32 %v2602_v44, %v2584_v15  ;;  %vm7120_vm8 = vcmp.ge.s32.totalorder %v6139_v13, 1  ;;  %v3027_v9 = vsel %vm3026_vm14, %v5195_v0, %v3023_v8  ;;  %vm3055_vm9 = vweird.f32 %v5197_v19 }
 0xb41   : > { %v2660_v48 = vsel %vm7120_vm8, %v6753_v37, 0.0  ;;  %vm6824_vm12 = vcmp.eq.f32.partialorder %v3058_v39, 8.507059e+37  ;;  %v2644_v26 = vmul.f32 %v2642_v58, %v2638_v50  ;;  %v3051_v5 = vsub.f32 1.0, %v3050_v52  ;;  %vm3056_vm5 = vmor %vm3054_vm0, %vm3055_vm9 }
 0xb42   : > { %v2626_v34 = vadd.f32 %v2622_v33, %v2604_v18  ;;  %v2628_v32 = vadd.f32 %v2624_v63, %v2606_v42  ;;  %v2646_v55 = vmul.f32 %v2642_v58, %v6763_v22  ;;  %v3032_v61 = vsel %vm6794_vm10, %v3031_v14, %v3027_v9 }
 0xb43   : > { %v2666_v51 = vmul.f32 %v2664_v17, %v2660_v48  ;;  %vm7123_vm4 = vcmp.lt.s32.totalorder %v6352_v45, 16  ;;  %v2686_v13 = vperm.slane %v6828_v24, 0  ;;  %v3052_v0 = vmul.f32 %v5197_v19, %v3051_v5 }
 0xb44   : > { %v2684_v8 = vsel %vm7123_vm4, %v6665_v6, 0.0  ;;  %v2648_v39 = vadd.f32 %v2644_v26, %v2626_v34  ;;  %v2650_v44 = vadd.f32 %v2646_v55, %v2628_v32  ;;  %v2668_v30 = vmul.f32 %v2664_v17, %v6771_v7 }
 0xb45   : > { %v2688_v15 = vmul.f32 %v2686_v13, %v6723_v49  ;;  %v2690_v33 = vmul.f32 %v2686_v13, %v2684_v8  ;;  %vm7124_vm15 = vcmp.lt.s32.totalorder %v6523_v28, 16  ;;  %v2708_v14 = vperm.slane %v6828_v24, 1 }
 0xb46   : > { %v2706_v20 = vsel %vm7124_vm15, %v6675_v35, 0.0  ;;  %v3053_v50 = vadd.f32 %v5197_v19, %v3052_v0  ;;  %v2670_v63 = vadd.f32 %v2666_v51, %v2648_v39  ;;  %v2672_v45 = vadd.f32 %v2668_v30, %v2650_v44 }
 0xb47   : > { %v2730_v58 = vperm.slane %v6828_v24, 2  ;;  %v3061_v52 = vor.u32 1.1754944e-38, %v3060_v31  ;;  %v2710_v17 = vmul.f32 %v2708_v14, %v6727_v56  ;;  %vm7125_vm6 = vcmp.lt.s32.totalorder %v6533_v21, 16 }
 0xb48   : > { %v2728_v49 = vsel %vm7125_vm6, %v6685_v38, 0.0  ;;  %v2752_v28 = vperm.slane %v6828_v24, 3  ;;  %v3057_v18 = vsel %vm3056_vm5, %v5197_v19, %v3053_v50  ;;  %v2692_v42 = vadd.f32 %v2688_v15, %v2670_v63 }
 0xb49   : > { %v2694_v48 = vadd.f32 %v2690_v33, %v2672_v45  ;;  %v2712_v9 = vmul.f32 %v2708_v14, %v2706_v20  ;;  %v3062_v26 = vsel %vm6824_vm12, %v3061_v52, %v3057_v18  ;;  %v3079_v5 = vmul.f32 %v3032_v61, %v6688_v47 }
 0xb4a   : > { %v2732_v57 = vmul.f32 %v2730_v58, %v6740_v16  ;;  %vm7126_vm2 = vcmp.lt.s32.totalorder %v6552_v41, 16  ;;  %v3081_v21 = vmul.f32 %v3062_v26, %v6715_v54  ;;  %v2714_v31 = vadd.f32 %v2710_v17, %v2692_v42 }
 0xb4b   : > { %v2750_v56 = vsel %vm7126_vm2, %v6699_v29, 0.0  ;;  %v2716_v34 = vadd.f32 %v2712_v9, %v2694_v48  ;;  %v2734_v32 = vmul.f32 %v2730_v58, %v2728_v49  ;;  %v2754_v19 = vmul.f32 %v2752_v28, %v6749_v60 }
 0xb4c   : > { %vm7127_vm3 = vcmp.lt.s32.totalorder %v6556_v4, 16  ;;  %v2774_v55 = vperm.slane %v6828_v24, 4  ;;  %v2796_v47 = vperm.slane %v6828_v24, 5  ;;  %v3083_v16 = vpack.c.bf16 %v3081_v21, %v3079_v5  ;;  %v2260_v4 = vld [vmem:[#allocation14 + $0x38] sm:$0x7f] }
 0xb4d   : > { %v2772_v40 = vsel %vm7127_vm3, %v6707_v23, 0.0  ;;  %v2736_v61 = vadd.f32 %v2732_v57, %v2714_v31  ;;  %v2738_v51 = vadd.f32 %v2734_v32, %v2716_v34  ;;  %v2756_v41 = vmul.f32 %v2752_v28, %v2750_v56 }
 0xb4e   : > { %vm7128_vm7 = vcmp.lt.s32.totalorder %v6560_v36, 16  ;;  %vm7129_vm10 = vcmp.lt.s32.totalorder %v6582_v43, 16  ;;  %v2818_v8 = vperm.slane %v6828_v24, 6  ;;  %3222 = vmatmul.bf16.vlgmr.msrb.gmra.mxu2 %v3083_v16  ;;  %v2776_v39 = vmul.f32 %v2774_v55, %v6759_v59 }
 0xb4f   : > { %v2794_v54 = vsel %vm7128_vm7, %v6731_v11, 0.0  ;;  %v2816_v60 = vsel %vm7129_vm10, %v6753_v37, 0.0  ;;  %v2758_v13 = vadd.f32 %v2754_v19, %v2736_v61  ;;  %v2760_v0 = vadd.f32 %v2756_v41, %v2738_v51 }
 0xb50   : > { %v2778_v44 = vmul.f32 %v2774_v55, %v2772_v40  ;;  %v2798_v30 = vmul.f32 %v2796_v47, %v6763_v22  ;;  %v2800_v20 = vmul.f32 %v2796_v47, %v2794_v54  ;;  %v2840_v36 = vperm.slane %v6828_v24, 7 }
 0xb51   : > { %v2780_v15 = vadd.f32 %v2776_v39, %v2758_v13  ;;  %v2820_v14 = vmul.f32 %v2818_v8, %v6771_v7  ;;  %v2822_v43 = vmul.f32 %v2818_v8, %v2816_v60  ;;  %v2862_v50 = vperm.slane %v2260_v4, 0 }
 0xb52   : > { %v2782_v33 = vadd.f32 %v2778_v44, %v2760_v0  ;;  %v2844_v58 = vmul.f32 0.0, %v2840_v36  ;;  %vm7130_vm11 = vcmp.lt.s32.totalorder %v6586_v46, 16  ;;  %vm7131_vm0 = vcmp.lt.s32.totalorder %v6591_v25, 16 }
 0xb53   : > { %v2802_v63 = vadd.f32 %v2798_v30, %v2780_v15  ;;  %v2858_v52 = vsel %vm7130_vm11, %v6665_v6, 0.0  ;;  %v2880_v59 = vsel %vm7131_vm0, %v6675_v35, 0.0  ;;  %v2884_v22 = vperm.slane %v2260_v4, 1 }
 0xb54   : > { %v2804_v45 = vadd.f32 %v2800_v20, %v2782_v33  ;;  %v2842_v24 = vmul.f32 %v2840_v36, %v6355_v1  ;;  %v2866_v28 = vmul.f32 0.0, %v2862_v50  ;;  %v2864_v7 = vmul.f32 %v2862_v50, %v2858_v52 }
 0xb55   : > { %v2824_v17 = vadd.f32 %v2820_v14, %v2802_v63  ;;  %v2888_v48 = vmul.f32 0.0, %v2884_v22  ;;  %v2906_v9 = vperm.slane %v2260_v4, 2  ;;  %v2886_v26 = vmul.f32 %v2884_v22, %v2880_v59 }
 0xb56   : > { %v2826_v49 = vadd.f32 %v2822_v43, %v2804_v45  ;;  %v2902_v46 = vsel %vm2897_vm13, %v6685_v38, 0.0  ;;  %v2928_v6 = vperm.slane %v2260_v4, 3  ;;  %vm7132_vm1 = vcmp.lt.s32.totalorder %v6614_v10, 16 }
 0xb57   : > { %v2846_v18 = vadd.f32 %v2842_v24, %v2824_v17  ;;  %v2910_v35 = vmul.f32 0.0, %v2906_v9  ;;  %v2924_v57 = vsel %vm7132_vm1, %v6699_v29, 0.0  ;;  %vm7133_vm14 = vcmp.lt.s32.totalorder %v6618_v53, 16 }
 0xb58   : > { %v2848_v42 = vadd.f32 %v2844_v58, %v2826_v49  ;;  %v2946_v1 = vsel %vm7133_vm14, %v6707_v23, 0.0  ;;  %v2950_v56 = vperm.slane %v2260_v4, 4  ;;  %v2908_v34 = vmul.f32 %v2906_v9, %v2902_v46 }
 0xb59   : > { %v2868_v5 = vadd.f32 %v2864_v7, %v2846_v18  ;;  %v2932_v32 = vmul.f32 0.0, %v2928_v6  ;;  %v2930_v19 = vmul.f32 %v2928_v6, %v2924_v57  ;;  %v2972_v55 = vperm.slane %v2260_v4, 5  ;;  %v3117_v6 = vld [vmem:[#allocation5 + $0x26] ss:$0 sm:$0xff] }
 0xb5a   : > { %v2870_v25 = vadd.f32 %v2866_v28, %v2848_v42  ;;  %v2954_v40 = vmul.f32 0.0, %v2950_v56  ;;  %v2952_v47 = vmul.f32 %v2950_v56, %v2946_v1  ;;  %vm7134_vm13 = vcmp.lt.s32.totalorder %v6634_v62, 16 }
 0xb5b   : > { %v2890_v21 = vadd.f32 %v2886_v26, %v2868_v5  ;;  %v2968_v10 = vsel %vm7134_vm13, %v6731_v11, 0.0  ;;  %v2976_v61 = vmul.f32 0.0, %v2972_v55  ;;  %v2994_v53 = vperm.slane %v2260_v4, 6 }
 0xb5c   : > { %v2892_v31 = vadd.f32 %v2888_v48, %v2870_v25  ;;  %vm7135_vm8 = vcmp.lt.s32.totalorder %v6638_v2, 16  ;;  %v2974_v54 = vmul.f32 %v2972_v55, %v2968_v10  ;;  %v4707_v10 = vld [vmem:[#allocation17 + $0x70] sm:$0xf] }
 0xb5d   : > { %v2912_v3 = vadd.f32 %v2908_v34, %v2890_v21  ;;  %v2990_v23 = vsel %vm7135_vm8, %v6753_v37, 0.0  ;;  %v2998_v60 = vmul.f32 0.0, %v2994_v53 }
 0xb5e   : > { %v2914_v38 = vadd.f32 %v2910_v35, %v2892_v31  ;;  %v2996_v0 = vmul.f32 %v2994_v53, %v2990_v23  ;;  %v4709_v53 = vld [vmem:[#allocation17 + $0x78] sm:$0xf0] }
 0xb5f   : > { %v2934_v29 = vadd.f32 %v2930_v19, %v2912_v3  ;;  %v7136_v19 = vld [vmem:[#allocation28_spill] sm:$0xff] }
 0xb60   : > { %v2936_v16 = vadd.f32 %v2932_v32, %v2914_v38 }
 0xb61   : > { %v2956_v51 = vadd.f32 %v2952_v47, %v2934_v29  ;;  %v4942_v29 = vld [vmem:[#allocation17 + $0x74] sm:$0xf0] }
 0xb62   : > { %v2958_v41 = vadd.f32 %v2954_v40, %v2936_v16  ;;  %v4941_v16 = vld [vmem:[#allocation17 + $0x74] sm:$0xf] }
 0xb63   : > { %v2978_v8 = vadd.f32 %v2974_v54, %v2956_v51  ;;  %v4712_v23 = vor.u32 %v4941_v16, %v4709_v53  ;;  %v4699_v51 = vld [vmem:[#allocation17 + $0x60] sm:$0xf]  ;;  %v4939_v54 = vld [vmem:[#allocation17 + $0x64] sm:$0xf] }
 0xb64   : > { %v2980_v13 = vadd.f32 %v2976_v61, %v2958_v41  ;;  %v4708_v61 = vor.u32 %v4942_v29, %v4707_v10  ;;  %v4940_v41 = vld [vmem:[#allocation17 + $0x64] sm:$0xf0]  ;;  %v4653_v10 = vld [vmem:[#allocation17 + $0x8] sm:$0xf0] }
 0xb65   : > { %v3000_v39 = vadd.f32 %v2996_v0, %v2978_v8  ;;  %3408 = vmatpush.bf16.msrb.mxu1 %v4712_v23  ;;  %v4700_v8 = vor.u32 %v4940_v41, %v4699_v51  ;;  %v4691_v0 = vld [vmem:[#allocation17 + $0x50] sm:$0xf] }
 0xb66   : > { %v3002_v44 = vadd.f32 %v2998_v60, %v2980_v13  ;;  %3394 = vmatpush.bf16.msrb.mxu0 %v4708_v61  ;;  %v4701_v13 = vld [vmem:[#allocation17 + $0x68] sm:$0xf0] }
 0xb67   : > { %v4582_v30 = vmul.f32 -1.442695, %v3000_v39 }
 0xb68   : > { %v4584_v62 = vmul.f32 -1.442695, %v3002_v44 }
 0xb69   : > { %5198 = vpow2.f32 %v4582_v30  ;;  %v4704_v30 = vor.u32 %v4939_v54, %v4701_v13 }
 0xb6a   : > { %5200 = vpow2.f32 %v4584_v62  ;;  %v4937_v62 = vld [vmem:[#allocation17 + $0x54] sm:$0xf]  ;;  %3395 = vmatpush.bf16.msrb.mxu0 %v4700_v8 }
 0xb6b   : > { %3409 = vmatpush.bf16.msrb.mxu1 %v4704_v30 }
 0xb6f   : > { %v5199_v11 = vpop.eup %5198 }
 0xb70   : > { %v5201_v15 = vpop.eup %5200  ;;  %v3016_v4 = vadd.f32 1.0, %v5199_v11  ;;  %v4693_v11 = vld [vmem:[#allocation17 + $0x58] sm:$0xf0] }
 0xb71   : > { %v3018_v33 = vadd.f32 1.0, %v5201_v15 }
 0xb72   : > { %5202 = vrcp.f32 %v3016_v4  ;;  %v3045_v43 = vand.u32 2147483648, %v3016_v4  ;;  %v3043_v45 = vand.u32 2147483647, %v3016_v4  ;;  %vm3039_vm4 = vweird.f32 %v3016_v4 }
 0xb73   : > { %5204 = vrcp.f32 %v3018_v33  ;;  %v3075_v58 = vand.u32 2147483648, %v3018_v33  ;;  %v3073_v59 = vand.u32 2147483647, %v3018_v33  ;;  %vm3069_vm5 = vweird.f32 %v3018_v33 }
 0xb74   : > { %v3046_v17 = vor.u32 1.1754944e-38, %v3045_v43  ;;  %vm3044_vm6 = vcmp.eq.f32.partialorder %v3043_v45, 8.507059e+37 }
 0xb75   : > { %v3076_v28 = vor.u32 1.1754944e-38, %v3075_v58  ;;  %vm3074_vm3 = vcmp.eq.f32.partialorder %v3073_v59, 8.507059e+37  ;;  %v4933_v58 = vld [vmem:[#allocation17 + $0x34] sm:$0xf] }
 0xb78   : > { %v5203_v2 = vpop.eup %5202 }
 0xb79   : > { %v5205_v37 = vpop.eup %5204  ;;  %v3035_v20 = vmul.f32 %v5203_v2, %v3016_v4  ;;  %vm3040_vm9 = vweird.f32 %v5203_v2 }
 0xb7a   : > { %v3065_v36 = vmul.f32 %v5205_v37, %v3018_v33  ;;  %vm3070_vm12 = vweird.f32 %v5205_v37  ;;  %vm3041_vm15 = vmor %vm3039_vm4, %vm3040_vm9  ;;  %v4696_v33 = vor.u32 %v4937_v62, %v4693_v11 }
 0xb7b   : > { %v3036_v14 = vsub.f32 1.0, %v3035_v20  ;;  %vm3071_vm2 = vmor %vm3069_vm5, %vm3070_vm12  ;;  %v4935_v20 = vld [vmem:[#allocation17 + $0x44] sm:$0xf] }
 0xb7c   : > { %v3066_v50 = vsub.f32 1.0, %v3065_v36  ;;  %v4685_v36 = vld [vmem:[#allocation17 + $0x48] sm:$0xf0]  ;;  %3410 = vmatpush.bf16.msrb.mxu1 %v4696_v33 }
 0xb7d   : > { %v3037_v63 = vmul.f32 %v5203_v2, %v3036_v14  ;;  %v4688_v43 = vor.u32 %v4935_v20, %v4685_v36 }
 0xb7e   : > { %v3067_v52 = vmul.f32 %v5205_v37, %v3066_v50  ;;  %v4675_v50 = vld [vmem:[#allocation17 + $0x30] sm:$0xf] }
 0xb7f   : > { %v3038_v22 = vadd.f32 %v5203_v2, %v3037_v63  ;;  %v4934_v63 = vld [vmem:[#allocation17 + $0x34] sm:$0xf0] }
 0xb80   : > { %v3068_v49 = vadd.f32 %v5205_v37, %v3067_v52  ;;  %v4677_v52 = vld [vmem:[#allocation17 + $0x38] sm:$0xf0]  ;;  %3411 = vmatpush.bf16.msrb.mxu1 %v4688_v43 }
 0xb81   : > { %v3042_v24 = vsel %vm3041_vm15, %v5203_v2, %v3038_v22  ;;  %v4683_v2 = vld [vmem:[#allocation17 + $0x40] sm:$0xf]  ;;  %v4676_v22 = vor.u32 %v4934_v63, %v4675_v50 }
 0xb82   : > { %v3047_v7 = vsel %vm3044_vm6, %v3046_v17, %v3042_v24  ;;  %v3072_v18 = vsel %vm3071_vm2, %v5205_v37, %v3068_v49  ;;  %v4936_v37 = vld [vmem:[#allocation17 + $0x44] sm:$0xf0]  ;;  %v4680_v24 = vor.u32 %v4933_v58, %v4677_v52 }
 0xb83   : > { %v3077_v42 = vsel %vm3074_vm3, %v3076_v28, %v3072_v18  ;;  %v3080_v48 = vmul.f32 %v3047_v7, %v3000_v39  ;;  %v4938_v39 = vld [vmem:[#allocation17 + $0x54] sm:$0xf0]  ;;  %v4684_v14 = vor.u32 %v4936_v37, %v4683_v2  ;;  %v4667_v28 = vld [vmem:[#allocation17 + $0x20] sm:$0xf]  ;;  %v4932_v7 = vld [vmem:[#allocation17 + $0x24] sm:$0xf0] }
 0xb84   : > { %v3082_v9 = vmul.f32 %v3077_v42, %v3002_v44  ;;  %v4692_v15 = vor.u32 %v4938_v39, %v4691_v0  ;;  %v4931_v42 = vld [vmem:[#allocation17 + $0x24] sm:$0xf]  ;;  %3412 = vmatpush.bf16.msrb.mxu1 %v4680_v24  ;;  %v3245_v39 = vld [vmem:[#allocation5 + $0x40] ss:$0 sm:$0xff] }
 0xb86   : > { %v3084_v26 = vpack.c.bf16 %v3082_v9, %v3080_v48  ;;  %3396 = vmatpush.bf16.msrb.mxu0 %v4692_v15  ;;  %v4669_v48 = vld [vmem:[#allocation17 + $0x28] sm:$0xf0]  ;;  %v3308_v15 = vld [vmem:[#allocation5 + $0x41] ss:$8 sm:$0x3] }
 0xb88   : > { %3236 = vmatmul.bf16.vlgmr.msrb.gmra.mxu3 %v3084_v26  ;;  %v4668_v26 = vor.u32 %v4932_v7, %v4667_v28 }
 0xb8a   : > { %3397 = vmatpush.bf16.msrb.mxu0 %v4684_v14  ;;  %v3311_v14 = vperm.slane %v3308_v15, 1 }
 0xb8e   : > { %3398 = vmatpush.bf16.msrb.mxu0 %v4676_v22 }
 0xb92   : > { %3399 = vmatpush.bf16.msrb.mxu0 %v4668_v26 }
 0xbd1   : > { %v3223_v46 = vpop.f32.mrf.mxu2 }
 0xbd2   : > { %v3224_v5 = vadd.f32 %v3223_v46, %v3117_v6  ;;  %v4672_v46 = vor.u32 %v4931_v42, %v4669_v48 }
 0xbd4   : > { %3413 = vmatpush.bf16.msrb.mxu1 %v4672_v46 }
 0xbd9   : > { %v3225_v57 = vpop.f32.mrf.mxu2 }
 0xbda   : > { %v3226_v56 = vadd.f32 %v3225_v57, %v3117_v6  ;;  %v4659_v6 = vld [vmem:[#allocation17 + $0x10] sm:$0xf]  ;;  %v4661_v57 = vld [vmem:[#allocation17 + $0x18] sm:$0xf0] }
 0xc0b   : > { %v3237_v25 = vpop.f32.mrf.mxu3 }
 0xc0c   : > { %v3238_v35 = vadd.f32 %v3237_v25, %v3224_v5  ;;  %v4930_v5 = vld [vmem:[#allocation17 + $0x14] sm:$0xf0] }
 0xc0e   : > { %v6900_v1 = vadd.f32 %v3238_v35, %v6095_v12  ;;  %v4929_v35 = vld [vmem:[#allocation17 + $0x14] sm:$0xf] }
 0xc10   : > { %3246 = vadd.xlane.f32.xlu1 %v6900_v1 }
 0xc13   : > { %v3239_v21 = vpop.f32.mrf.mxu3 }
 0xc14   : > { %v3240_v31 = vadd.f32 %v3239_v21, %v3226_v56  ;;  %v4660_v21 = vor.u32 %v4930_v5, %v4659_v6 }
 0xc16   : > { %v6904_v34 = vadd.f32 %v3240_v31, %v6099_v27  ;;  %3400 = vmatpush.bf16.msrb.mxu0 %v4660_v21 }
 0xc18   : > { %3248 = vadd.xlane.f32.xlu2 %v6904_v34 }
 0xc83   : > { %v3247_v32 = vpop.xlane.xlu1 %3246 }
 0xc84   : > { %v3250_v3 = vmul.f32 %v3247_v32, %v7136_v19  ;;  %v4664_v32 = vor.u32 %v4929_v35, %v4661_v57 }
 0xc86   : > { %v6909_v38 = vsub.f32 %v6900_v1, %v3250_v3  ;;  %v4651_v3 = vld [vmem:[#allocation17] sm:$0xf]  ;;  %3414 = vmatpush.bf16.msrb.mxu1 %v4664_v32 }
 0xc88   : > { %v3254_v12 = vmul.f32 %v6909_v38, %v6909_v38 }
 0xc8a   : > { %3256 = vadd.xlane.f32.xlu0 %v3254_v12  ;;  %v4928_v12 = vld [vmem:[#allocation17 + $0x4] sm:$0xf0] }
 0xc8b   : > { %v3249_v40 = vpop.xlane.xlu2 %3248  ;;  %v4652_v16 = vor.u32 %v4928_v12, %v4651_v3 }
 0xc8c   : > { %v3251_v55 = vmul.f32 %v3249_v40, %v7136_v19 }
 0xc8d   : > { %3401 = vmatpush.bf16.msrb.mxu0 %v4652_v16 }
 0xc8e   : > { %v6915_v47 = vsub.f32 %v6904_v34, %v3251_v55 }
 0xc90   : > { %v3255_v27 = vmul.f32 %v6915_v47, %v6915_v47 }
 0xc92   : > { %3258 = vadd.xlane.f32.xlu1 %v3255_v27  ;;  %v4927_v27 = vld [vmem:[#allocation17 + $0x4] sm:$0xf] }
 0xc93   : > { %v4656_v61 = vor.u32 %v4927_v27, %v4653_v10 }
 0xc95   : > { %3415 = vmatpush.bf16.msrb.mxu1 %v4656_v61 }
 0xcfd   : > { %v3257_v60 = vpop.xlane.xlu0 %3256 }
 0xcfe   : > { %v3260_v44 = vmul.f32 %v3257_v60, %v7136_v19  ;;  %v3244_v60 = vld [vmem:[#allocation5 + $0x27] ss:$0 sm:$0xff] }
 0xd00   : > { %v3262_v4 = vadd.f32 1e-05, %v3260_v44 }
 0xd02   : > { %5206 = vrsqrt.f32 %v3262_v4  ;;  %vm3270_vm10 = vweird.f32 %v3262_v4 }
 0xd05   : > { %v3259_v45 = vpop.xlane.xlu1 %3258 }
 0xd06   : > { %v3261_v59 = vmul.f32 %v3259_v45, %v7136_v19 }
 0xd08   : > { %v5207_v17 = vpop.eup %5206  ;;  %v3263_v49 = vadd.f32 1e-05, %v3261_v59 }
 0xd09   : > { %v3265_v18 = vmul.f32 %v5207_v17, %v3262_v4  ;;  %vm3271_vm7 = vweird.f32 %v5207_v17  ;;  %v3310_v4 = vperm.slane %v3308_v15, 0 }
 0xd0a   : > { %5208 = vrsqrt.f32 %v3263_v49  ;;  %vm3272_vm11 = vmor %vm3270_vm10, %vm3271_vm7  ;;  %vm3280_vm1 = vweird.f32 %v3263_v49 }
 0xd0b   : > { %v3266_v9 = vmul.f32 %v5207_v17, %v3265_v18 }
 0xd0d   : > { %v3267_v25 = vmul.f32 0.5, %v3266_v9 }
 0xd0f   : > { %v3268_v56 = vsub.f32 1.5, %v3267_v25 }
 0xd10   : > { %v5209_v31 = vpop.eup %5208 }
 0xd11   : > { %v3269_v40 = vmul.f32 %v5207_v17, %v3268_v56  ;;  %v3275_v55 = vmul.f32 %v5209_v31, %v3263_v49  ;;  %vm3281_vm0 = vweird.f32 %v5209_v31 }
 0xd12   : > { %vm3282_vm14 = vmor %vm3280_vm1, %vm3281_vm0 }
 0xd13   : > { %v3276_v29 = vmul.f32 %v5209_v31, %v3275_v55  ;;  %v3273_v53 = vsel %vm3272_vm11, %v5207_v17, %v3269_v40 }
 0xd14   : > { %v3284_v41 = vmul.f32 %v3273_v53, %v6909_v38 }
 0xd15   : > { %v3277_v23 = vmul.f32 0.5, %v3276_v29 }
 0xd16   : > { %v3286_v0 = vmul.f32 %v3284_v41, %v3244_v60 }
 0xd17   : > { %v3278_v51 = vsub.f32 1.5, %v3277_v23 }
 0xd18   : > { %v3288_v30 = vadd.f32 %v3286_v0, %v3245_v39 }
 0xd19   : > { %v3279_v54 = vmul.f32 %v5209_v31, %v3278_v51 }
 0xd1b   : > { %v3283_v8 = vsel %vm3282_vm14, %v5209_v31, %v3279_v54 }
 0xd1c   : > { %v3285_v13 = vmul.f32 %v3283_v8, %v6915_v47 }
 0xd1e   : > { %v3287_v44 = vmul.f32 %v3285_v13, %v3244_v60 }
 0xd20   : > { %v3289_v62 = vadd.f32 %v3287_v44, %v3245_v39 }
 0xd22   : > { %v3290_v11 = vpack.c.bf16 %v3289_v62, %v3288_v30 }
 0xd24   : > { %3402 = vmatmul.bf16.vlgmr.msrb.gmra.mxu0 %v3290_v11  ;;  %3416 = vmatmul.bf16.vlgmr.msrb.gmra.mxu1 %v3290_v11 }
 0xda1   : > { %v3403_v33 = vpop.f32.mrf.mxu0  ;;  %v3417_v50 = vpop.f32.mrf.mxu1 }
 0xda2   : > { %v6923_v38 = vadd.f32 %v3403_v33, %v3310_v4  ;;  %v6929_v63 = vadd.f32 %v3417_v50, %v3311_v14 }
 0xda4   : > { %v6926_v2 = vmul.f32 0.70710677, %v6923_v38  ;;  %v6932_v52 = vmul.f32 0.70710677, %v6929_v63 }
 0xda6   : > { %v3430_v37 = vand.u32 2147483647, %v6926_v2  ;;  %v3431_v17 = vand.u32 2147483647, %v6932_v52 }
 0xda8   : > { %v3434_v20 = vmul.f32 0.3275911, %v3430_v37  ;;  %v3435_v28 = vmul.f32 0.3275911, %v3431_v17  ;;  %v3538_v53 = vsub.f32 0.0, %v3430_v37  ;;  %v3539_v41 = vsub.f32 0.0, %v3431_v17 }
 0xda9   : > { %v3405_v18 = vpop.f32.mrf.mxu0  ;;  %v3419_v42 = vpop.f32.mrf.mxu1 }
 0xdaa   : > { %v3438_v47 = vadd.f32 1.0, %v3434_v20  ;;  %v3439_v9 = vadd.f32 1.0, %v3435_v28  ;;  %v6937_v26 = vadd.f32 %v3405_v18, %v3310_v4  ;;  %v6940_v6 = vadd.f32 %v3419_v42, %v3311_v14  ;;  %v4958_v28 = vld [vmem:[#allocation19 + $0x78] sm:$0xff] }
 0xdab   : > { %v3542_v13 = vmul.f32 %v3538_v53, %v3430_v37  ;;  %v3543_v62 = vmul.f32 %v3539_v41, %v3431_v17  ;;  %3727 = vmatpush.bf16.msra.mxu3 %v4958_v28  ;;  %v4948_v53 = vld [vmem:[#allocation19 + $0x28] sm:$0xff] }
 0xdac   : > { %5210 = vrcp.f32 %v3438_v47  ;;  %v3453_v58 = vand.u32 2147483648, %v3438_v47  ;;  %v3451_v22 = vand.u32 2147483647, %v3438_v47  ;;  %vm3447_vm8 = vweird.f32 %v3438_v47 }
 0xdad   : > { %5212 = vrcp.f32 %v3439_v9  ;;  %v6943_v5 = vmul.f32 0.70710677, %v6937_v26  ;;  %v6946_v25 = vmul.f32 0.70710677, %v6940_v6  ;;  %v3466_v10 = vand.u32 2147483647, %v3439_v9 }
 0xdae   : > { %v3454_v24 = vor.u32 1.1754944e-38, %v3453_v58  ;;  %vm3452_vm12 = vcmp.eq.f32.partialorder %v3451_v22, 8.507059e+37  ;;  %v3468_v29 = vand.u32 2147483648, %v3439_v9  ;;  %vm3462_vm15 = vweird.f32 %v3439_v9 }
 0xdaf   : > { %v6949_v57 = vand.u32 2147483647, %v6943_v5  ;;  %v6952_v56 = vand.u32 2147483647, %v6946_v25  ;;  %vm3467_vm6 = vcmp.eq.f32.partialorder %v3466_v10, 8.507059e+37 }
 0xdb0   : > { %v3469_v51 = vor.u32 1.1754944e-38, %v3468_v29  ;;  %v3546_v20 = vmul.f32 1.442695, %v3542_v13 }
 0xdb1   : > { %v3436_v31 = vmul.f32 0.3275911, %v6949_v57  ;;  %v3437_v32 = vmul.f32 0.3275911, %v6952_v56  ;;  %v3540_v18 = vsub.f32 0.0, %v6949_v57 }
 0xdb2   : > { %v5211_v36 = vpop.eup %5210 }
 0xdb3   : > { %v3443_v43 = vmul.f32 %v5211_v36, %v3438_v47  ;;  %vm3448_vm13 = vweird.f32 %v5211_v36  ;;  %v5213_v21 = vpop.eup %5212  ;;  %v3440_v40 = vadd.f32 1.0, %v3436_v31  ;;  %v6957_v55 = vadd.f32 1.0, %v3437_v32  ;;  %v4957_v31 = vld [vmem:[#allocation19 + $0x70] sm:$0xff] }
 0xdb4   : > { %vm3449_vm9 = vmor %vm3447_vm8, %vm3448_vm13  ;;  %v3458_v12 = vmul.f32 %v5213_v21, %v3439_v9  ;;  %vm3463_vm4 = vweird.f32 %v5213_v21  ;;  %3728 = vmatpush.bf16.msra.mxu3 %v4957_v31  ;;  %v4952_v31 = vld [vmem:[#allocation19 + $0x48] sm:$0xff]  ;;  %vm3562_vm13 = vcmp.ge.f32.partialorder %v6926_v2, 0.0  ;;  %vm3563_vm8 = vcmp.ge.f32.partialorder %v6932_v52, 0.0 }
 0xdb5   : > { %v3444_v45 = vsub.f32 1.0, %v3443_v43  ;;  %5214 = vrcp.f32 %v3440_v40  ;;  %vm3464_vm5 = vmor %vm3462_vm15, %vm3463_vm4  ;;  %v3481_v47 = vand.u32 2147483647, %v3440_v40  ;;  %v3498_v37 = vand.u32 2147483648, %v6957_v55 }
 0xdb6   : > { %v3459_v27 = vsub.f32 1.0, %v3458_v12  ;;  %5216 = vrcp.f32 %v6957_v55  ;;  %vm3477_vm7 = vweird.f32 %v3440_v40  ;;  %vm3492_vm11 = vweird.f32 %v6957_v55 }
 0xdb7   : > { %v3445_v59 = vmul.f32 %v5211_v36, %v3444_v45  ;;  %v3548_v45 = vmul.f32 1.442695, %v3543_v62  ;;  %vm3482_vm0 = vcmp.eq.f32.partialorder %v3481_v47, 8.507059e+37  ;;  %v3541_v12 = vsub.f32 0.0, %v6952_v56  ;;  %v4947_v62 = vld [vmem:[#allocation19 + $0x20] sm:$0xff] }
 0xdb8   : > { %v3460_v61 = vmul.f32 %v5213_v21, %v3459_v27  ;;  %5218 = vpow2.f32 %v3546_v20  ;;  %v3422_v2 = vmul.f32 0.5, %v6923_v38  ;;  %v3424_v52 = vmul.f32 0.5, %v6937_v26  ;;  %v3616_v38 = vld [vmem:[#allocation5 + $0x42] ss:$0 sm:$0xff] }
 0xdb9   : > { %v3446_v49 = vadd.f32 %v5211_v36, %v3445_v59  ;;  %v3496_v59 = vand.u32 2147483647, %v6957_v55  ;;  %5220 = vpow2.f32 %v3548_v45  ;;  %v3545_v13 = vmul.f32 %v3541_v12, %v6952_v56  ;;  %v4946_v56 = vld [vmem:[#allocation19 + $0x18] sm:$0xff] }
 0xdba   : > { %v3461_v23 = vadd.f32 %v5213_v21, %v3460_v61 }
 0xdbb   : > { %v3450_v7 = vsel %vm3449_vm9, %v5211_v36, %v3446_v49  ;;  %v5215_v8 = vpop.eup %5214  ;;  %v3483_v36 = vand.u32 2147483648, %v3440_v40  ;;  %vm3497_vm14 = vcmp.eq.f32.partialorder %v3496_v59, 8.507059e+37  ;;  %vm3564_vm9 = vcmp.ge.f32.partialorder %v6943_v5, 0.0 }
 0xdbc   : > { %v6935_v48 = vsel %vm3452_vm12, %v3454_v24, %v3450_v7  ;;  %v3465_v60 = vsel %vm3464_vm5, %v5213_v21, %v3461_v23  ;;  %v5217_v39 = vpop.eup %5216  ;;  %v3473_v30 = vmul.f32 %v5215_v8, %v3440_v40  ;;  %vm3478_vm2 = vweird.f32 %v5215_v8  ;;  %v4950_v24 = vld [vmem:[#allocation19 + $0x38] sm:$0xff]  ;;  %v4949_v21 = vld [vmem:[#allocation19 + $0x30] sm:$0xff]  ;;  %v4956_v23 = vld [vmem:[#allocation19 + $0x68] sm:$0xff] }
 0xdbd   : > { %v3502_v46 = vmul.f32 1.0614054, %v6935_v48  ;;  %v6961_v0 = vsel %vm3467_vm6, %v3469_v51, %v3465_v60  ;;  %v3488_v11 = vmul.f32 %v5217_v39, %v6957_v55  ;;  %vm3493_vm3 = vweird.f32 %v5217_v39  ;;  %vm3479_vm10 = vmor %vm3477_vm7, %vm3478_vm2  ;;  %3713 = vmatpush.bf16.msra.mxu2 %v4950_v24  ;;  %3729 = vmatpush.bf16.msra.mxu3 %v4956_v23 }
 0xdbe   : > { %v3503_v44 = vmul.f32 1.0614054, %v6961_v0  ;;  %v3474_v33 = vsub.f32 1.0, %v3473_v30  ;;  %v3484_v7 = vor.u32 1.1754944e-38, %v3483_v36  ;;  %vm3494_vm1 = vmor %vm3492_vm11, %vm3493_vm3  ;;  %v3544_v51 = vmul.f32 %v3540_v18, %v6949_v57 }
 0xdbf   : > { %v3506_v35 = vadd.f32 -1.4531521, %v3502_v46  ;;  %v3489_v14 = vsub.f32 1.0, %v3488_v11  ;;  %v4955_v11 = vld [vmem:[#allocation19 + $0x60] sm:$0xff]  ;;  %v3552_v36 = vmul.f32 1.442695, %v3545_v13 }
 0xdc0   : > { %v3507_v4 = vadd.f32 -1.4531521, %v3503_v44  ;;  %v3475_v50 = vmul.f32 %v5215_v8, %v3474_v33  ;;  %vm3565_vm12 = vcmp.ge.f32.partialorder %v6946_v25, 0.0 }
 0xdc1   : > { %v3510_v3 = vmul.f32 %v3506_v35, %v6935_v48  ;;  %v3490_v58 = vmul.f32 %v5217_v39, %v3489_v14  ;;  %v3499_v35 = vor.u32 1.1754944e-38, %v3498_v37  ;;  %3714 = vmatpush.bf16.msra.mxu2 %v4949_v21  ;;  %3730 = vmatpush.bf16.msra.mxu3 %v4955_v11  ;;  %v4944_v21 = vld [vmem:[#allocation19 + $0x8] sm:$0xff] }
 0xdc2   : > { %v3511_v43 = vmul.f32 %v3507_v4, %v6961_v0  ;;  %v3476_v49 = vadd.f32 %v5215_v8, %v3475_v50  ;;  %v3550_v4 = vmul.f32 1.442695, %v3544_v51  ;;  %v4954_v50 = vld [vmem:[#allocation19 + $0x58] sm:$0xff] }
 0xdc3   : > { %v3514_v16 = vadd.f32 1.4214138, %v3510_v3  ;;  %v3491_v42 = vadd.f32 %v5217_v39, %v3490_v58 }
 0xdc4   : > { %v3515_v17 = vadd.f32 1.4214138, %v3511_v43  ;;  %v3480_v46 = vsel %vm3479_vm10, %v5215_v8, %v3476_v49  ;;  %5222 = vpow2.f32 %v3550_v4  ;;  %v4953_v49 = vld [vmem:[#allocation19 + $0x50] sm:$0xff] }
 0xdc5   : > { %v3518_v54 = vmul.f32 %v3514_v16, %v6935_v48  ;;  %v3485_v32 = vsel %vm3482_vm0, %v3484_v7, %v3480_v46  ;;  %v3495_v3 = vsel %vm3494_vm1, %v5217_v39, %v3491_v42  ;;  %3715 = vmatpush.bf16.msra.mxu2 %v4948_v53  ;;  %5224 = vpow2.f32 %v3552_v36  ;;  %3731 = vmatpush.bf16.msra.mxu3 %v4954_v50 }
 0xdc6   : > { %v3519_v9 = vmul.f32 %v3515_v17, %v6961_v0  ;;  %v3504_v10 = vmul.f32 1.0614054, %v3485_v32  ;;  %v3500_v55 = vsel %vm3497_vm14, %v3499_v35, %v3495_v3  ;;  %v4945_v17 = vld [vmem:[#allocation19 + $0x10] sm:$0xff] }
 0xdc7   : > { %v3522_v15 = vadd.f32 -0.28449672, %v3518_v54  ;;  %v3505_v29 = vmul.f32 1.0614054, %v3500_v55 }
 0xdc8   : > { %v3523_v27 = vadd.f32 -0.28449672, %v3519_v9  ;;  %v3508_v61 = vadd.f32 -1.4531521, %v3504_v10 }
 0xdc9   : > { %v3526_v22 = vmul.f32 %v3522_v15, %v6935_v48  ;;  %v3509_v41 = vadd.f32 -1.4531521, %v3505_v29  ;;  %v5219_v15 = vpop.eup %5218  ;;  %3716 = vmatpush.bf16.msra.mxu2 %v4947_v62  ;;  %3732 = vmatpush.bf16.msra.mxu3 %v4953_v49 }
 0xdca   : > { %v3527_v16 = vmul.f32 %v3523_v27, %v6961_v0  ;;  %v3512_v8 = vmul.f32 %v3508_v61, %v3485_v32  ;;  %v5221_v20 = vpop.eup %5220 }
 0xdcb   : > { %v3530_v40 = vadd.f32 0.2548296, %v3526_v22  ;;  %v3513_v39 = vmul.f32 %v3509_v41, %v3500_v55  ;;  %v5223_v18 = vpop.eup %5222 }
 0xdcc   : > { %v3531_v60 = vadd.f32 0.2548296, %v3527_v16  ;;  %v3516_v30 = vadd.f32 1.4214138, %v3512_v8  ;;  %v5225_v46 = vpop.eup %5224 }
 0xdcd   : > { %v3534_v54 = vmul.f32 %v3530_v40, %v6935_v48  ;;  %v3517_v33 = vadd.f32 1.4214138, %v3513_v39  ;;  %3717 = vmatpush.bf16.msra.mxu2 %v4946_v56  ;;  %3733 = vmatpush.bf16.msra.mxu3 %v4952_v31 }
 0xdce   : > { %v3535_v44 = vmul.f32 %v3531_v60, %v6961_v0  ;;  %v3520_v47 = vmul.f32 %v3516_v30, %v3485_v32  ;;  %v3425_v60 = vmul.f32 0.5, %v6940_v6 }
 0xdcf   : > { %v3554_v57 = vmul.f32 %v5219_v15, %v3534_v54  ;;  %v3521_v14 = vmul.f32 %v3517_v33, %v3500_v55  ;;  %v3423_v54 = vmul.f32 0.5, %v6929_v63 }
 0xdd0   : > { %v3555_v48 = vmul.f32 %v5221_v20, %v3535_v44  ;;  %v3524_v43 = vadd.f32 -0.28449672, %v3520_v47 }
 0xdd1   : > { %v3525_v0 = vadd.f32 -0.28449672, %v3521_v14  ;;  %v3558_v37 = vsub.f32 1.0, %v3554_v57  ;;  %3718 = vmatpush.bf16.msra.mxu2 %v4945_v17 }
 0xdd2   : > { %v3528_v45 = vmul.f32 %v3524_v43, %v3485_v32  ;;  %v3559_v58 = vsub.f32 1.0, %v3555_v48 }
 0xdd3   : > { %v3529_v59 = vmul.f32 %v3525_v0, %v3500_v55  ;;  %v3566_v28 = vsub.f32 0.0, %v3558_v37 }
 0xdd4   : > { %v3532_v22 = vadd.f32 0.2548296, %v3528_v45  ;;  %v3567_v42 = vsub.f32 0.0, %v3559_v58 }
 0xdd5   : > { %v3533_v24 = vadd.f32 0.2548296, %v3529_v59  ;;  %v3570_v12 = vsel %vm3562_vm13, %v3558_v37, %v3566_v28  ;;  %3719 = vmatpush.bf16.msra.mxu2 %v4944_v21 }
 0xdd6   : > { %v3536_v7 = vmul.f32 %v3532_v22, %v3485_v32  ;;  %v3571_v27 = vsel %vm3563_vm8, %v3559_v58, %v3567_v42  ;;  %v4943_v32 = vld [vmem:[#allocation19] sm:$0xff]  ;;  %v3574_v16 = vadd.f32 1.0, %v3570_v12 }
 0xdd7   : > { %v3537_v9 = vmul.f32 %v3533_v24, %v3500_v55  ;;  %v4951_v55 = vld [vmem:[#allocation19 + $0x40] sm:$0xff]  ;;  %v3575_v53 = vadd.f32 1.0, %v3571_v27 }
 0xdd8   : > { %v3556_v35 = vmul.f32 %v5223_v18, %v3536_v7  ;;  %3734 = vmatpush.bf16.msra.mxu3 %v4951_v55  ;;  %v3578_v13 = vmul.f32 %v3574_v16, %v3422_v2 }
 0xdd9   : > { %v3557_v3 = vmul.f32 %v5225_v46, %v3537_v9  ;;  %3720 = vmatpush.bf16.msra.mxu2 %v4943_v32  ;;  %v3579_v39 = vmul.f32 %v3575_v53, %v3423_v54  ;;  %v3741_v9 = vld [vmem:[#allocation5 + $0x43] ss:$0 sm:$0xff] }
 0xdda   : > { %v3560_v40 = vsub.f32 1.0, %v3556_v35 }
 0xddb   : > { %v3561_v10 = vsub.f32 1.0, %v3557_v3 }
 0xddc   : > { %v3568_v29 = vsub.f32 0.0, %v3560_v40 }
 0xddd   : > { %v3569_v61 = vsub.f32 0.0, %v3561_v10 }
 0xdde   : > { %v3572_v23 = vsel %vm3564_vm9, %v3560_v40, %v3568_v29 }
 0xddf   : > { %v3576_v51 = vadd.f32 1.0, %v3572_v23  ;;  %v3573_v41 = vsel %vm3565_vm12, %v3561_v10, %v3569_v61 }
 0xde0   : > { %v3577_v8 = vadd.f32 1.0, %v3573_v41 }
 0xde1   : > { %v3580_v5 = vmul.f32 %v3576_v51, %v3424_v52 }
 0xde2   : > { %v3581_v44 = vmul.f32 %v3577_v8, %v3425_v60 }
 0xde3   : > { %v3582_v30 = vpack.c.bf16 %v3580_v5, %v3578_v13 }
 0xde4   : > { %v3583_v62 = vpack.c.bf16 %v3581_v44, %v3579_v39 }
 0xde5   : > { %3721 = vmatmul.bf16.vlgmr.msra.gmra.mxu2 %v3582_v30 }
 0xde6   : > { %3735 = vmatmul.bf16.vlgmr.msra.gmra.mxu3 %v3583_v62 }
 0xe68   : > { %v3722_v25 = vpop.f32.mrf.mxu2 }
 0xe69   : > { %v3723_v26 = vadd.f32 %v3722_v25, %v3616_v38  ;;  %v3736_v11 = vpop.f32.mrf.mxu3 }
 0xe6b   : > { %v3737_v15 = vadd.f32 %v3736_v11, %v3723_v26 }
 0xe6d   : > { %3743 = vadd.xlane.f32.xlu2 %v3737_v15 }
 0xe70   : > { %v3724_v63 = vpop.f32.mrf.mxu2 }
 0xe71   : > { %v3725_v4 = vadd.f32 %v3724_v63, %v3616_v38  ;;  %v3738_v6 = vpop.f32.mrf.mxu3 }
 0xe73   : > { %v3739_v33 = vadd.f32 %v3738_v6, %v3725_v4 }
 0xe75   : > { %3745 = vadd.xlane.f32.xlu0 %v3739_v33 }
 0xee0   : > { %v3744_v20 = vpop.xlane.xlu2 %3743 }
 0xee1   : > { %v3747_v57 = vmul.f32 %v3744_v20, %v7136_v19 }
 0xee3   : > { %v3749_v47 = vsub.f32 %v3737_v15, %v3747_v57 }
 0xee5   : > { %v3751_v36 = vmul.f32 %v3749_v47, %v3749_v47 }
 0xee7   : > { %3753 = vadd.xlane.f32.xlu1 %v3751_v36 }
 0xee8   : > { %v3746_v48 = vpop.xlane.xlu0 %3745 }
 0xee9   : > { %v3748_v14 = vmul.f32 %v3746_v48, %v7136_v19 }
 0xeeb   : > { %v3750_v43 = vsub.f32 %v3739_v33, %v3748_v14 }
 0xeed   : > { %v3752_v56 = vmul.f32 %v3750_v43, %v3750_v43 }
 0xeef   : > { %3755 = vadd.xlane.f32.xlu2 %v3752_v56 }
 0xf5a   : > { %v3754_v50 = vpop.xlane.xlu1 %3753 }
 0xf5b   : > { %v3757_v0 = vmul.f32 %v3754_v50, %v7136_v19 }
 0xf5d   : > { %v3759_v37 = vadd.f32 1e-05, %v3757_v0 }
 0xf5f   : > { %5226 = vrsqrt.f32 %v3759_v37  ;;  %vm3767_vm15 = vweird.f32 %v3759_v37 }
 0xf62   : > { %v3756_v45 = vpop.xlane.xlu2 %3755 }
 0xf63   : > { %v3758_v58 = vmul.f32 %v3756_v45, %v7136_v19  ;;  %v3742_v19 = vld [vmem:[#allocation5 + $0x44] ss:$0 sm:$0xff] }
 0xf65   : > { %v5227_v59 = vpop.eup %5226  ;;  %v3760_v22 = vadd.f32 1e-05, %v3758_v58 }
 0xf66   : > { %v3762_v17 = vmul.f32 %v5227_v59, %v3759_v37  ;;  %vm3768_vm4 = vweird.f32 %v5227_v59 }
 0xf67   : > { %5228 = vrsqrt.f32 %v3760_v22  ;;  %vm3769_vm5 = vmor %vm3767_vm15, %vm3768_vm4  ;;  %vm3777_vm2 = vweird.f32 %v3760_v22 }
 0xf68   : > { %v3763_v49 = vmul.f32 %v5227_v59, %v3762_v17 }
 0xf6a   : > { %v3764_v24 = vmul.f32 0.5, %v3763_v49 }
 0xf6c   : > { %v3765_v28 = vsub.f32 1.5, %v3764_v24 }
 0xf6d   : > { %v5229_v7 = vpop.eup %5228 }
 0xf6e   : > { %v3766_v18 = vmul.f32 %v5227_v59, %v3765_v28  ;;  %v3772_v42 = vmul.f32 %v5229_v7, %v3760_v22  ;;  %vm3778_vm6 = vweird.f32 %v5229_v7 }
 0xf6f   : > { %vm3779_vm3 = vmor %vm3777_vm2, %vm3778_vm6 }
 0xf70   : > { %v3770_v46 = vsel %vm3769_vm5, %v5227_v59, %v3766_v18  ;;  %v3773_v35 = vmul.f32 %v5229_v7, %v3772_v42 }
 0xf71   : > { %v3781_v21 = vmul.f32 %v3770_v46, %v3749_v47 }
 0xf72   : > { %v3774_v31 = vmul.f32 0.5, %v3773_v35 }
 0xf73   : > { %v3783_v3 = vmul.f32 %v3781_v21, %v3741_v9 }
 0xf74   : > { %v3775_v12 = vsub.f32 1.5, %v3774_v31 }
 0xf75   : > { %v3785_v40 = vadd.f32 %v3783_v3, %v3742_v19 }
 0xf76   : > { %v3776_v27 = vmul.f32 %v5229_v7, %v3775_v12 }
 0xf77   : > { %v3787_v10 = vadd.f32 %v3785_v40, %v6900_v1 }
 0xf78   : > { %v3780_v29 = vsel %vm3779_vm3, %v5229_v7, %v3776_v27 }
 0xf79   : > { %v3782_v32 = vmul.f32 %v3780_v29, %v3750_v43  ;;  %3789 = vst [vmem:[%s571_s14] sm:$0xff] %v3787_v10 }
 0xf7b   : > { %v3784_v55 = vmul.f32 %v3782_v32, %v3741_v9 }
 0xf7d   : > { %v3786_v16 = vadd.f32 %v3784_v55, %v3742_v19 }
 0xf7f   : > { %v3788_v61 = vadd.f32 %v3786_v16, %v6904_v34 }
 0xf81   : > { %3790 = vst [vmem:[%s571_s14 + $0x8] sm:$0xff] %v3788_v61 }
 0xf82   : > { %5587 = shalt.err (!%p5584_p9)
}
 0xf83   : > { %s5669_s16 = smov 128   ;;  %s5670_s2 = smov 8  }
 0xf84   : > { %5002 = dma.vmem_to_hbm [thread:$0]  (%p5872_p4), %s3805_s1, 256, %s3807_s4, %s3792_s24, %s5669_s16, %s5669_s16, %s5670_s2  }
 0xf85 PF: > { %s3821_s3 = sand.u32 1, %s5634_s17   ;;  %p7137_p10 = scmp.ge.s32.totalorder %s5646_s20, 2 }
 0xf86   : > { %s3822_s25 = scalar_lea.sflag [#allocation4], %s3821_s3 }
 0xf87   : > { %p5040_p13 = pnand %p7137_p10, %p5876_p6 }
 0xf89   : > { %p5041_p11 = pneg %p5040_p13 }
 0xf8b   : > { %5629 = dma.done.wait (%p5041_p11), %s3822_s25, 256  }
 0xf8c   : > { %5631 = vsyncadd (%p5041_p11), %s3822_s25, 4294967040  ;;  %p29_p0 = scmp.ge.s32.totalorder %s5846_s28, 4   ;;  %s7138_s17 = smov %s5638_s18 }
 0xf8d   : > { %s7139_s18 = smov %s5642_s19  ;;  %s7140_s19 = smov %s5857_s30 }
 0xf8e   : > { %s7141_s20 = smov %s5846_s28  ;;  %31 = sbr.rel (!%p29_p0) target bundleno = 17 (0x11), region = 153 }
 0xf93   :  { %3828 = vsyncpa [#allocation3], 1 }
 0xf94   :  { %3830 = vsyncpa [#allocation3 + $0x1], 1 }
 0xf95   :  { %3831 = vsyncpa [#allocation6], 1 }
 0xf96   :  { %3832 = vsyncpa [#allocation9], 1 }
 0xf97   :  { %3833 = vsyncpa [#allocation12], 1 }
 0xf98   :  { %3834 = vsyncpa [#allocation15], 1 }
 0xf99   :  { %3835 = vsyncpa [#allocation18], 1 }
 0xf9a   :  { %3836 = vsyncpa [#allocation4], 1 }
 0xf9b   :  { %3838 = vsyncpa [#allocation4 + $0x1], 1 }

</bundles_post_ra>
